<compile_context>
chip_gen: v6e
topology: v6e:2x2x1
jax: 0.10.0
libtpu: 0.0.40
codegen_flags: <defaults>
</compile_context>

<pallas_src>
import math
import functools

import jax
import jax.numpy as jnp
from jax.experimental import pallas as pl
from jax.experimental.pallas import tpu as pltpu


VMEM_SPEC = pl.BlockSpec(memory_space=pltpu.MemorySpace.VMEM)
NEG_INF = -1e30


def _layer_norm(x, g, b, eps=1e-5):
    mu = jnp.mean(x, axis=-1, keepdims=True)
    var = jnp.mean(x * x, axis=-1, keepdims=True) - mu * mu   # independent reductions
    return (x - mu) * jax.lax.rsqrt(var + eps) * g + b


# ---------------------------------------------------------------------------
# Fused kernel: input proj -> pos-enc -> pre-LN -> 3 transformer blocks -> head
# ---------------------------------------------------------------------------
def _fused_predictor_kernel(
    x_ref, pe_ref, sbias_ref, kvmask_ref,
    enc_in_w_ref, enc_ln_g_ref, enc_ln_b_ref,
    q_w_ref, q_b_ref, k_w_ref, k_b_ref, v_w_ref, v_b_ref,
    proj_w_ref, proj_b_ref,
    ln1_g_ref, ln1_b_ref,
    ffn_w1_ref, ffn_b1_ref, ffn_w2_ref, ffn_b2_ref,
    ln2_g_ref, ln2_b_ref,
    out_w_ref, out_b_ref,
    o_ref,
    *, heads, num_blocks):

    bf16 = jnp.bfloat16
    f32 = jnp.float32

    # Precomputed constants (VMEM inputs, hoisted across all layers).
    kv_mask = kvmask_ref[...]                 # (R, D) f32: 1 iff head(row) == head(lane)
    kv_mask_b = kv_mask.astype(bf16)
    score_bias = sbias_ref[...]               # (BS, R) f32: 0 same-batch, -1e30 otherwise

    def attention(h, l):
        hb = h.astype(bf16)
        # 1/sqrt(head_dim) is folded into q_w / q_b offline.
        q = jnp.dot(hb, q_w_ref[l], preferred_element_type=f32) + q_b_ref[l]
        k = jnp.dot(hb, k_w_ref[l], preferred_element_type=f32) + k_b_ref[l]
        v = jnp.dot(hb, v_w_ref[l], preferred_element_type=f32) + v_b_ref[l]
        # Head-major block-diagonal K/V: row r = h*(B*S) + (b*S + j).
        k_blk = (jnp.concatenate([k] * heads, axis=0) * kv_mask).astype(bf16)   # (R, D)
        v_blk = (jnp.concatenate([v] * heads, axis=0) * kv_mask).astype(bf16)   # (R, D)
        # Single lane-dense score matmul for ALL batches & heads.
        s = jnp.einsum('id,rd->ir', q.astype(bf16), k_blk,
                       preferred_element_type=f32) + score_bias                 # (BS, R)
        s = s - jnp.max(s, axis=-1, keepdims=True)
        e = jnp.exp(s)                         # cross-batch entries underflow to exactly 0
        eb = e.astype(bf16)
        num = jnp.dot(eb, v_blk, preferred_element_type=f32)      # (BS, D)
        den = jnp.dot(eb, kv_mask_b, preferred_element_type=f32)  # per-(batch,head) sums
        # Clamp guards against a head fully underflowing under the shared row max.
        return num * pl.reciprocal(jnp.maximum(den, 1e-20), approx=True)

    # --- encoder stem: input projection + (pos-enc + bias, pre-folded) + pre-LN ---
    h = jnp.dot(x_ref[...].astype(bf16), enc_in_w_ref[...],
                preferred_element_type=f32) + pe_ref[...]
    h = _layer_norm(h, enc_ln_g_ref[...], enc_ln_b_ref[...])

    # --- stacked transformer blocks (encoder layers then decoder layers) ----------
    for l in range(num_blocks):
        a = attention(h, l)
        a = jnp.dot(a.astype(bf16), proj_w_ref[l],
                    preferred_element_type=f32) + proj_b_ref[l]
        h = _layer_norm(h + a, ln1_g_ref[l], ln1_b_ref[l])
        f = jnp.dot(h.astype(bf16), ffn_w1_ref[l],
                    preferred_element_type=f32) + ffn_b1_ref[l]
        f = jnp.maximum(f, 0.0)
        f = jnp.dot(f.astype(bf16), ffn_w2_ref[l],
                    preferred_element_type=f32) + ffn_b2_ref[l]
        h = _layer_norm(h + f, ln2_g_ref[l], ln2_b_ref[l])

    # --- decoder output head (lane-padded to 128 for unmasked stores) -------------
    o_ref[...] = jnp.dot(h.astype(bf16), out_w_ref[...],
                         preferred_element_type=f32) + out_b_ref[...]


# ---------------------------------------------------------------------------
# Wrapper: single pallas_call for the whole forward pass
# ---------------------------------------------------------------------------
def predictor_forward(x, params, num_heads=8):
    B, S, Fin = x.shape
    D = params['enc_in_w'].shape[1]
    L = params['qkv_w'].shape[0]
    dh = D // num_heads
    out_pad = params['dec_out_w'].shape[1]
    out_dim = params['out_dim']
    scale = 1.0 / math.sqrt(dh)
    bf16 = jnp.bfloat16

    # Split QKV into three 64-lane matmuls; fold 1/sqrt(head_dim) into Q.
    qkv_w, qkv_b = params['qkv_w'], params['qkv_b']
    q_w = (qkv_w[:, :, :D] * scale).astype(bf16)
    k_w = qkv_w[:, :, D:2 * D].astype(bf16)
    v_w = qkv_w[:, :, 2 * D:].astype(bf16)
    q_b = qkv_b[:, :, :D] * scale
    k_b = qkv_b[:, :, D:2 * D]
    v_b = qkv_b[:, :, 2 * D:]

    # Positional encoding pre-tiled to (B*S, D) with the input-proj bias folded in.
    pe_bias = jnp.tile(params['pe'][:S], (B, 1)) + params['enc_in_b']

    # Precomputed attention masks (row index r = h*(B*S) + b*S + j).
    BS, R = B * S, B * num_heads * S
    kv_mask = (jnp.arange(R)[:, None] // BS
               == jnp.arange(D)[None, :] // dh).astype(jnp.float32)          # (R, D)
    same_batch = (jnp.arange(BS)[:, None] // S) == ((jnp.arange(R)[None, :] % BS) // S)
    score_bias = jnp.where(same_batch, 0.0, NEG_INF).astype(jnp.float32)     # (BS, R)

    kernel = functools.partial(_fused_predictor_kernel, heads=num_heads, num_blocks=L)

    out = pl.pallas_call(
        kernel,
        out_shape=jax.ShapeDtypeStruct((BS, out_pad), jnp.float32),
        in_specs=[VMEM_SPEC] * 25,
        out_specs=VMEM_SPEC,
        compiler_params=pltpu.CompilerParams(vmem_limit_bytes=32 * 1024 * 1024),
    )(
        x.reshape(BS, Fin).astype(jnp.float32),
        pe_bias, score_bias, kv_mask,
        params['enc_in_w'].astype(bf16), params['enc_ln_g'], params['enc_ln_b'],
        q_w, q_b, k_w, k_b, v_w, v_b,
        params['proj_w'].astype(bf16), params['proj_b'],
        params['ln1_g'], params['ln1_b'],
        params['ffn_w1'].astype(bf16), params['ffn_b1'],
        params['ffn_w2'].astype(bf16), params['ffn_b2'],
        params['ln2_g'], params['ln2_b'],
        params['dec_out_w'].astype(bf16), params['dec_out_b'],
    )
    # slice off the lane padding outside the kernel
    return out[:, :out_dim].reshape(B, S, out_dim)


# ---------------------------------------------------------------------------
# Deterministic parameter init (xavier_uniform weights, zero biases, unit LN)
# ---------------------------------------------------------------------------
def _xavier(key, din, dout):
    a = math.sqrt(6.0 / (din + dout))
    return jax.random.uniform(key, (din, dout), jnp.float32, -a, a)


def init_params(key, input_size=5, hidden_size=64, output_size=61,
                num_layers=2, max_seq_length=5000):
    d = hidden_size
    n_blocks = num_layers + (num_layers - 1)   # encoder blocks + decoder blocks
    ks = jax.random.split(key, 2 + 4 * n_blocks)

    # sinusoidal positional-encoding buffer
    position = jnp.arange(max_seq_length, dtype=jnp.float32)[:, None]
    div_term = jnp.exp(jnp.arange(0, d, 2, dtype=jnp.float32) * (-math.log(10000.0) / d))
    pe = jnp.zeros((max_seq_length, d), jnp.float32)
    pe = pe.at[:, 0::2].set(jnp.sin(position * div_term))
    pe = pe.at[:, 1::2].set(jnp.cos(position * div_term))

    # per-block weights stacked along a leading layer axis
    qkv_w = jnp.stack([_xavier(ks[2 + 4 * i + 0], d, 3 * d) for i in range(n_blocks)])
    proj_w = jnp.stack([_xavier(ks[2 + 4 * i + 1], d, d) for i in range(n_blocks)])
    ffn_w1 = jnp.stack([_xavier(ks[2 + 4 * i + 2], d, 2 * d) for i in range(n_blocks)])
    ffn_w2 = jnp.stack([_xavier(ks[2 + 4 * i + 3], 2 * d, d) for i in range(n_blocks)])

    out_pad = 128  # lane-dense output head; columns >= output_size are zero & sliced off
    out_w = jnp.zeros((d, out_pad), jnp.float32)
    out_w = out_w.at[:, :output_size].set(_xavier(ks[1], d, output_size))

    return {
        'enc_in_w': _xavier(ks[0], input_size, d),
        'enc_in_b': jnp.zeros((1, d), jnp.float32),
        'pe': pe,
        'enc_ln_g': jnp.ones((1, d), jnp.float32),
        'enc_ln_b': jnp.zeros((1, d), jnp.float32),
        'qkv_w': qkv_w, 'qkv_b': jnp.zeros((n_blocks, 1, 3 * d), jnp.float32),
        'proj_w': proj_w, 'proj_b': jnp.zeros((n_blocks, 1, d), jnp.float32),
        'ln1_g': jnp.ones((n_blocks, 1, d), jnp.float32),
        'ln1_b': jnp.zeros((n_blocks, 1, d), jnp.float32),
        'ffn_w1': ffn_w1, 'ffn_b1': jnp.zeros((n_blocks, 1, 2 * d), jnp.float32),
        'ffn_w2': ffn_w2, 'ffn_b2': jnp.zeros((n_blocks, 1, d), jnp.float32),
        'ln2_g': jnp.ones((n_blocks, 1, d), jnp.float32),
        'ln2_b': jnp.zeros((n_blocks, 1, d), jnp.float32),
        'dec_out_w': out_w,
        'dec_out_b': jnp.zeros((1, out_pad), jnp.float32),
        'out_dim': output_size,
    }


# TODO(synk): chunked attention path (seq_len > chunk_size) of LinearAttention is not
# implemented; only the exact non-chunked softmax path used at these sizes is fused.

# ---------------------------------------------------------------------------
if __name__ == "__main__":
    key = jax.random.PRNGKey(0)
    k_param, k_x = jax.random.split(key)

    B, S, INPUT, HIDDEN, OUTPUT = 2, 8, 5, 64, 61
    params = init_params(k_param, input_size=INPUT, hidden_size=HIDDEN,
                         output_size=OUTPUT, num_layers=2, max_seq_length=64)

    x = jax.random.normal(k_x, (B, S, INPUT), jnp.float32)

    logits = predictor_forward(x, params, num_heads=8)
    jax.block_until_ready(logits)
    assert logits.shape == (B, S, OUTPUT)
    assert bool(jnp.all(jnp.isfinite(logits)))
    print("KERNEL_OK")
</pallas_src>

<mosaic_0001>
module attributes {stable_mosaic.version = 11 : i64} {
  func.func @_fused_predictor_kernel(%arg0: memref<16x5xf32, #tpu.memory_space<vmem>>, %arg1: memref<16x64xf32, #tpu.memory_space<vmem>>, %arg2: memref<16x128xf32, #tpu.memory_space<vmem>>, %arg3: memref<128x64xf32, #tpu.memory_space<vmem>>, %arg4: memref<5x64xbf16, #tpu.memory_space<vmem>>, %arg5: memref<1x64xf32, #tpu.memory_space<vmem>>, %arg6: memref<1x64xf32, #tpu.memory_space<vmem>>, %arg7: memref<3x64x64xbf16, #tpu.memory_space<vmem>>, %arg8: memref<3x1x64xf32, #tpu.memory_space<vmem>>, %arg9: memref<3x64x64xbf16, #tpu.memory_space<vmem>>, %arg10: memref<3x1x64xf32, #tpu.memory_space<vmem>>, %arg11: memref<3x64x64xbf16, #tpu.memory_space<vmem>>, %arg12: memref<3x1x64xf32, #tpu.memory_space<vmem>>, %arg13: memref<3x64x64xbf16, #tpu.memory_space<vmem>>, %arg14: memref<3x1x64xf32, #tpu.memory_space<vmem>>, %arg15: memref<3x1x64xf32, #tpu.memory_space<vmem>>, %arg16: memref<3x1x64xf32, #tpu.memory_space<vmem>>, %arg17: memref<3x64x128xbf16, #tpu.memory_space<vmem>>, %arg18: memref<3x1x128xf32, #tpu.memory_space<vmem>>, %arg19: memref<3x128x64xbf16, #tpu.memory_space<vmem>>, %arg20: memref<3x1x64xf32, #tpu.memory_space<vmem>>, %arg21: memref<3x1x64xf32, #tpu.memory_space<vmem>>, %arg22: memref<3x1x64xf32, #tpu.memory_space<vmem>>, %arg23: memref<64x128xbf16, #tpu.memory_space<vmem>>, %arg24: memref<1x128xf32, #tpu.memory_space<vmem>>, %arg25: memref<16x128xf32, #tpu.memory_space<vmem>>) attributes {dimension_semantics = [], scalar_prefetch = 0 : i64, scratch_operands = 0 : i64, tpu.core_type = #tpu.core_type<tc>} {
    %c0 = arith.constant 0 : index
    %c0_0 = arith.constant 0 : index
    %0 = vector.load %arg3[%c0, %c0_0] : memref<128x64xf32, #tpu.memory_space<vmem>>, vector<128x64xf32>
    %1 = arith.truncf %0 : vector<128x64xf32> to vector<128x64xbf16>
    %c0_1 = arith.constant 0 : index
    %c0_2 = arith.constant 0 : index
    %2 = vector.load %arg2[%c0_1, %c0_2] : memref<16x128xf32, #tpu.memory_space<vmem>>, vector<16x128xf32>
    %c0_3 = arith.constant 0 : index
    %c0_4 = arith.constant 0 : index
    %3 = vector.load %arg0[%c0_3, %c0_4] : memref<16x5xf32, #tpu.memory_space<vmem>>, vector<16x5xf32>
    %4 = arith.truncf %3 : vector<16x5xf32> to vector<16x5xbf16>
    %c0_5 = arith.constant 0 : index
    %c0_6 = arith.constant 0 : index
    %5 = vector.load %arg4[%c0_5, %c0_6] : memref<5x64xbf16, #tpu.memory_space<vmem>>, vector<5x64xbf16>
    %cst = arith.constant dense<0.000000e+00> : vector<16x64xf32>
    %6 = tpu.matmul %4, %5, %cst {dimension_numbers = #tpu.dot_dimension_numbers<[1], [0], [0], [1], [0, 0, 1, 1], [], []>} : vector<16x5xbf16>, vector<5x64xbf16>, vector<16x64xf32> -> vector<16x64xf32>
    %c0_7 = arith.constant 0 : index
    %c0_8 = arith.constant 0 : index
    %7 = vector.load %arg1[%c0_7, %c0_8] : memref<16x64xf32, #tpu.memory_space<vmem>>, vector<16x64xf32>
    %8 = arith.addf %6, %7 : vector<16x64xf32>
    %c0_9 = arith.constant 0 : index
    %c0_10 = arith.constant 0 : index
    %9 = vector.load %arg5[%c0_9, %c0_10] : memref<1x64xf32, #tpu.memory_space<vmem>>, vector<1x64xf32>
    %c0_11 = arith.constant 0 : index
    %c0_12 = arith.constant 0 : index
    %10 = vector.load %arg6[%c0_11, %c0_12] : memref<1x64xf32, #tpu.memory_space<vmem>>, vector<1x64xf32>
    %cst_13 = arith.constant dense<0.000000e+00> : vector<16xf32>
    %11 = vector.multi_reduction <add>, %8, %cst_13 [1] : vector<16x64xf32> to vector<16xf32>
    %12 = vector.shape_cast %11 : vector<16xf32> to vector<16x1xf32>
    %cst_14 = arith.constant 6.400000e+01 : f32
    %13 = vector.broadcast %cst_14 : f32 to vector<16x1xf32>
    %14 = arith.divf %12, %13 : vector<16x1xf32>
    %15 = arith.mulf %8, %8 : vector<16x64xf32>
    %cst_15 = arith.constant dense<0.000000e+00> : vector<16xf32>
    %16 = vector.multi_reduction <add>, %15, %cst_15 [1] : vector<16x64xf32> to vector<16xf32>
    %17 = vector.shape_cast %16 : vector<16xf32> to vector<16x1xf32>
    %cst_16 = arith.constant 6.400000e+01 : f32
    %18 = vector.broadcast %cst_16 : f32 to vector<16x1xf32>
    %19 = arith.divf %17, %18 : vector<16x1xf32>
    %20 = arith.mulf %14, %14 : vector<16x1xf32>
    %21 = arith.subf %19, %20 : vector<16x1xf32>
    %22 = vector.broadcast %14 : vector<16x1xf32> to vector<16x64xf32>
    %23 = arith.subf %8, %22 : vector<16x64xf32>
    %cst_17 = arith.constant 9.99999974E-6 : f32
    %24 = vector.broadcast %cst_17 : f32 to vector<16x1xf32>
    %25 = arith.addf %21, %24 : vector<16x1xf32>
    %26 = math.rsqrt %25 : vector<16x1xf32>
    %27 = vector.broadcast %26 : vector<16x1xf32> to vector<16x64xf32>
    %28 = arith.mulf %23, %27 : vector<16x64xf32>
    %29 = vector.broadcast %9 : vector<1x64xf32> to vector<16x64xf32>
    %30 = arith.mulf %28, %29 : vector<16x64xf32>
    %31 = vector.broadcast %10 : vector<1x64xf32> to vector<16x64xf32>
    %32 = arith.addf %30, %31 : vector<16x64xf32>
    %33 = arith.truncf %32 : vector<16x64xf32> to vector<16x64xbf16>
    %c0_18 = arith.constant 0 : index
    %c0_19 = arith.constant 0 : index
    %c0_20 = arith.constant 0 : index
    %34 = vector.load %arg7[%c0_18, %c0_19, %c0_20] : memref<3x64x64xbf16, #tpu.memory_space<vmem>>, vector<1x64x64xbf16>
    %35 = vector.shape_cast %34 : vector<1x64x64xbf16> to vector<64x64xbf16>
    %cst_21 = arith.constant dense<0.000000e+00> : vector<16x64xf32>
    %36 = tpu.matmul %33, %35, %cst_21 {dimension_numbers = #tpu.dot_dimension_numbers<[1], [0], [0], [1], [0, 0, 1, 1], [], []>} : vector<16x64xbf16>, vector<64x64xbf16>, vector<16x64xf32> -> vector<16x64xf32>
    %c0_22 = arith.constant 0 : index
    %c0_23 = arith.constant 0 : index
    %c0_24 = arith.constant 0 : index
    %37 = vector.load %arg8[%c0_22, %c0_23, %c0_24] : memref<3x1x64xf32, #tpu.memory_space<vmem>>, vector<1x1x64xf32>
    %38 = vector.shape_cast %37 : vector<1x1x64xf32> to vector<1x64xf32>
    %39 = vector.broadcast %38 : vector<1x64xf32> to vector<16x64xf32>
    %40 = arith.addf %36, %39 : vector<16x64xf32>
    %c0_25 = arith.constant 0 : index
    %c0_26 = arith.constant 0 : index
    %c0_27 = arith.constant 0 : index
    %41 = vector.load %arg9[%c0_25, %c0_26, %c0_27] : memref<3x64x64xbf16, #tpu.memory_space<vmem>>, vector<1x64x64xbf16>
    %42 = vector.shape_cast %41 : vector<1x64x64xbf16> to vector<64x64xbf16>
    %cst_28 = arith.constant dense<0.000000e+00> : vector<16x64xf32>
    %43 = tpu.matmul %33, %42, %cst_28 {dimension_numbers = #tpu.dot_dimension_numbers<[1], [0], [0], [1], [0, 0, 1, 1], [], []>} : vector<16x64xbf16>, vector<64x64xbf16>, vector<16x64xf32> -> vector<16x64xf32>
    %c0_29 = arith.constant 0 : index
    %c0_30 = arith.constant 0 : index
    %c0_31 = arith.constant 0 : index
    %44 = vector.load %arg10[%c0_29, %c0_30, %c0_31] : memref<3x1x64xf32, #tpu.memory_space<vmem>>, vector<1x1x64xf32>
    %45 = vector.shape_cast %44 : vector<1x1x64xf32> to vector<1x64xf32>
    %46 = vector.broadcast %45 : vector<1x64xf32> to vector<16x64xf32>
    %47 = arith.addf %43, %46 : vector<16x64xf32>
    %c0_32 = arith.constant 0 : index
    %c0_33 = arith.constant 0 : index
    %c0_34 = arith.constant 0 : index
    %48 = vector.load %arg11[%c0_32, %c0_33, %c0_34] : memref<3x64x64xbf16, #tpu.memory_space<vmem>>, vector<1x64x64xbf16>
    %49 = vector.shape_cast %48 : vector<1x64x64xbf16> to vector<64x64xbf16>
    %cst_35 = arith.constant dense<0.000000e+00> : vector<16x64xf32>
    %50 = tpu.matmul %33, %49, %cst_35 {dimension_numbers = #tpu.dot_dimension_numbers<[1], [0], [0], [1], [0, 0, 1, 1], [], []>} : vector<16x64xbf16>, vector<64x64xbf16>, vector<16x64xf32> -> vector<16x64xf32>
    %c0_36 = arith.constant 0 : index
    %c0_37 = arith.constant 0 : index
    %c0_38 = arith.constant 0 : index
    %51 = vector.load %arg12[%c0_36, %c0_37, %c0_38] : memref<3x1x64xf32, #tpu.memory_space<vmem>>, vector<1x1x64xf32>
    %52 = vector.shape_cast %51 : vector<1x1x64xf32> to vector<1x64xf32>
    %53 = vector.broadcast %52 : vector<1x64xf32> to vector<16x64xf32>
    %54 = arith.addf %50, %53 : vector<16x64xf32>
    %55 = tpu.concatenate %47, %47, %47, %47, %47, %47, %47, %47 in 0 : vector<16x64xf32>, vector<16x64xf32>, vector<16x64xf32>, vector<16x64xf32>, vector<16x64xf32>, vector<16x64xf32>, vector<16x64xf32>, vector<16x64xf32> -> vector<128x64xf32>
    %56 = arith.mulf %55, %0 : vector<128x64xf32>
    %57 = arith.truncf %56 : vector<128x64xf32> to vector<128x64xbf16>
    %58 = tpu.concatenate %54, %54, %54, %54, %54, %54, %54, %54 in 0 : vector<16x64xf32>, vector<16x64xf32>, vector<16x64xf32>, vector<16x64xf32>, vector<16x64xf32>, vector<16x64xf32>, vector<16x64xf32>, vector<16x64xf32> -> vector<128x64xf32>
    %59 = arith.mulf %58, %0 : vector<128x64xf32>
    %60 = arith.truncf %59 : vector<128x64xf32> to vector<128x64xbf16>
    %61 = arith.truncf %40 : vector<16x64xf32> to vector<16x64xbf16>
    "tpu.trace_start"() <{level = 10 : i32, message = "id,rd->ir"}> : () -> ()
    %cst_39 = arith.constant dense<0.000000e+00> : vector<16x128xf32>
    %62 = tpu.matmul %61, %57, %cst_39 {dimension_numbers = #tpu.dot_dimension_numbers<[1], [1], [0], [0], [0, 0, 1, 0], [], []>} : vector<16x64xbf16>, vector<128x64xbf16>, vector<16x128xf32> -> vector<16x128xf32>
    "tpu.trace_stop"() : () -> ()
    %63 = arith.addf %62, %2 : vector<16x128xf32>
    %cst_40 = arith.constant dense<0xFF800000> : vector<16xf32>
    %64 = vector.multi_reduction <maximumf>, %63, %cst_40 [1] : vector<16x128xf32> to vector<16xf32>
    %65 = vector.shape_cast %64 : vector<16xf32> to vector<16x1xf32>
    %66 = vector.broadcast %65 : vector<16x1xf32> to vector<16x128xf32>
    %67 = arith.subf %63, %66 : vector<16x128xf32>
    %68 = math.exp %67 : vector<16x128xf32>
    %69 = arith.truncf %68 : vector<16x128xf32> to vector<16x128xbf16>
    %cst_41 = arith.constant dense<0.000000e+00> : vector<16x64xf32>
    %70 = tpu.matmul %69, %60, %cst_41 {dimension_numbers = #tpu.dot_dimension_numbers<[1], [0], [0], [1], [0, 0, 1, 1], [], []>} : vector<16x128xbf16>, vector<128x64xbf16>, vector<16x64xf32> -> vector<16x64xf32>
    %cst_42 = arith.constant dense<0.000000e+00> : vector<16x64xf32>
    %71 = tpu.matmul %69, %1, %cst_42 {dimension_numbers = #tpu.dot_dimension_numbers<[1], [0], [0], [1], [0, 0, 1, 1], [], []>} : vector<16x128xbf16>, vector<128x64xbf16>, vector<16x64xf32> -> vector<16x64xf32>
    %cst_43 = arith.constant 9.99999968E-21 : f32
    %72 = vector.broadcast %cst_43 : f32 to vector<16x64xf32>
    %73 = arith.maximumf %71, %72 : vector<16x64xf32>
    %74 = tpu.reciprocal %73 {approx = true} : vector<16x64xf32> -> vector<16x64xf32>
    %75 = arith.mulf %70, %74 : vector<16x64xf32>
    %76 = arith.truncf %75 : vector<16x64xf32> to vector<16x64xbf16>
    %c0_44 = arith.constant 0 : index
    %c0_45 = arith.constant 0 : index
    %c0_46 = arith.constant 0 : index
    %77 = vector.load %arg13[%c0_44, %c0_45, %c0_46] : memref<3x64x64xbf16, #tpu.memory_space<vmem>>, vector<1x64x64xbf16>
    %78 = vector.shape_cast %77 : vector<1x64x64xbf16> to vector<64x64xbf16>
    %cst_47 = arith.constant dense<0.000000e+00> : vector<16x64xf32>
    %79 = tpu.matmul %76, %78, %cst_47 {dimension_numbers = #tpu.dot_dimension_numbers<[1], [0], [0], [1], [0, 0, 1, 1], [], []>} : vector<16x64xbf16>, vector<64x64xbf16>, vector<16x64xf32> -> vector<16x64xf32>
    %c0_48 = arith.constant 0 : index
    %c0_49 = arith.constant 0 : index
    %c0_50 = arith.constant 0 : index
    %80 = vector.load %arg14[%c0_48, %c0_49, %c0_50] : memref<3x1x64xf32, #tpu.memory_space<vmem>>, vector<1x1x64xf32>
    %81 = vector.shape_cast %80 : vector<1x1x64xf32> to vector<1x64xf32>
    %82 = vector.broadcast %81 : vector<1x64xf32> to vector<16x64xf32>
    %83 = arith.addf %79, %82 : vector<16x64xf32>
    %84 = arith.addf %32, %83 : vector<16x64xf32>
    %c0_51 = arith.constant 0 : index
    %c0_52 = arith.constant 0 : index
    %c0_53 = arith.constant 0 : index
    %85 = vector.load %arg15[%c0_51, %c0_52, %c0_53] : memref<3x1x64xf32, #tpu.memory_space<vmem>>, vector<1x1x64xf32>
    %86 = vector.shape_cast %85 : vector<1x1x64xf32> to vector<1x64xf32>
    %c0_54 = arith.constant 0 : index
    %c0_55 = arith.constant 0 : index
    %c0_56 = arith.constant 0 : index
    %87 = vector.load %arg16[%c0_54, %c0_55, %c0_56] : memref<3x1x64xf32, #tpu.memory_space<vmem>>, vector<1x1x64xf32>
    %88 = vector.shape_cast %87 : vector<1x1x64xf32> to vector<1x64xf32>
    %cst_57 = arith.constant dense<0.000000e+00> : vector<16xf32>
    %89 = vector.multi_reduction <add>, %84, %cst_57 [1] : vector<16x64xf32> to vector<16xf32>
    %90 = vector.shape_cast %89 : vector<16xf32> to vector<16x1xf32>
    %cst_58 = arith.constant 6.400000e+01 : f32
    %91 = vector.broadcast %cst_58 : f32 to vector<16x1xf32>
    %92 = arith.divf %90, %91 : vector<16x1xf32>
    %93 = arith.mulf %84, %84 : vector<16x64xf32>
    %cst_59 = arith.constant dense<0.000000e+00> : vector<16xf32>
    %94 = vector.multi_reduction <add>, %93, %cst_59 [1] : vector<16x64xf32> to vector<16xf32>
    %95 = vector.shape_cast %94 : vector<16xf32> to vector<16x1xf32>
    %cst_60 = arith.constant 6.400000e+01 : f32
    %96 = vector.broadcast %cst_60 : f32 to vector<16x1xf32>
    %97 = arith.divf %95, %96 : vector<16x1xf32>
    %98 = arith.mulf %92, %92 : vector<16x1xf32>
    %99 = arith.subf %97, %98 : vector<16x1xf32>
    %100 = vector.broadcast %92 : vector<16x1xf32> to vector<16x64xf32>
    %101 = arith.subf %84, %100 : vector<16x64xf32>
    %cst_61 = arith.constant 9.99999974E-6 : f32
    %102 = vector.broadcast %cst_61 : f32 to vector<16x1xf32>
    %103 = arith.addf %99, %102 : vector<16x1xf32>
    %104 = math.rsqrt %103 : vector<16x1xf32>
    %105 = vector.broadcast %104 : vector<16x1xf32> to vector<16x64xf32>
    %106 = arith.mulf %101, %105 : vector<16x64xf32>
    %107 = vector.broadcast %86 : vector<1x64xf32> to vector<16x64xf32>
    %108 = arith.mulf %106, %107 : vector<16x64xf32>
    %109 = vector.broadcast %88 : vector<1x64xf32> to vector<16x64xf32>
    %110 = arith.addf %108, %109 : vector<16x64xf32>
    %111 = arith.truncf %110 : vector<16x64xf32> to vector<16x64xbf16>
    %c0_62 = arith.constant 0 : index
    %c0_63 = arith.constant 0 : index
    %c0_64 = arith.constant 0 : index
    %112 = vector.load %arg17[%c0_62, %c0_63, %c0_64] : memref<3x64x128xbf16, #tpu.memory_space<vmem>>, vector<1x64x128xbf16>
    %113 = vector.shape_cast %112 : vector<1x64x128xbf16> to vector<64x128xbf16>
    %cst_65 = arith.constant dense<0.000000e+00> : vector<16x128xf32>
    %114 = tpu.matmul %111, %113, %cst_65 {dimension_numbers = #tpu.dot_dimension_numbers<[1], [0], [0], [1], [0, 0, 1, 1], [], []>} : vector<16x64xbf16>, vector<64x128xbf16>, vector<16x128xf32> -> vector<16x128xf32>
    %c0_66 = arith.constant 0 : index
    %c0_67 = arith.constant 0 : index
    %c0_68 = arith.constant 0 : index
    %115 = vector.load %arg18[%c0_66, %c0_67, %c0_68] : memref<3x1x128xf32, #tpu.memory_space<vmem>>, vector<1x1x128xf32>
    %116 = vector.shape_cast %115 : vector<1x1x128xf32> to vector<1x128xf32>
    %117 = vector.broadcast %116 : vector<1x128xf32> to vector<16x128xf32>
    %118 = arith.addf %114, %117 : vector<16x128xf32>
    %cst_69 = arith.constant 0.000000e+00 : f32
    %119 = vector.broadcast %cst_69 : f32 to vector<16x128xf32>
    %120 = arith.maximumf %118, %119 : vector<16x128xf32>
    %121 = arith.truncf %120 : vector<16x128xf32> to vector<16x128xbf16>
    %c0_70 = arith.constant 0 : index
    %c0_71 = arith.constant 0 : index
    %c0_72 = arith.constant 0 : index
    %122 = vector.load %arg19[%c0_70, %c0_71, %c0_72] : memref<3x128x64xbf16, #tpu.memory_space<vmem>>, vector<1x128x64xbf16>
    %123 = vector.shape_cast %122 : vector<1x128x64xbf16> to vector<128x64xbf16>
    %cst_73 = arith.constant dense<0.000000e+00> : vector<16x64xf32>
    %124 = tpu.matmul %121, %123, %cst_73 {dimension_numbers = #tpu.dot_dimension_numbers<[1], [0], [0], [1], [0, 0, 1, 1], [], []>} : vector<16x128xbf16>, vector<128x64xbf16>, vector<16x64xf32> -> vector<16x64xf32>
    %c0_74 = arith.constant 0 : index
    %c0_75 = arith.constant 0 : index
    %c0_76 = arith.constant 0 : index
    %125 = vector.load %arg20[%c0_74, %c0_75, %c0_76] : memref<3x1x64xf32, #tpu.memory_space<vmem>>, vector<1x1x64xf32>
    %126 = vector.shape_cast %125 : vector<1x1x64xf32> to vector<1x64xf32>
    %127 = vector.broadcast %126 : vector<1x64xf32> to vector<16x64xf32>
    %128 = arith.addf %124, %127 : vector<16x64xf32>
    %129 = arith.addf %110, %128 : vector<16x64xf32>
    %c0_77 = arith.constant 0 : index
    %c0_78 = arith.constant 0 : index
    %c0_79 = arith.constant 0 : index
    %130 = vector.load %arg21[%c0_77, %c0_78, %c0_79] : memref<3x1x64xf32, #tpu.memory_space<vmem>>, vector<1x1x64xf32>
    %131 = vector.shape_cast %130 : vector<1x1x64xf32> to vector<1x64xf32>
    %c0_80 = arith.constant 0 : index
    %c0_81 = arith.constant 0 : index
    %c0_82 = arith.constant 0 : index
    %132 = vector.load %arg22[%c0_80, %c0_81, %c0_82] : memref<3x1x64xf32, #tpu.memory_space<vmem>>, vector<1x1x64xf32>
    %133 = vector.shape_cast %132 : vector<1x1x64xf32> to vector<1x64xf32>
    %cst_83 = arith.constant dense<0.000000e+00> : vector<16xf32>
    %134 = vector.multi_reduction <add>, %129, %cst_83 [1] : vector<16x64xf32> to vector<16xf32>
    %135 = vector.shape_cast %134 : vector<16xf32> to vector<16x1xf32>
    %cst_84 = arith.constant 6.400000e+01 : f32
    %136 = vector.broadcast %cst_84 : f32 to vector<16x1xf32>
    %137 = arith.divf %135, %136 : vector<16x1xf32>
    %138 = arith.mulf %129, %129 : vector<16x64xf32>
    %cst_85 = arith.constant dense<0.000000e+00> : vector<16xf32>
    %139 = vector.multi_reduction <add>, %138, %cst_85 [1] : vector<16x64xf32> to vector<16xf32>
    %140 = vector.shape_cast %139 : vector<16xf32> to vector<16x1xf32>
    %cst_86 = arith.constant 6.400000e+01 : f32
    %141 = vector.broadcast %cst_86 : f32 to vector<16x1xf32>
    %142 = arith.divf %140, %141 : vector<16x1xf32>
    %143 = arith.mulf %137, %137 : vector<16x1xf32>
    %144 = arith.subf %142, %143 : vector<16x1xf32>
    %145 = vector.broadcast %137 : vector<16x1xf32> to vector<16x64xf32>
    %146 = arith.subf %129, %145 : vector<16x64xf32>
    %cst_87 = arith.constant 9.99999974E-6 : f32
    %147 = vector.broadcast %cst_87 : f32 to vector<16x1xf32>
    %148 = arith.addf %144, %147 : vector<16x1xf32>
    %149 = math.rsqrt %148 : vector<16x1xf32>
    %150 = vector.broadcast %149 : vector<16x1xf32> to vector<16x64xf32>
    %151 = arith.mulf %146, %150 : vector<16x64xf32>
    %152 = vector.broadcast %131 : vector<1x64xf32> to vector<16x64xf32>
    %153 = arith.mulf %151, %152 : vector<16x64xf32>
    %154 = vector.broadcast %133 : vector<1x64xf32> to vector<16x64xf32>
    %155 = arith.addf %153, %154 : vector<16x64xf32>
    %156 = arith.truncf %155 : vector<16x64xf32> to vector<16x64xbf16>
    %c1 = arith.constant 1 : index
    %c0_88 = arith.constant 0 : index
    %c0_89 = arith.constant 0 : index
    %157 = vector.load %arg7[%c1, %c0_88, %c0_89] : memref<3x64x64xbf16, #tpu.memory_space<vmem>>, vector<1x64x64xbf16>
    %158 = vector.shape_cast %157 : vector<1x64x64xbf16> to vector<64x64xbf16>
    %cst_90 = arith.constant dense<0.000000e+00> : vector<16x64xf32>
    %159 = tpu.matmul %156, %158, %cst_90 {dimension_numbers = #tpu.dot_dimension_numbers<[1], [0], [0], [1], [0, 0, 1, 1], [], []>} : vector<16x64xbf16>, vector<64x64xbf16>, vector<16x64xf32> -> vector<16x64xf32>
    %c1_91 = arith.constant 1 : index
    %c0_92 = arith.constant 0 : index
    %c0_93 = arith.constant 0 : index
    %160 = vector.load %arg8[%c1_91, %c0_92, %c0_93] : memref<3x1x64xf32, #tpu.memory_space<vmem>>, vector<1x1x64xf32>
    %161 = vector.shape_cast %160 : vector<1x1x64xf32> to vector<1x64xf32>
    %162 = vector.broadcast %161 : vector<1x64xf32> to vector<16x64xf32>
    %163 = arith.addf %159, %162 : vector<16x64xf32>
    %c1_94 = arith.constant 1 : index
    %c0_95 = arith.constant 0 : index
    %c0_96 = arith.constant 0 : index
    %164 = vector.load %arg9[%c1_94, %c0_95, %c0_96] : memref<3x64x64xbf16, #tpu.memory_space<vmem>>, vector<1x64x64xbf16>
    %165 = vector.shape_cast %164 : vector<1x64x64xbf16> to vector<64x64xbf16>
    %cst_97 = arith.constant dense<0.000000e+00> : vector<16x64xf32>
    %166 = tpu.matmul %156, %165, %cst_97 {dimension_numbers = #tpu.dot_dimension_numbers<[1], [0], [0], [1], [0, 0, 1, 1], [], []>} : vector<16x64xbf16>, vector<64x64xbf16>, vector<16x64xf32> -> vector<16x64xf32>
    %c1_98 = arith.constant 1 : index
    %c0_99 = arith.constant 0 : index
    %c0_100 = arith.constant 0 : index
    %167 = vector.load %arg10[%c1_98, %c0_99, %c0_100] : memref<3x1x64xf32, #tpu.memory_space<vmem>>, vector<1x1x64xf32>
    %168 = vector.shape_cast %167 : vector<1x1x64xf32> to vector<1x64xf32>
    %169 = vector.broadcast %168 : vector<1x64xf32> to vector<16x64xf32>
    %170 = arith.addf %166, %169 : vector<16x64xf32>
    %c1_101 = arith.constant 1 : index
    %c0_102 = arith.constant 0 : index
    %c0_103 = arith.constant 0 : index
    %171 = vector.load %arg11[%c1_101, %c0_102, %c0_103] : memref<3x64x64xbf16, #tpu.memory_space<vmem>>, vector<1x64x64xbf16>
    %172 = vector.shape_cast %171 : vector<1x64x64xbf16> to vector<64x64xbf16>
    %cst_104 = arith.constant dense<0.000000e+00> : vector<16x64xf32>
    %173 = tpu.matmul %156, %172, %cst_104 {dimension_numbers = #tpu.dot_dimension_numbers<[1], [0], [0], [1], [0, 0, 1, 1], [], []>} : vector<16x64xbf16>, vector<64x64xbf16>, vector<16x64xf32> -> vector<16x64xf32>
    %c1_105 = arith.constant 1 : index
    %c0_106 = arith.constant 0 : index
    %c0_107 = arith.constant 0 : index
    %174 = vector.load %arg12[%c1_105, %c0_106, %c0_107] : memref<3x1x64xf32, #tpu.memory_space<vmem>>, vector<1x1x64xf32>
    %175 = vector.shape_cast %174 : vector<1x1x64xf32> to vector<1x64xf32>
    %176 = vector.broadcast %175 : vector<1x64xf32> to vector<16x64xf32>
    %177 = arith.addf %173, %176 : vector<16x64xf32>
    %178 = tpu.concatenate %170, %170, %170, %170, %170, %170, %170, %170 in 0 : vector<16x64xf32>, vector<16x64xf32>, vector<16x64xf32>, vector<16x64xf32>, vector<16x64xf32>, vector<16x64xf32>, vector<16x64xf32>, vector<16x64xf32> -> vector<128x64xf32>
    %179 = arith.mulf %178, %0 : vector<128x64xf32>
    %180 = arith.truncf %179 : vector<128x64xf32> to vector<128x64xbf16>
    %181 = tpu.concatenate %177, %177, %177, %177, %177, %177, %177, %177 in 0 : vector<16x64xf32>, vector<16x64xf32>, vector<16x64xf32>, vector<16x64xf32>, vector<16x64xf32>, vector<16x64xf32>, vector<16x64xf32>, vector<16x64xf32> -> vector<128x64xf32>
    %182 = arith.mulf %181, %0 : vector<128x64xf32>
    %183 = arith.truncf %182 : vector<128x64xf32> to vector<128x64xbf16>
    %184 = arith.truncf %163 : vector<16x64xf32> to vector<16x64xbf16>
    "tpu.trace_start"() <{level = 10 : i32, message = "id,rd->ir"}> : () -> ()
    %cst_108 = arith.constant dense<0.000000e+00> : vector<16x128xf32>
    %185 = tpu.matmul %184, %180, %cst_108 {dimension_numbers = #tpu.dot_dimension_numbers<[1], [1], [0], [0], [0, 0, 1, 0], [], []>} : vector<16x64xbf16>, vector<128x64xbf16>, vector<16x128xf32> -> vector<16x128xf32>
    "tpu.trace_stop"() : () -> ()
    %186 = arith.addf %185, %2 : vector<16x128xf32>
    %cst_109 = arith.constant dense<0xFF800000> : vector<16xf32>
    %187 = vector.multi_reduction <maximumf>, %186, %cst_109 [1] : vector<16x128xf32> to vector<16xf32>
    %188 = vector.shape_cast %187 : vector<16xf32> to vector<16x1xf32>
    %189 = vector.broadcast %188 : vector<16x1xf32> to vector<16x128xf32>
    %190 = arith.subf %186, %189 : vector<16x128xf32>
    %191 = math.exp %190 : vector<16x128xf32>
    %192 = arith.truncf %191 : vector<16x128xf32> to vector<16x128xbf16>
    %cst_110 = arith.constant dense<0.000000e+00> : vector<16x64xf32>
    %193 = tpu.matmul %192, %183, %cst_110 {dimension_numbers = #tpu.dot_dimension_numbers<[1], [0], [0], [1], [0, 0, 1, 1], [], []>} : vector<16x128xbf16>, vector<128x64xbf16>, vector<16x64xf32> -> vector<16x64xf32>
    %cst_111 = arith.constant dense<0.000000e+00> : vector<16x64xf32>
    %194 = tpu.matmul %192, %1, %cst_111 {dimension_numbers = #tpu.dot_dimension_numbers<[1], [0], [0], [1], [0, 0, 1, 1], [], []>} : vector<16x128xbf16>, vector<128x64xbf16>, vector<16x64xf32> -> vector<16x64xf32>
    %cst_112 = arith.constant 9.99999968E-21 : f32
    %195 = vector.broadcast %cst_112 : f32 to vector<16x64xf32>
    %196 = arith.maximumf %194, %195 : vector<16x64xf32>
    %197 = tpu.reciprocal %196 {approx = true} : vector<16x64xf32> -> vector<16x64xf32>
    %198 = arith.mulf %193, %197 : vector<16x64xf32>
    %199 = arith.truncf %198 : vector<16x64xf32> to vector<16x64xbf16>
    %c1_113 = arith.constant 1 : index
    %c0_114 = arith.constant 0 : index
    %c0_115 = arith.constant 0 : index
    %200 = vector.load %arg13[%c1_113, %c0_114, %c0_115] : memref<3x64x64xbf16, #tpu.memory_space<vmem>>, vector<1x64x64xbf16>
    %201 = vector.shape_cast %200 : vector<1x64x64xbf16> to vector<64x64xbf16>
    %cst_116 = arith.constant dense<0.000000e+00> : vector<16x64xf32>
    %202 = tpu.matmul %199, %201, %cst_116 {dimension_numbers = #tpu.dot_dimension_numbers<[1], [0], [0], [1], [0, 0, 1, 1], [], []>} : vector<16x64xbf16>, vector<64x64xbf16>, vector<16x64xf32> -> vector<16x64xf32>
    %c1_117 = arith.constant 1 : index
    %c0_118 = arith.constant 0 : index
    %c0_119 = arith.constant 0 : index
    %203 = vector.load %arg14[%c1_117, %c0_118, %c0_119] : memref<3x1x64xf32, #tpu.memory_space<vmem>>, vector<1x1x64xf32>
    %204 = vector.shape_cast %203 : vector<1x1x64xf32> to vector<1x64xf32>
    %205 = vector.broadcast %204 : vector<1x64xf32> to vector<16x64xf32>
    %206 = arith.addf %202, %205 : vector<16x64xf32>
    %207 = arith.addf %155, %206 : vector<16x64xf32>
    %c1_120 = arith.constant 1 : index
    %c0_121 = arith.constant 0 : index
    %c0_122 = arith.constant 0 : index
    %208 = vector.load %arg15[%c1_120, %c0_121, %c0_122] : memref<3x1x64xf32, #tpu.memory_space<vmem>>, vector<1x1x64xf32>
    %209 = vector.shape_cast %208 : vector<1x1x64xf32> to vector<1x64xf32>
    %c1_123 = arith.constant 1 : index
    %c0_124 = arith.constant 0 : index
    %c0_125 = arith.constant 0 : index
    %210 = vector.load %arg16[%c1_123, %c0_124, %c0_125] : memref<3x1x64xf32, #tpu.memory_space<vmem>>, vector<1x1x64xf32>
    %211 = vector.shape_cast %210 : vector<1x1x64xf32> to vector<1x64xf32>
    %cst_126 = arith.constant dense<0.000000e+00> : vector<16xf32>
    %212 = vector.multi_reduction <add>, %207, %cst_126 [1] : vector<16x64xf32> to vector<16xf32>
    %213 = vector.shape_cast %212 : vector<16xf32> to vector<16x1xf32>
    %cst_127 = arith.constant 6.400000e+01 : f32
    %214 = vector.broadcast %cst_127 : f32 to vector<16x1xf32>
    %215 = arith.divf %213, %214 : vector<16x1xf32>
    %216 = arith.mulf %207, %207 : vector<16x64xf32>
    %cst_128 = arith.constant dense<0.000000e+00> : vector<16xf32>
    %217 = vector.multi_reduction <add>, %216, %cst_128 [1] : vector<16x64xf32> to vector<16xf32>
    %218 = vector.shape_cast %217 : vector<16xf32> to vector<16x1xf32>
    %cst_129 = arith.constant 6.400000e+01 : f32
    %219 = vector.broadcast %cst_129 : f32 to vector<16x1xf32>
    %220 = arith.divf %218, %219 : vector<16x1xf32>
    %221 = arith.mulf %215, %215 : vector<16x1xf32>
    %222 = arith.subf %220, %221 : vector<16x1xf32>
    %223 = vector.broadcast %215 : vector<16x1xf32> to vector<16x64xf32>
    %224 = arith.subf %207, %223 : vector<16x64xf32>
    %cst_130 = arith.constant 9.99999974E-6 : f32
    %225 = vector.broadcast %cst_130 : f32 to vector<16x1xf32>
    %226 = arith.addf %222, %225 : vector<16x1xf32>
    %227 = math.rsqrt %226 : vector<16x1xf32>
    %228 = vector.broadcast %227 : vector<16x1xf32> to vector<16x64xf32>
    %229 = arith.mulf %224, %228 : vector<16x64xf32>
    %230 = vector.broadcast %209 : vector<1x64xf32> to vector<16x64xf32>
    %231 = arith.mulf %229, %230 : vector<16x64xf32>
    %232 = vector.broadcast %211 : vector<1x64xf32> to vector<16x64xf32>
    %233 = arith.addf %231, %232 : vector<16x64xf32>
    %234 = arith.truncf %233 : vector<16x64xf32> to vector<16x64xbf16>
    %c1_131 = arith.constant 1 : index
    %c0_132 = arith.constant 0 : index
    %c0_133 = arith.constant 0 : index
    %235 = vector.load %arg17[%c1_131, %c0_132, %c0_133] : memref<3x64x128xbf16, #tpu.memory_space<vmem>>, vector<1x64x128xbf16>
    %236 = vector.shape_cast %235 : vector<1x64x128xbf16> to vector<64x128xbf16>
    %cst_134 = arith.constant dense<0.000000e+00> : vector<16x128xf32>
    %237 = tpu.matmul %234, %236, %cst_134 {dimension_numbers = #tpu.dot_dimension_numbers<[1], [0], [0], [1], [0, 0, 1, 1], [], []>} : vector<16x64xbf16>, vector<64x128xbf16>, vector<16x128xf32> -> vector<16x128xf32>
    %c1_135 = arith.constant 1 : index
    %c0_136 = arith.constant 0 : index
    %c0_137 = arith.constant 0 : index
    %238 = vector.load %arg18[%c1_135, %c0_136, %c0_137] : memref<3x1x128xf32, #tpu.memory_space<vmem>>, vector<1x1x128xf32>
    %239 = vector.shape_cast %238 : vector<1x1x128xf32> to vector<1x128xf32>
    %240 = vector.broadcast %239 : vector<1x128xf32> to vector<16x128xf32>
    %241 = arith.addf %237, %240 : vector<16x128xf32>
    %cst_138 = arith.constant 0.000000e+00 : f32
    %242 = vector.broadcast %cst_138 : f32 to vector<16x128xf32>
    %243 = arith.maximumf %241, %242 : vector<16x128xf32>
    %244 = arith.truncf %243 : vector<16x128xf32> to vector<16x128xbf16>
    %c1_139 = arith.constant 1 : index
    %c0_140 = arith.constant 0 : index
    %c0_141 = arith.constant 0 : index
    %245 = vector.load %arg19[%c1_139, %c0_140, %c0_141] : memref<3x128x64xbf16, #tpu.memory_space<vmem>>, vector<1x128x64xbf16>
    %246 = vector.shape_cast %245 : vector<1x128x64xbf16> to vector<128x64xbf16>
    %cst_142 = arith.constant dense<0.000000e+00> : vector<16x64xf32>
    %247 = tpu.matmul %244, %246, %cst_142 {dimension_numbers = #tpu.dot_dimension_numbers<[1], [0], [0], [1], [0, 0, 1, 1], [], []>} : vector<16x128xbf16>, vector<128x64xbf16>, vector<16x64xf32> -> vector<16x64xf32>
    %c1_143 = arith.constant 1 : index
    %c0_144 = arith.constant 0 : index
    %c0_145 = arith.constant 0 : index
    %248 = vector.load %arg20[%c1_143, %c0_144, %c0_145] : memref<3x1x64xf32, #tpu.memory_space<vmem>>, vector<1x1x64xf32>
    %249 = vector.shape_cast %248 : vector<1x1x64xf32> to vector<1x64xf32>
    %250 = vector.broadcast %249 : vector<1x64xf32> to vector<16x64xf32>
    %251 = arith.addf %247, %250 : vector<16x64xf32>
    %252 = arith.addf %233, %251 : vector<16x64xf32>
    %c1_146 = arith.constant 1 : index
    %c0_147 = arith.constant 0 : index
    %c0_148 = arith.constant 0 : index
    %253 = vector.load %arg21[%c1_146, %c0_147, %c0_148] : memref<3x1x64xf32, #tpu.memory_space<vmem>>, vector<1x1x64xf32>
    %254 = vector.shape_cast %253 : vector<1x1x64xf32> to vector<1x64xf32>
    %c1_149 = arith.constant 1 : index
    %c0_150 = arith.constant 0 : index
    %c0_151 = arith.constant 0 : index
    %255 = vector.load %arg22[%c1_149, %c0_150, %c0_151] : memref<3x1x64xf32, #tpu.memory_space<vmem>>, vector<1x1x64xf32>
    %256 = vector.shape_cast %255 : vector<1x1x64xf32> to vector<1x64xf32>
    %cst_152 = arith.constant dense<0.000000e+00> : vector<16xf32>
    %257 = vector.multi_reduction <add>, %252, %cst_152 [1] : vector<16x64xf32> to vector<16xf32>
    %258 = vector.shape_cast %257 : vector<16xf32> to vector<16x1xf32>
    %cst_153 = arith.constant 6.400000e+01 : f32
    %259 = vector.broadcast %cst_153 : f32 to vector<16x1xf32>
    %260 = arith.divf %258, %259 : vector<16x1xf32>
    %261 = arith.mulf %252, %252 : vector<16x64xf32>
    %cst_154 = arith.constant dense<0.000000e+00> : vector<16xf32>
    %262 = vector.multi_reduction <add>, %261, %cst_154 [1] : vector<16x64xf32> to vector<16xf32>
    %263 = vector.shape_cast %262 : vector<16xf32> to vector<16x1xf32>
    %cst_155 = arith.constant 6.400000e+01 : f32
    %264 = vector.broadcast %cst_155 : f32 to vector<16x1xf32>
    %265 = arith.divf %263, %264 : vector<16x1xf32>
    %266 = arith.mulf %260, %260 : vector<16x1xf32>
    %267 = arith.subf %265, %266 : vector<16x1xf32>
    %268 = vector.broadcast %260 : vector<16x1xf32> to vector<16x64xf32>
    %269 = arith.subf %252, %268 : vector<16x64xf32>
    %cst_156 = arith.constant 9.99999974E-6 : f32
    %270 = vector.broadcast %cst_156 : f32 to vector<16x1xf32>
    %271 = arith.addf %267, %270 : vector<16x1xf32>
    %272 = math.rsqrt %271 : vector<16x1xf32>
    %273 = vector.broadcast %272 : vector<16x1xf32> to vector<16x64xf32>
    %274 = arith.mulf %269, %273 : vector<16x64xf32>
    %275 = vector.broadcast %254 : vector<1x64xf32> to vector<16x64xf32>
    %276 = arith.mulf %274, %275 : vector<16x64xf32>
    %277 = vector.broadcast %256 : vector<1x64xf32> to vector<16x64xf32>
    %278 = arith.addf %276, %277 : vector<16x64xf32>
    %279 = arith.truncf %278 : vector<16x64xf32> to vector<16x64xbf16>
    %c2 = arith.constant 2 : index
    %c0_157 = arith.constant 0 : index
    %c0_158 = arith.constant 0 : index
    %280 = vector.load %arg7[%c2, %c0_157, %c0_158] : memref<3x64x64xbf16, #tpu.memory_space<vmem>>, vector<1x64x64xbf16>
    %281 = vector.shape_cast %280 : vector<1x64x64xbf16> to vector<64x64xbf16>
    %cst_159 = arith.constant dense<0.000000e+00> : vector<16x64xf32>
    %282 = tpu.matmul %279, %281, %cst_159 {dimension_numbers = #tpu.dot_dimension_numbers<[1], [0], [0], [1], [0, 0, 1, 1], [], []>} : vector<16x64xbf16>, vector<64x64xbf16>, vector<16x64xf32> -> vector<16x64xf32>
    %c2_160 = arith.constant 2 : index
    %c0_161 = arith.constant 0 : index
    %c0_162 = arith.constant 0 : index
    %283 = vector.load %arg8[%c2_160, %c0_161, %c0_162] : memref<3x1x64xf32, #tpu.memory_space<vmem>>, vector<1x1x64xf32>
    %284 = vector.shape_cast %283 : vector<1x1x64xf32> to vector<1x64xf32>
    %285 = vector.broadcast %284 : vector<1x64xf32> to vector<16x64xf32>
    %286 = arith.addf %282, %285 : vector<16x64xf32>
    %c2_163 = arith.constant 2 : index
    %c0_164 = arith.constant 0 : index
    %c0_165 = arith.constant 0 : index
    %287 = vector.load %arg9[%c2_163, %c0_164, %c0_165] : memref<3x64x64xbf16, #tpu.memory_space<vmem>>, vector<1x64x64xbf16>
    %288 = vector.shape_cast %287 : vector<1x64x64xbf16> to vector<64x64xbf16>
    %cst_166 = arith.constant dense<0.000000e+00> : vector<16x64xf32>
    %289 = tpu.matmul %279, %288, %cst_166 {dimension_numbers = #tpu.dot_dimension_numbers<[1], [0], [0], [1], [0, 0, 1, 1], [], []>} : vector<16x64xbf16>, vector<64x64xbf16>, vector<16x64xf32> -> vector<16x64xf32>
    %c2_167 = arith.constant 2 : index
    %c0_168 = arith.constant 0 : index
    %c0_169 = arith.constant 0 : index
    %290 = vector.load %arg10[%c2_167, %c0_168, %c0_169] : memref<3x1x64xf32, #tpu.memory_space<vmem>>, vector<1x1x64xf32>
    %291 = vector.shape_cast %290 : vector<1x1x64xf32> to vector<1x64xf32>
    %292 = vector.broadcast %291 : vector<1x64xf32> to vector<16x64xf32>
    %293 = arith.addf %289, %292 : vector<16x64xf32>
    %c2_170 = arith.constant 2 : index
    %c0_171 = arith.constant 0 : index
    %c0_172 = arith.constant 0 : index
    %294 = vector.load %arg11[%c2_170, %c0_171, %c0_172] : memref<3x64x64xbf16, #tpu.memory_space<vmem>>, vector<1x64x64xbf16>
    %295 = vector.shape_cast %294 : vector<1x64x64xbf16> to vector<64x64xbf16>
    %cst_173 = arith.constant dense<0.000000e+00> : vector<16x64xf32>
    %296 = tpu.matmul %279, %295, %cst_173 {dimension_numbers = #tpu.dot_dimension_numbers<[1], [0], [0], [1], [0, 0, 1, 1], [], []>} : vector<16x64xbf16>, vector<64x64xbf16>, vector<16x64xf32> -> vector<16x64xf32>
    %c2_174 = arith.constant 2 : index
    %c0_175 = arith.constant 0 : index
    %c0_176 = arith.constant 0 : index
    %297 = vector.load %arg12[%c2_174, %c0_175, %c0_176] : memref<3x1x64xf32, #tpu.memory_space<vmem>>, vector<1x1x64xf32>
    %298 = vector.shape_cast %297 : vector<1x1x64xf32> to vector<1x64xf32>
    %299 = vector.broadcast %298 : vector<1x64xf32> to vector<16x64xf32>
    %300 = arith.addf %296, %299 : vector<16x64xf32>
    %301 = tpu.concatenate %293, %293, %293, %293, %293, %293, %293, %293 in 0 : vector<16x64xf32>, vector<16x64xf32>, vector<16x64xf32>, vector<16x64xf32>, vector<16x64xf32>, vector<16x64xf32>, vector<16x64xf32>, vector<16x64xf32> -> vector<128x64xf32>
    %302 = arith.mulf %301, %0 : vector<128x64xf32>
    %303 = arith.truncf %302 : vector<128x64xf32> to vector<128x64xbf16>
    %304 = tpu.concatenate %300, %300, %300, %300, %300, %300, %300, %300 in 0 : vector<16x64xf32>, vector<16x64xf32>, vector<16x64xf32>, vector<16x64xf32>, vector<16x64xf32>, vector<16x64xf32>, vector<16x64xf32>, vector<16x64xf32> -> vector<128x64xf32>
    %305 = arith.mulf %304, %0 : vector<128x64xf32>
    %306 = arith.truncf %305 : vector<128x64xf32> to vector<128x64xbf16>
    %307 = arith.truncf %286 : vector<16x64xf32> to vector<16x64xbf16>
    "tpu.trace_start"() <{level = 10 : i32, message = "id,rd->ir"}> : () -> ()
    %cst_177 = arith.constant dense<0.000000e+00> : vector<16x128xf32>
    %308 = tpu.matmul %307, %303, %cst_177 {dimension_numbers = #tpu.dot_dimension_numbers<[1], [1], [0], [0], [0, 0, 1, 0], [], []>} : vector<16x64xbf16>, vector<128x64xbf16>, vector<16x128xf32> -> vector<16x128xf32>
    "tpu.trace_stop"() : () -> ()
    %309 = arith.addf %308, %2 : vector<16x128xf32>
    %cst_178 = arith.constant dense<0xFF800000> : vector<16xf32>
    %310 = vector.multi_reduction <maximumf>, %309, %cst_178 [1] : vector<16x128xf32> to vector<16xf32>
    %311 = vector.shape_cast %310 : vector<16xf32> to vector<16x1xf32>
    %312 = vector.broadcast %311 : vector<16x1xf32> to vector<16x128xf32>
    %313 = arith.subf %309, %312 : vector<16x128xf32>
    %314 = math.exp %313 : vector<16x128xf32>
    %315 = arith.truncf %314 : vector<16x128xf32> to vector<16x128xbf16>
    %cst_179 = arith.constant dense<0.000000e+00> : vector<16x64xf32>
    %316 = tpu.matmul %315, %306, %cst_179 {dimension_numbers = #tpu.dot_dimension_numbers<[1], [0], [0], [1], [0, 0, 1, 1], [], []>} : vector<16x128xbf16>, vector<128x64xbf16>, vector<16x64xf32> -> vector<16x64xf32>
    %cst_180 = arith.constant dense<0.000000e+00> : vector<16x64xf32>
    %317 = tpu.matmul %315, %1, %cst_180 {dimension_numbers = #tpu.dot_dimension_numbers<[1], [0], [0], [1], [0, 0, 1, 1], [], []>} : vector<16x128xbf16>, vector<128x64xbf16>, vector<16x64xf32> -> vector<16x64xf32>
    %cst_181 = arith.constant 9.99999968E-21 : f32
    %318 = vector.broadcast %cst_181 : f32 to vector<16x64xf32>
    %319 = arith.maximumf %317, %318 : vector<16x64xf32>
    %320 = tpu.reciprocal %319 {approx = true} : vector<16x64xf32> -> vector<16x64xf32>
    %321 = arith.mulf %316, %320 : vector<16x64xf32>
    %322 = arith.truncf %321 : vector<16x64xf32> to vector<16x64xbf16>
    %c2_182 = arith.constant 2 : index
    %c0_183 = arith.constant 0 : index
    %c0_184 = arith.constant 0 : index
    %323 = vector.load %arg13[%c2_182, %c0_183, %c0_184] : memref<3x64x64xbf16, #tpu.memory_space<vmem>>, vector<1x64x64xbf16>
    %324 = vector.shape_cast %323 : vector<1x64x64xbf16> to vector<64x64xbf16>
    %cst_185 = arith.constant dense<0.000000e+00> : vector<16x64xf32>
    %325 = tpu.matmul %322, %324, %cst_185 {dimension_numbers = #tpu.dot_dimension_numbers<[1], [0], [0], [1], [0, 0, 1, 1], [], []>} : vector<16x64xbf16>, vector<64x64xbf16>, vector<16x64xf32> -> vector<16x64xf32>
    %c2_186 = arith.constant 2 : index
    %c0_187 = arith.constant 0 : index
    %c0_188 = arith.constant 0 : index
    %326 = vector.load %arg14[%c2_186, %c0_187, %c0_188] : memref<3x1x64xf32, #tpu.memory_space<vmem>>, vector<1x1x64xf32>
    %327 = vector.shape_cast %326 : vector<1x1x64xf32> to vector<1x64xf32>
    %328 = vector.broadcast %327 : vector<1x64xf32> to vector<16x64xf32>
    %329 = arith.addf %325, %328 : vector<16x64xf32>
    %330 = arith.addf %278, %329 : vector<16x64xf32>
    %c2_189 = arith.constant 2 : index
    %c0_190 = arith.constant 0 : index
    %c0_191 = arith.constant 0 : index
    %331 = vector.load %arg15[%c2_189, %c0_190, %c0_191] : memref<3x1x64xf32, #tpu.memory_space<vmem>>, vector<1x1x64xf32>
    %332 = vector.shape_cast %331 : vector<1x1x64xf32> to vector<1x64xf32>
    %c2_192 = arith.constant 2 : index
    %c0_193 = arith.constant 0 : index
    %c0_194 = arith.constant 0 : index
    %333 = vector.load %arg16[%c2_192, %c0_193, %c0_194] : memref<3x1x64xf32, #tpu.memory_space<vmem>>, vector<1x1x64xf32>
    %334 = vector.shape_cast %333 : vector<1x1x64xf32> to vector<1x64xf32>
    %cst_195 = arith.constant dense<0.000000e+00> : vector<16xf32>
    %335 = vector.multi_reduction <add>, %330, %cst_195 [1] : vector<16x64xf32> to vector<16xf32>
    %336 = vector.shape_cast %335 : vector<16xf32> to vector<16x1xf32>
    %cst_196 = arith.constant 6.400000e+01 : f32
    %337 = vector.broadcast %cst_196 : f32 to vector<16x1xf32>
    %338 = arith.divf %336, %337 : vector<16x1xf32>
    %339 = arith.mulf %330, %330 : vector<16x64xf32>
    %cst_197 = arith.constant dense<0.000000e+00> : vector<16xf32>
    %340 = vector.multi_reduction <add>, %339, %cst_197 [1] : vector<16x64xf32> to vector<16xf32>
    %341 = vector.shape_cast %340 : vector<16xf32> to vector<16x1xf32>
    %cst_198 = arith.constant 6.400000e+01 : f32
    %342 = vector.broadcast %cst_198 : f32 to vector<16x1xf32>
    %343 = arith.divf %341, %342 : vector<16x1xf32>
    %344 = arith.mulf %338, %338 : vector<16x1xf32>
    %345 = arith.subf %343, %344 : vector<16x1xf32>
    %346 = vector.broadcast %338 : vector<16x1xf32> to vector<16x64xf32>
    %347 = arith.subf %330, %346 : vector<16x64xf32>
    %cst_199 = arith.constant 9.99999974E-6 : f32
    %348 = vector.broadcast %cst_199 : f32 to vector<16x1xf32>
    %349 = arith.addf %345, %348 : vector<16x1xf32>
    %350 = math.rsqrt %349 : vector<16x1xf32>
    %351 = vector.broadcast %350 : vector<16x1xf32> to vector<16x64xf32>
    %352 = arith.mulf %347, %351 : vector<16x64xf32>
    %353 = vector.broadcast %332 : vector<1x64xf32> to vector<16x64xf32>
    %354 = arith.mulf %352, %353 : vector<16x64xf32>
    %355 = vector.broadcast %334 : vector<1x64xf32> to vector<16x64xf32>
    %356 = arith.addf %354, %355 : vector<16x64xf32>
    %357 = arith.truncf %356 : vector<16x64xf32> to vector<16x64xbf16>
    %c2_200 = arith.constant 2 : index
    %c0_201 = arith.constant 0 : index
    %c0_202 = arith.constant 0 : index
    %358 = vector.load %arg17[%c2_200, %c0_201, %c0_202] : memref<3x64x128xbf16, #tpu.memory_space<vmem>>, vector<1x64x128xbf16>
    %359 = vector.shape_cast %358 : vector<1x64x128xbf16> to vector<64x128xbf16>
    %cst_203 = arith.constant dense<0.000000e+00> : vector<16x128xf32>
    %360 = tpu.matmul %357, %359, %cst_203 {dimension_numbers = #tpu.dot_dimension_numbers<[1], [0], [0], [1], [0, 0, 1, 1], [], []>} : vector<16x64xbf16>, vector<64x128xbf16>, vector<16x128xf32> -> vector<16x128xf32>
    %c2_204 = arith.constant 2 : index
    %c0_205 = arith.constant 0 : index
    %c0_206 = arith.constant 0 : index
    %361 = vector.load %arg18[%c2_204, %c0_205, %c0_206] : memref<3x1x128xf32, #tpu.memory_space<vmem>>, vector<1x1x128xf32>
    %362 = vector.shape_cast %361 : vector<1x1x128xf32> to vector<1x128xf32>
    %363 = vector.broadcast %362 : vector<1x128xf32> to vector<16x128xf32>
    %364 = arith.addf %360, %363 : vector<16x128xf32>
    %cst_207 = arith.constant 0.000000e+00 : f32
    %365 = vector.broadcast %cst_207 : f32 to vector<16x128xf32>
    %366 = arith.maximumf %364, %365 : vector<16x128xf32>
    %367 = arith.truncf %366 : vector<16x128xf32> to vector<16x128xbf16>
    %c2_208 = arith.constant 2 : index
    %c0_209 = arith.constant 0 : index
    %c0_210 = arith.constant 0 : index
    %368 = vector.load %arg19[%c2_208, %c0_209, %c0_210] : memref<3x128x64xbf16, #tpu.memory_space<vmem>>, vector<1x128x64xbf16>
    %369 = vector.shape_cast %368 : vector<1x128x64xbf16> to vector<128x64xbf16>
    %cst_211 = arith.constant dense<0.000000e+00> : vector<16x64xf32>
    %370 = tpu.matmul %367, %369, %cst_211 {dimension_numbers = #tpu.dot_dimension_numbers<[1], [0], [0], [1], [0, 0, 1, 1], [], []>} : vector<16x128xbf16>, vector<128x64xbf16>, vector<16x64xf32> -> vector<16x64xf32>
    %c2_212 = arith.constant 2 : index
    %c0_213 = arith.constant 0 : index
    %c0_214 = arith.constant 0 : index
    %371 = vector.load %arg20[%c2_212, %c0_213, %c0_214] : memref<3x1x64xf32, #tpu.memory_space<vmem>>, vector<1x1x64xf32>
    %372 = vector.shape_cast %371 : vector<1x1x64xf32> to vector<1x64xf32>
    %373 = vector.broadcast %372 : vector<1x64xf32> to vector<16x64xf32>
    %374 = arith.addf %370, %373 : vector<16x64xf32>
    %375 = arith.addf %356, %374 : vector<16x64xf32>
    %c2_215 = arith.constant 2 : index
    %c0_216 = arith.constant 0 : index
    %c0_217 = arith.constant 0 : index
    %376 = vector.load %arg21[%c2_215, %c0_216, %c0_217] : memref<3x1x64xf32, #tpu.memory_space<vmem>>, vector<1x1x64xf32>
    %377 = vector.shape_cast %376 : vector<1x1x64xf32> to vector<1x64xf32>
    %c2_218 = arith.constant 2 : index
    %c0_219 = arith.constant 0 : index
    %c0_220 = arith.constant 0 : index
    %378 = vector.load %arg22[%c2_218, %c0_219, %c0_220] : memref<3x1x64xf32, #tpu.memory_space<vmem>>, vector<1x1x64xf32>
    %379 = vector.shape_cast %378 : vector<1x1x64xf32> to vector<1x64xf32>
    %cst_221 = arith.constant dense<0.000000e+00> : vector<16xf32>
    %380 = vector.multi_reduction <add>, %375, %cst_221 [1] : vector<16x64xf32> to vector<16xf32>
    %381 = vector.shape_cast %380 : vector<16xf32> to vector<16x1xf32>
    %cst_222 = arith.constant 6.400000e+01 : f32
    %382 = vector.broadcast %cst_222 : f32 to vector<16x1xf32>
    %383 = arith.divf %381, %382 : vector<16x1xf32>
    %384 = arith.mulf %375, %375 : vector<16x64xf32>
    %cst_223 = arith.constant dense<0.000000e+00> : vector<16xf32>
    %385 = vector.multi_reduction <add>, %384, %cst_223 [1] : vector<16x64xf32> to vector<16xf32>
    %386 = vector.shape_cast %385 : vector<16xf32> to vector<16x1xf32>
    %cst_224 = arith.constant 6.400000e+01 : f32
    %387 = vector.broadcast %cst_224 : f32 to vector<16x1xf32>
    %388 = arith.divf %386, %387 : vector<16x1xf32>
    %389 = arith.mulf %383, %383 : vector<16x1xf32>
    %390 = arith.subf %388, %389 : vector<16x1xf32>
    %391 = vector.broadcast %383 : vector<16x1xf32> to vector<16x64xf32>
    %392 = arith.subf %375, %391 : vector<16x64xf32>
    %cst_225 = arith.constant 9.99999974E-6 : f32
    %393 = vector.broadcast %cst_225 : f32 to vector<16x1xf32>
    %394 = arith.addf %390, %393 : vector<16x1xf32>
    %395 = math.rsqrt %394 : vector<16x1xf32>
    %396 = vector.broadcast %395 : vector<16x1xf32> to vector<16x64xf32>
    %397 = arith.mulf %392, %396 : vector<16x64xf32>
    %398 = vector.broadcast %377 : vector<1x64xf32> to vector<16x64xf32>
    %399 = arith.mulf %397, %398 : vector<16x64xf32>
    %400 = vector.broadcast %379 : vector<1x64xf32> to vector<16x64xf32>
    %401 = arith.addf %399, %400 : vector<16x64xf32>
    %402 = arith.truncf %401 : vector<16x64xf32> to vector<16x64xbf16>
    %c0_226 = arith.constant 0 : index
    %c0_227 = arith.constant 0 : index
    %403 = vector.load %arg23[%c0_226, %c0_227] : memref<64x128xbf16, #tpu.memory_space<vmem>>, vector<64x128xbf16>
    %cst_228 = arith.constant dense<0.000000e+00> : vector<16x128xf32>
    %404 = tpu.matmul %402, %403, %cst_228 {dimension_numbers = #tpu.dot_dimension_numbers<[1], [0], [0], [1], [0, 0, 1, 1], [], []>} : vector<16x64xbf16>, vector<64x128xbf16>, vector<16x128xf32> -> vector<16x128xf32>
    %c0_229 = arith.constant 0 : index
    %c0_230 = arith.constant 0 : index
    %405 = vector.load %arg24[%c0_229, %c0_230] : memref<1x128xf32, #tpu.memory_space<vmem>>, vector<1x128xf32>
    %406 = vector.broadcast %405 : vector<1x128xf32> to vector<16x128xf32>
    %407 = arith.addf %404, %406 : vector<16x128xf32>
    %c0_231 = arith.constant 0 : index
    %c0_232 = arith.constant 0 : index
    %408 = vector.load %arg25[%c0_231, %c0_232] : memref<16x128xf32, #tpu.memory_space<vmem>>, vector<16x128xf32>
    tpu.vector_store %arg25[%c0_231, %c0_232], %407 {strides = array<i32>} : memref<16x128xf32, #tpu.memory_space<vmem>>, vector<16x128xf32>,
    return
  }
}

</mosaic_0001>

<bundles_post_ra>
// kernel: tpu_custom_call.1
= control target key start
LH: loop header
LB: loop body
LE: loop exit
PB: predicated region body
PF: predicated region fallthrough
CT: control target
= control target key end

     0   :  { %s5395_s0 = inlined_call_operand.vmem [shape: f32[16,5], index: 0, kind: input, shape index: {}]   ;;  %s5396_s1 = inlined_call_operand.hbm [shape: f32[16,64], index: 1, kind: input, shape index: {}]   ;;  %s5397_s2 = inlined_call_operand.hbm [shape: f32[16,128], index: 2, kind: input, shape index: {}]   ;;  %s5398_s3 = inlined_call_operand.vmem [shape: f32[128,64], index: 3, kind: input, shape index: {}]   ;;  %s5399_s4 = inlined_call_operand.hbm [shape: bf16[5,64], index: 4, kind: input, shape index: {}]   ;;  %s5400_s5 = inlined_call_operand.hbm [shape: f32[1,64], index: 5, kind: input, shape index: {}]   ;;  %s5401_s6 = inlined_call_operand.hbm [shape: f32[1,64], index: 6, kind: input, shape index: {}]   ;;  %s5402_s7 = inlined_call_operand.vmem [shape: bf16[3,64,64], index: 7, kind: input, shape index: {}]   ;;  %s5403_s8 = inlined_call_operand.hbm [shape: f32[3,1,64], index: 8, kind: input, shape index: {}]   ;;  %s5404_s9 = inlined_call_operand.vmem [shape: bf16[3,64,64], index: 9, kind: input, shape index: {}]   ;;  %s5405_s10 = inlined_call_operand.vmem [shape: f32[3,1,64], index: 10, kind: input, shape index: {}]   ;;  %s5406_s11 = inlined_call_operand.vmem [shape: bf16[3,64,64], index: 11, kind: input, shape index: {}]   ;;  %s5407_s12 = inlined_call_operand.vmem [shape: f32[3,1,64], index: 12, kind: input, shape index: {}]   ;;  %s5408_s13 = inlined_call_operand.vmem [shape: bf16[3,64,64], index: 13, kind: input, shape index: {}]   ;;  %s5409_s14 = inlined_call_operand.vmem [shape: f32[3,1,64], index: 14, kind: input, shape index: {}]   ;;  %s5410_s15 = inlined_call_operand.vmem [shape: f32[3,1,64], index: 15, kind: input, shape index: {}]   ;;  %s5411_s16 = inlined_call_operand.vmem [shape: f32[3,1,64], index: 16, kind: input, shape index: {}]   ;;  %s5412_s17 = inlined_call_operand.hbm [shape: bf16[3,64,128], index: 17, kind: input, shape index: {}]   ;;  %s5413_s18 = inlined_call_operand.vmem [shape: f32[3,1,128], index: 18, kind: input, shape index: {}]   ;;  %s5414_s19 = inlined_call_operand.vmem [shape: bf16[3,128,64], index: 19, kind: input, shape index: {}]   ;;  %s5415_s20 = inlined_call_operand.vmem [shape: f32[3,1,64], index: 20, kind: input, shape index: {}]   ;;  %s5416_s21 = inlined_call_operand.vmem [shape: f32[3,1,64], index: 21, kind: input, shape index: {}]   ;;  %s5417_s22 = inlined_call_operand.vmem [shape: f32[3,1,64], index: 22, kind: input, shape index: {}]   ;;  %s5418_s23 = inlined_call_operand.vmem [shape: bf16[64,128], index: 23, kind: input, shape index: {}]   ;;  %s5419_s24 = inlined_call_operand.vmem [shape: f32[1,128], index: 24, kind: input, shape index: {}]   ;;  %s5420_s25 = inlined_call_operand.hbm [shape: f32[16,128], index: 25, kind: output, shape index: {}]  }
   0x1   :  { %5425 = sst [smem:[#allocation20_spill]] %s5395_s0 }
   0x2   :  { %5426 = sst [smem:[#allocation21_spill]] %s5396_s1 }
   0x3   :  { %5427 = sst [smem:[#allocation22_spill]] %s5397_s2 }
   0x4   :  { %5428 = sst [smem:[#allocation23_spill]] %s5398_s3 }
   0x5   :  { %5429 = sst [smem:[#allocation24_spill]] %s5399_s4 }
   0x6   :  { %5430 = sst [smem:[#allocation25_spill]] %s5400_s5 }
   0x7   :  { %5431 = sst [smem:[#allocation26_spill]] %s5401_s6 }
   0x8   :  { %5432 = sst [smem:[#allocation27_spill]] %s5402_s7 }
   0x9   :  { %5433 = sst [smem:[#allocation28_spill]] %s5403_s8 }
   0xa   :  { %5434 = sst [smem:[#allocation29_spill]] %s5404_s9 }
   0xb   :  { %5435 = sst [smem:[#allocation30_spill]] %s5420_s25 }
   0xc   :  { %30 = vsyncpa [#allocation3], 0 }
   0xd   :  { %31 = vsyncpa [#allocation6], 0 }
   0xe   :  { %32 = vsyncpa [#allocation9], 0 }
   0xf   :  { %33 = vsyncpa [#allocation12], 0 }
  0x10   :  { %34 = vsyncpa [#allocation4], 0  ;;  %s4200_s29 = smov [#allocation5]   ;;  %s4201_s6 = smov [#allocation8]  }
  0x11   :  { %s54_s2 = sshll.u32 %s4200_s29, 4  ;;  %s79_s30 = sshll.u32 %s4201_s6, 4  ;;  %s55_s2 = int_to_ptr.vmem [resolvable:$true] %s54_s2  ;;  %s80_s30 = int_to_ptr.vmem [resolvable:$true] %s79_s30 }
  0x12   :  { %s4038_s7 = scalar_lea.vmem %s55_s2, 256  ;;  %p4043_p1 = scmp.lt.s32.totalorder %s55_s2, %s55_s2 }
  0x13   :  { %p4039_p0 = scmp.ne.s32.totalorder %s55_s2, %s4038_s7  ;;  %p4044_p2 = scmp.lt.s32.totalorder %s4038_s7, %s4038_s7 }
  0x15   :  { %p4045_p3 = por %p4044_p2, %p4043_p1 }
  0x17   :  { %p4046_p4 = pnand %p4045_p3, %p4039_p0 }
  0x19   :  { %4049 = shalt.err (!%p4046_p4)
}
  0x1a   :  { %s4202_s3 = smov 128   ;;  %s4203_s26 = smov 8  }
  0x1b   :  { %s5436_s27 = sld [smem:[#allocation22_spill]]  ;;  %s4058_s4 = scalar_lea.vmem %s80_s30, 16 }
  0x1c   :  { %p4059_p5 = scmp.ne.s32.totalorder %s80_s30, %s4058_s4  ;;  %s4062_s28 = scalar_lea.vmem %s80_s30, 32 }
  0x1d   :  { %p4063_p6 = scmp.lt.s32.totalorder %s80_s30, %s80_s30  ;;  %p4064_p7 = scmp.lt.s32.totalorder %s4062_s28, %s4058_s4 }
  0x1f   :  { %p4065_p8 = por %p4064_p7, %p4063_p6 }
  0x21   :  { %60 = dma.hbm_to_vmem [thread:$0]  %s5436_s27, 256, %s55_s2, [#allocation6], %s4202_s3, %s4202_s3, %s4203_s26  }
  0x22   :  { %p4066_p9 = pnand %p4065_p8, %p4059_p5 }
  0x24   :  { %4069 = shalt.err (!%p4066_p9)
}
  0x25   :  { %s5437_s0 = sld [smem:[#allocation25_spill]]  ;;  %s4204_s29 = smov [#allocation11]  }
  0x26   :  { %s100_s6 = sshll.u32 %s4204_s29, 4  ;;  %s101_s6 = int_to_ptr.vmem [resolvable:$true] %s100_s6 }
  0x27   :  { %s4078_s7 = scalar_lea.vmem %s101_s6, 48  ;;  %s4082_s25 = scalar_lea.vmem %s101_s6, 64 }
  0x28   :  { %p4079_p10 = scmp.ne.s32.totalorder %s101_s6, %s4078_s7  ;;  %p4083_p11 = scmp.lt.s32.totalorder %s101_s6, %s101_s6 }
  0x29   :  { %p4084_p12 = scmp.lt.s32.totalorder %s4082_s25, %s4078_s7 }
  0x2b   :  { %82 = dma.hbm_to_vmem [thread:$0]  %s5437_s0, 16, %s80_s30, [#allocation9]  }
  0x2c   :  { %p4085_p13 = por %p4084_p12, %p4083_p11 }
  0x2e   :  { %p4086_p0 = pnand %p4085_p13, %p4079_p10 }
  0x30   :  { %4089 = shalt.err (!%p4086_p0)
}
  0x31   :  { %s4205_s2 = smov 16   ;;  %s4206_s1 = smov 1  }
  0x32   :  { %s5438_s4 = sld [smem:[#allocation28_spill]]  ;;  %s4207_s28 = smov [#allocation2]  }
  0x33   :  { %s42_s9 = sshll.u32 %s4207_s28, 4  ;;  %s4208_s30 = smov [#allocation7]   ;;  %s43_s9 = int_to_ptr.vmem [resolvable:$true] %s42_s9 }
  0x34   :  { %s69_s5 = sshll.u32 %s4208_s30, 4  ;;  %s4098_s0 = scalar_lea.vmem %s43_s9, 256  ;;  %s70_s5 = int_to_ptr.vmem [resolvable:$true] %s69_s5 }
  0x35   :  { %p4099_p1 = scmp.ne.s32.totalorder %s43_s9, %s4098_s0  ;;  %p4103_p2 = scmp.lt.s32.totalorder %s43_s9, %s43_s9 }
  0x36   :  { %p4104_p3 = scmp.lt.s32.totalorder %s4098_s0, %s4098_s0 }
  0x38   :  { %106 = dma.hbm_to_vmem [thread:$0]  %s5438_s4, 48, %s101_s6, [#allocation12], %s4205_s2, %s4205_s2, %s4206_s1  }
  0x39   :  { %p4105_p4 = por %p4104_p3, %p4103_p2 }
  0x3b   :  { %p4106_p5 = pnand %p4105_p4, %p4099_p1 }
  0x3d   :  { %4109 = shalt.err (!%p4106_p5)
}
  0x3e   :  { %s5439_s7 = sld [smem:[#allocation21_spill]]  ;;  %s4118_s6 = scalar_lea.vmem %s70_s5, 64 }
  0x3f   :  { %p4119_p6 = scmp.ne.s32.totalorder %s70_s5, %s4118_s6  ;;  %p4123_p7 = scmp.lt.s32.totalorder %s70_s5, %s70_s5 }
  0x40   :  { %p4124_p8 = scmp.lt.s32.totalorder %s4118_s6, %s4118_s6 }
  0x42   :  { %p4125_p9 = por %p4124_p8, %p4123_p7 }
  0x44   :  { %48 = dma.hbm_to_vmem [thread:$0]  %s5439_s7, 256, %s43_s9, [#allocation3], %s4202_s3, %s4202_s3, %s4203_s26  }
  0x45   :  { %p4126_p10 = pnand %p4125_p9, %p4119_p6 }
  0x47   :  { %4129 = shalt.err (!%p4126_p10)
}
  0x48   :  { %s5440_s8 = sld [smem:[#allocation24_spill]]  ;;  %s4209_s27 = smov [#allocation10]  }
  0x49   :  { %s89_s4 = sshll.u32 %s4209_s27, 4  ;;  %s4210_s28 = smov [#allocation13]   ;;  %s90_s4 = int_to_ptr.vmem [resolvable:$true] %s89_s4 }
  0x4a   :  { %s128_s30 = sshll.u32 %s4210_s28, 4  ;;  %s4138_s0 = scalar_lea.vmem %s90_s4, 16  ;;  %s129_s30 = int_to_ptr.vmem [resolvable:$true] %s128_s30 }
  0x4b   :  { %p4139_p11 = scmp.ne.s32.totalorder %s90_s4, %s4138_s0  ;;  %s4142_s9 = scalar_lea.vmem %s90_s4, 32 }
  0x4c   :  { %p4143_p12 = scmp.lt.s32.totalorder %s90_s4, %s90_s4  ;;  %p4144_p13 = scmp.lt.s32.totalorder %s4142_s9, %s4138_s0 }
  0x4e   :  { %72 = dma.hbm_to_vmem [thread:$0]  %s5440_s8, 64, %s70_s5, [#allocation6]  }
  0x4f   :  { %p4145_p0 = por %p4144_p13, %p4143_p12 }
  0x51   :  { %p4146_p1 = pnand %p4145_p0, %p4139_p11 }
  0x53   :  { %4149 = shalt.err (!%p4146_p1)
}
  0x54   :  { %s5441_s7 = sld [smem:[#allocation26_spill]]  ;;  %s4158_s6 = scalar_lea.vmem %s129_s30, 1536 }
  0x55   :  { %p4159_p2 = scmp.ne.s32.totalorder %s129_s30, %s4158_s6  ;;  %p4163_p3 = scmp.lt.s32.totalorder %s129_s30, %s129_s30 }
  0x56   :  { %p4164_p4 = scmp.lt.s32.totalorder %s4158_s6, %s4158_s6 }
  0x58   :  { %p4165_p5 = por %p4164_p4, %p4163_p3 }
  0x5a   :  { %92 = dma.hbm_to_vmem [thread:$0]  %s5441_s7, 16, %s90_s4, [#allocation9]  }
  0x5b   :  { %p4166_p6 = pnand %p4165_p5, %p4159_p2 }
  0x5d   :  { %4169 = shalt.err (!%p4166_p6)
}
  0x5e   :  { %s4211_s5 = smov 64   ;;  %s4212_s2 = smov 4  }
  0x5f   :  { %134 = dma.hbm_to_vmem [thread:$0]  %s5412_s17, 1536, %s129_s30, [#allocation12], %s4211_s5, %s4211_s5, %s4212_s2  }
  0x60   :  { %4190 = dma.done.wait [#allocation3], 256  }
  0x61   :  { %4191 = vsyncadd [#allocation3], 4294967040 }
  0x62   :  { %4192 = dma.done.wait [#allocation6], 320  }
  0x63   :  { %4193 = vsyncadd [#allocation6], 4294966976 }
  0x64   :  { %4194 = dma.done.wait [#allocation9], 32  }
  0x65   :  { %4195 = vsyncadd [#allocation9], 4294967264 }
  0x66   :  { %4196 = dma.done.wait [#allocation12], 1584  }
  0x67   :  { %4197 = vsyncadd [#allocation12], 4294965712  ;;  %vm207_vm0 = vcmask 1041408   ;;  %v4213_v0 = vmov 0.0   ;;  %vm208_vm1 = vcmask 1042432   ;;  %v4214_v1 = vmov 65535  }
  0x68   :  { %3417 = vmatprep.subr.bf16.mxu0 %v4213_v0  ;;  %3423 = vmatprep.subr.bf16.mxu1 %v4213_v0  ;;  %v209_v2 = vsel %vm207_vm0, 4294967295, %v4214_v1  ;;  %vm4215_vm2 = vmmov 0   ;;  %v200_v4 = vld [vmem:[#allocation7] sm:$0x7]  ;;  %s5442_s4 = sld [smem:[#allocation20_spill]]  ;;  %vm203_vm3 = vcmask 39936  }
  0x69   :  { %3419 = vmatprep.mubr.msk.bf16.mxu0 %vm4215_vm2, %v4213_v0  ;;  %3431 = vmatprep.mubr.msk.bf16.mxu1 %vm4215_vm2, %v4213_v0  ;;  %v210_v3 = vsel %vm208_vm1, %v209_v2, 0  ;;  %v201_v9 = vld [vmem:[#allocation2] sm:$0xff]  ;;  %vm257_vm4 = vcmask 523264   ;;  %v202_v13 = vld [vmem:[#allocation2 + $0x8] sm:$0xff]  ;;  %s5443_s25 = sld [smem:[#allocation27_spill]]  ;;  %v3880_v57 = vld [vmem:[%s5406_s11 + $0x18] sm:$0xff]  }
  0x6a   :  { %v212_v7 = vand.u32 %v210_v3, %v200_v4  ;;  %s5444_s6 = sld [smem:[#allocation29_spill]]  ;;  %v2973_v48 = vld [vmem:[#allocation8] ss:$0 sm:$0xff]  ;;  %v2974_v53 = vld [vmem:[#allocation10] ss:$0 sm:$0xff]  ;;  %v3881_v59 = vld [vmem:[%s5406_s11 + $0x10] sm:$0xff]  }
  0x6b   :  { %v3882_v60 = vld [vmem:[%s5406_s11 + $0x8] sm:$0xff]   ;;  %v3883_v61 = vld [vmem:[%s5406_s11] sm:$0xff]   ;;  %s5445_s29 = sld [smem:[#allocation23_spill]] }
  0x6c   :  { %3418 = vmatpush3.bf16.msra.mxu0 %v212_v7  ;;  %v2981_v63 = vld [vmem:[%s5405_s10] ss:$0 sm:$0xff]  ;;  %v2975_v2 = vld [vmem:[#allocation11] ss:$0 sm:$0xff] }
  0x6d   :  { %3435 = vmatprep.subr.bf16.mxu0 %v4213_v0 }
  0x6e   :  { %v197_v5 = vld [vmem:[%s5442_s4] sm:$0xff]  ;;  %v198_v6 = vld [vmem:[%s5442_s4 + $0x8] sm:$0xff] }
  0x6f   :  { %v199_v8 = vpack.c.bf16 %v198_v6, %v197_v5  ;;  %v3872_v23 = vld [vmem:[%s5443_s25 + $0x18] sm:$0xff]   ;;  %v3874_v25 = vld [vmem:[%s5443_s25 + $0x10] sm:$0xff]   ;;  %v3876_v27 = vld [vmem:[%s5443_s25 + $0x8] sm:$0xff]  }
  0x70   :  { %v3873_v24 = vld [vmem:[%s5444_s6 + $0x18] sm:$0xff]   ;;  %3424 = vmatpush3.bf16.msra.mxu1 %v3872_v23  ;;  %v3875_v26 = vld [vmem:[%s5444_s6 + $0x10] sm:$0xff]   ;;  %v3877_v28 = vld [vmem:[%s5444_s6 + $0x8] sm:$0xff]  }
  0x71   :  { %3420 = vmatmul.mubr.msk.bf16.vlgmr.msra.gmra.mxu0 %vm203_vm3, %v199_v8  ;;  %3425 = vmatprep.subr.bf16.mxu1 %v4213_v0  ;;  %v3878_v29 = vld [vmem:[%s5443_s25] sm:$0xff]   ;;  %v4464_v8 = vld [vmem:[%s5445_s29 + $0x70] sm:$0xff] }
  0x72   :  { %3443 = vmatprep.mubr.msk.bf16.mxu0 %vm4215_vm2, %v4213_v0  ;;  %3436 = vmatpush3.bf16.msra.mxu0 %v3873_v24  ;;  %v3879_v30 = vld [vmem:[%s5444_s6] sm:$0xff]  }
  0x73   :  { %3437 = vmatprep.subr.bf16.mxu0 %v4213_v0 }
  0x74   :  { %3426 = vmatpush3.bf16.msra.mxu1 %v3874_v25  ;;  %v2987_v25 = vld [vmem:[%s5407_s12] ss:$0 sm:$0xff] }
  0x75   :  { %3427 = vmatprep.subr.bf16.mxu1 %v4213_v0 }
  0x76   :  { %3438 = vmatpush3.bf16.msra.mxu0 %v3875_v26 }
  0x77   :  { %3439 = vmatprep.subr.bf16.mxu0 %v4213_v0 }
  0x78   :  { %3428 = vmatpush3.bf16.msra.mxu1 %v3876_v27  ;;  %v4505_v27 = vld [vmem:[%s5445_s29 + $0x58] sm:$0xff] }
  0x79   :  { %3429 = vmatprep.subr.bf16.mxu1 %v4213_v0 }
  0x7a   :  { %3440 = vmatpush3.bf16.msra.mxu0 %v3877_v28 }
  0x7b   :  { %3441 = vmatprep.subr.bf16.mxu0 %v4213_v0 }
  0x7c   :  { %3430 = vmatpush3.bf16.msra.mxu1 %v3878_v29  ;;  %v4510_v29 = vld [vmem:[%s5445_s29 + $0x50] sm:$0xff] }
  0x7d   :  { %3447 = vmatprep.subr.bf16.mxu1 %v4213_v0 }
  0x7e   :  { %3442 = vmatpush3.bf16.msra.mxu0 %v3879_v30 }
  0x7f   :  { %3459 = vmatprep.subr.bf16.mxu0 %v4213_v0 }
 0x131   :  { %v248_v10 = vpop.f32.mrf.mxu0 }
 0x132   :  { %v249_v11 = vadd.f32 %v248_v10, %v201_v9  ;;  %v4469_v9 = vld [vmem:[%s5445_s29 + $0x78] sm:$0xff] }
 0x133   :  { %v3421_v12 = vpop.f32.mrf.mxu0 }
 0x134   :  { %v258_v14 = vsel %vm257_vm4, %v249_v11, 0.0  ;;  %v267_v15 = vmul.f32 %v249_v11, %v249_v11 }
 0x135   :  { %259 = vadd.xlane.f32.xlu0 %v258_v14  ;;  %v251_v16 = vpop.f32.mrf.mxu0 }
 0x136   :  { %v252_v17 = vadd.f32 %v251_v16, %v202_v13  ;;  %v269_v18 = vsel %vm257_vm4, %v267_v15, 0.0 }
 0x137   :  { %270 = vadd.xlane.f32.xlu1 %v269_v18  ;;  %v3422_v19 = vpop.f32.mrf.mxu0  ;;  %v4486_v18 = vld [vmem:[%s5445_s29 + $0x68] sm:$0xff] }
 0x138   :  { %v261_v20 = vsel %vm257_vm4, %v252_v17, 0.0  ;;  %v268_v21 = vmul.f32 %v252_v17, %v252_v17 }
 0x139   :  { %262 = vadd.xlane.f32.xlu0 %v261_v20  ;;  %v4491_v20 = vld [vmem:[%s5445_s29 + $0x60] sm:$0xff] }
 0x13a   :  { %v272_v22 = vsel %vm257_vm4, %v268_v21, 0.0 }
 0x13b   :  { %273 = vadd.xlane.f32.xlu1 %v272_v22 }
 0x1be   :  { %v260_v31 = vpop.xlane.xlu0 %259 }
 0x1bf   :  { %v265_v32 = vmul.f32 0.015625, %v260_v31 }
 0x1c0   :  { %v271_v33 = vpop.xlane.xlu1 %270 }
 0x1c1   :  { %v277_v34 = vmul.f32 %v265_v32, %v265_v32  ;;  %v275_v35 = vmul.f32 0.015625, %v271_v33  ;;  %v281_v45 = vsub.f32 %v249_v11, %v265_v32 }
 0x1c2   :  { %v263_v36 = vpop.xlane.xlu0 %262 }
 0x1c3   :  { %v279_v37 = vsub.f32 %v275_v35, %v277_v34  ;;  %v266_v38 = vmul.f32 0.015625, %v263_v36 }
 0x1c4   :  { %v274_v39 = vpop.xlane.xlu1 %273 }
 0x1c5   :  { %v283_v40 = vadd.f32 1e-05, %v279_v37  ;;  %v278_v41 = vmul.f32 %v266_v38, %v266_v38  ;;  %v276_v42 = vmul.f32 0.015625, %v274_v39  ;;  %v282_v49 = vsub.f32 %v252_v17, %v266_v38 }
 0x1c7   :  { %3960 = vrsqrt.f32 %v283_v40  ;;  %v280_v43 = vsub.f32 %v276_v42, %v278_v41  ;;  %v4529_v40 = vld [vmem:[%s5445_s29 + $0x48] sm:$0xff] }
 0x1c9   :  { %v284_v44 = vadd.f32 1e-05, %v280_v43  ;;  %v4536_v43 = vld [vmem:[%s5445_s29 + $0x40] sm:$0xff] }
 0x1cb   :  { %3962 = vrsqrt.f32 %v284_v44 }
 0x1d4   :  { %v3961_v46 = vpop.eup %3960 }
 0x1d5   :  { %v287_v47 = vmul.f32 %v3961_v46, %v281_v45 }
 0x1d7   :  { %v295_v52 = vmul.f32 %v2973_v48, %v287_v47 }
 0x1d8   :  { %v3963_v50 = vpop.eup %3962 }
 0x1d9   :  { %v288_v51 = vmul.f32 %v3963_v50, %v282_v49  ;;  %v4425_v55 = vadd.f32 %v2974_v53, %v295_v52  ;;  %v4555_v52 = vld [vmem:[%s5445_s29 + $0x38] sm:$0xff] }
 0x1db   :  { %v296_v54 = vmul.f32 %v2973_v48, %v288_v51 }
 0x1dd   :  { %v4427_v56 = vadd.f32 %v2974_v53, %v296_v54 }
 0x1df   :  { %v305_v58 = vpack.c.bf16 %v4427_v56, %v4425_v55 }
 0x1e1   :  { %3432 = vmatmul.mubr.msk.bf16.vlgmr.msra.gmra.mxu1 %vm257_vm4, %v305_v58  ;;  %3444 = vmatmul.mubr.msk.bf16.vlgmr.msra.gmra.mxu0 %vm257_vm4, %v305_v58 }
 0x1e2   :  { %3448 = vmatpush3.bf16.msra.mxu1 %v3880_v57  ;;  %3455 = vmatprep.mubr.msk.bf16.mxu1 %vm4215_vm2, %v4213_v0  ;;  %v4562_v57 = vld [vmem:[%s5445_s29 + $0x30] sm:$0xff] }
 0x1e3   :  { %3449 = vmatprep.subr.bf16.mxu1 %v4213_v0  ;;  %3475 = vmatprep.mubr.msk.bf16.mxu0 %vm4215_vm2, %v4213_v0 }
 0x1e6   :  { %3450 = vmatpush3.bf16.msra.mxu1 %v3881_v59 }
 0x1e7   :  { %3451 = vmatprep.subr.bf16.mxu1 %v4213_v0 }
 0x1ea   :  { %3452 = vmatpush3.bf16.msra.mxu1 %v3882_v60 }
 0x1eb   :  { %3453 = vmatprep.subr.bf16.mxu1 %v4213_v0 }
 0x1ee   :  { %3454 = vmatpush3.bf16.msra.mxu1 %v3883_v61 }
 0x1ef   :  { %3479 = vmatprep.subr.bf16.mxu1 %v4213_v0 }
 0x1f1   :  { %3456 = vmatmul.mubr.msk.bf16.vlgmr.msra.gmra.mxu1 %vm257_vm4, %v305_v58 }
 0x1f2   :  { %3495 = vmatprep.mubr.msk.bf16.mxu1 %vm4215_vm2, %v4213_v0 }
 0x2a1   :  { %v382_v62 = vpop.f32.mrf.mxu1  ;;  %v462_v1 = vpop.f32.mrf.mxu0 }
 0x2a2   :  { %v4459_v5 = vadd.f32 %v2981_v63, %v462_v1  ;;  %v4471_v10 = vadd.f32 %v2975_v2, %v382_v62 }
 0x2a3   :  { %v3433_v3 = vpop.f32.mrf.mxu1  ;;  %v3445_v4 = vpop.f32.mrf.mxu0 }
 0x2a4   :  { %v563_v16 = vmul.f32 %v4459_v5, %v4464_v8  ;;  %v561_v23 = vmul.f32 %v4459_v5, %v4491_v20  ;;  %v559_v35 = vmul.f32 %v4459_v5, %v4510_v29  ;;  %v557_v49 = vmul.f32 %v4459_v5, %v4536_v43  ;;  %v4581_v3 = vld [vmem:[%s5445_s29 + $0x28] sm:$0xff] }
 0x2a5   :  { %v385_v6 = vpop.f32.mrf.mxu1  ;;  %v465_v7 = vpop.f32.mrf.mxu0 }
 0x2a6   :  { %v4473_v11 = vadd.f32 %v2975_v2, %v385_v6  ;;  %v4475_v12 = vadd.f32 %v2981_v63, %v465_v7  ;;  %v555_v63 = vmul.f32 %v4459_v5, %v4562_v57  ;;  %v4588_v7 = vld [vmem:[%s5445_s29 + $0x20] sm:$0xff] }
 0x2a7   :  { %v3434_v13 = vpop.f32.mrf.mxu1  ;;  %v3446_v14 = vpop.f32.mrf.mxu0 }
 0x2a8   :  { %v597_v15 = vpack.c.bf16 %v4473_v11, %v4471_v10  ;;  %v564_v17 = vmul.f32 %v4475_v12, %v4469_v9  ;;  %v562_v22 = vmul.f32 %v4475_v12, %v4486_v18  ;;  %v560_v32 = vmul.f32 %v4475_v12, %v4505_v27 }
 0x2a9   :  { %v558_v46 = vmul.f32 %v4475_v12, %v4529_v40  ;;  %v556_v60 = vmul.f32 %v4475_v12, %v4555_v52 }
 0x2aa   :  { %v572_v19 = vpack.c.bf16 %v564_v17, %v563_v16  ;;  %v571_v24 = vpack.c.bf16 %v562_v22, %v561_v23  ;;  %v570_v39 = vpack.c.bf16 %v560_v32, %v559_v35  ;;  %v554_v16 = vmul.f32 %v4475_v12, %v4581_v3  ;;  %v4599_v17 = vld [vmem:[%s5445_s29 + $0x18] sm:$0xff]  ;;  %v4609_v23 = vld [vmem:[%s5445_s29 + $0x10] sm:$0xff]  ;;  %v4624_v32 = vld [vmem:[%s5445_s29] sm:$0xff] }
 0x2ab   :  { %v569_v51 = vpack.c.bf16 %v558_v46, %v557_v49  ;;  %v568_v2 = vpack.c.bf16 %v556_v60, %v555_v63  ;;  %v553_v22 = vmul.f32 %v4459_v5, %v4588_v7  ;;  %v4658_v60 = vpack.c.bf16 %v4469_v9, %v4464_v8 }
 0x2ac   :  { %v623_v21 = vsel %vm257_vm4, %v572_v19, 0  ;;  %v620_v31 = vsel %vm257_vm4, %v571_v24, 0  ;;  %v617_v44 = vsel %vm257_vm4, %v570_v39, 0  ;;  %v4671_v63 = vpack.c.bf16 %v4505_v27, %v4510_v29 }
 0x2ad   :  { %3460 = vmatpush3.bf16.xpose.msra.mxu0 %v623_v21  ;;  %v614_v58 = vsel %vm257_vm4, %v569_v51, 0  ;;  %v611_v13 = vsel %vm257_vm4, %v568_v2, 0  ;;  %v4683_v2 = vpack.c.bf16 %v4555_v52, %v4562_v57 }
 0x2ae   :  { %3461 = vmatprep.subr.bf16.mxu0 %v4213_v0 }
 0x2b1   :  { %v542_v26 = vpop.f32.mrf.mxu1 }
 0x2b2   :  { %v4512_v30 = vadd.f32 %v2987_v25, %v542_v26  ;;  %v4617_v26 = vld [vmem:[%s5445_s29 + $0x8] sm:$0xff] }
 0x2b3   :  { %v3457_v28 = vpop.f32.mrf.mxu1 }
 0x2b4   :  { %v587_v37 = vmul.f32 %v4512_v30, %v4464_v8  ;;  %v585_v45 = vmul.f32 %v4512_v30, %v4491_v20  ;;  %v583_v50 = vmul.f32 %v4512_v30, %v4510_v29  ;;  %v581_v59 = vmul.f32 %v4512_v30, %v4536_v43 }
 0x2b5   :  { %v545_v33 = vpop.f32.mrf.mxu1  ;;  %3462 = vmatpush3.bf16.xpose.msra.mxu0 %v620_v31  ;;  %v579_v1 = vmul.f32 %v4512_v30, %v4562_v57  ;;  %v577_v14 = vmul.f32 %v4512_v30, %v4588_v7  ;;  %v575_v24 = vmul.f32 %v4512_v30, %v4609_v23  ;;  %v573_v35 = vmul.f32 %v4512_v30, %v4624_v32 }
 0x2b6   :  { %v4517_v34 = vadd.f32 %v2987_v25, %v545_v33  ;;  %3463 = vmatprep.subr.bf16.mxu0 %v4213_v0  ;;  %v567_v25 = vpack.c.bf16 %v554_v16, %v553_v22  ;;  %v550_v30 = vmul.f32 %v4475_v12, %v4617_v26  ;;  %v3885_v16 = vld [vmem:[%s5408_s13 + $0x10] sm:$0xff]  }
 0x2b7   :  { %v3458_v36 = vpop.f32.mrf.mxu1 }
 0x2b8   :  { %v588_v38 = vmul.f32 %v4517_v34, %v4469_v9  ;;  %v586_v42 = vmul.f32 %v4517_v34, %v4486_v18  ;;  %v584_v48 = vmul.f32 %v4517_v34, %v4505_v27  ;;  %v582_v54 = vmul.f32 %v4517_v34, %v4529_v40 }
 0x2b9   :  { %v580_v62 = vmul.f32 %v4517_v34, %v4555_v52  ;;  %v578_v6 = vmul.f32 %v4517_v34, %v4581_v3  ;;  %v576_v21 = vmul.f32 %v4517_v34, %v4599_v17  ;;  %v574_v31 = vmul.f32 %v4517_v34, %v4617_v26 }
 0x2ba   :  { %v596_v41 = vpack.c.bf16 %v588_v38, %v587_v37  ;;  %v595_v47 = vpack.c.bf16 %v586_v42, %v585_v45  ;;  %v594_v53 = vpack.c.bf16 %v584_v48, %v583_v50  ;;  %v593_v61 = vpack.c.bf16 %v582_v54, %v581_v59 }
 0x2bb   :  { %v592_v4 = vpack.c.bf16 %v580_v62, %v579_v1  ;;  %v591_v19 = vpack.c.bf16 %v578_v6, %v577_v14  ;;  %v590_v28 = vpack.c.bf16 %v576_v21, %v575_v24  ;;  %v608_v33 = vsel %vm257_vm4, %v567_v25, 0  ;;  %v3884_v14 = vld [vmem:[%s5408_s13 + $0x18] sm:$0xff]   ;;  %v3887_v21 = vld [vmem:[%s5408_s13] sm:$0xff]  }
 0x2bc   :  { %3480 = vmatpush3.bf16.msra.mxu1 %v596_v41  ;;  %v552_v36 = vmul.f32 %v4475_v12, %v4599_v17  ;;  %v589_v37 = vpack.c.bf16 %v574_v31, %v573_v35  ;;  %v551_v34 = vmul.f32 %v4459_v5, %v4609_v23  ;;  %v549_v41 = vmul.f32 %v4459_v5, %v4624_v32  ;;  %v4650_v12 = vld [vmem:[#allocation5] sm:$0xff] }
 0x2bd   :  { %3464 = vmatpush3.bf16.xpose.msra.mxu0 %v617_v44  ;;  %3481 = vmatprep.subr.bf16.mxu1 %v4213_v0  ;;  %v4663_v62 = vpack.c.bf16 %v4486_v18, %v4491_v20  ;;  %v4677_v1 = vpack.c.bf16 %v4529_v40, %v4536_v43  ;;  %v4695_v6 = vpack.c.bf16 %v4599_v17, %v4609_v23 }
 0x2be   :  { %3465 = vmatprep.subr.bf16.mxu0 %v4213_v0  ;;  %v566_v38 = vpack.c.bf16 %v552_v36, %v551_v34  ;;  %v565_v42 = vpack.c.bf16 %v550_v30, %v549_v41 }
 0x2c0   :  { %3482 = vmatpush3.bf16.msra.mxu1 %v595_v47  ;;  %v605_v39 = vsel %vm257_vm4, %v566_v38, 0  ;;  %v602_v44 = vsel %vm257_vm4, %v565_v42, 0  ;;  %v4653_v47 = vld [vmem:[#allocation5 + $0x8] sm:$0xff] }
 0x2c1   :  { %3483 = vmatprep.subr.bf16.mxu1 %v4213_v0 }
 0x2c4   :  { %3484 = vmatpush3.bf16.msra.mxu1 %v594_v53 }
 0x2c5   :  { %3466 = vmatpush3.bf16.xpose.msra.mxu0 %v614_v58  ;;  %3485 = vmatprep.subr.bf16.mxu1 %v4213_v0 }
 0x2c6   :  { %3467 = vmatprep.subr.bf16.mxu0 %v4213_v0 }
 0x2c8   :  { %3486 = vmatpush3.bf16.msra.mxu1 %v593_v61 }
 0x2c9   :  { %3487 = vmatprep.subr.bf16.mxu1 %v4213_v0 }
 0x2cc   :  { %3488 = vmatpush3.bf16.msra.mxu1 %v592_v4  ;;  %v4689_v4 = vpack.c.bf16 %v4581_v3, %v4588_v7 }
 0x2cd   :  { %3468 = vmatpush3.bf16.xpose.msra.mxu0 %v611_v13  ;;  %3489 = vmatprep.subr.bf16.mxu1 %v4213_v0  ;;  %v4701_v13 = vpack.c.bf16 %v4617_v26, %v4624_v32 }
 0x2ce   :  { %3469 = vmatprep.subr.bf16.mxu0 %v4213_v0 }
 0x2d0   :  { %3490 = vmatpush3.bf16.msra.mxu1 %v591_v19  ;;  %v3886_v19 = vld [vmem:[%s5408_s13 + $0x8] sm:$0xff]  }
 0x2d1   :  { %3491 = vmatprep.subr.bf16.mxu1 %v4213_v0 }
 0x2d4   :  { %3492 = vmatpush3.bf16.msra.mxu1 %v590_v28 }
 0x2d5   :  { %3470 = vmatpush3.bf16.xpose.msra.mxu0 %v608_v33  ;;  %3493 = vmatprep.subr.bf16.mxu1 %v4213_v0 }
 0x2d6   :  { %3471 = vmatprep.subr.bf16.mxu0 %v4213_v0 }
 0x2d8   :  { %3494 = vmatpush3.bf16.msra.mxu1 %v589_v37 }
 0x2d9   :  { %3499 = vmatprep.subr.bf16.mxu1 %v4213_v0 }
 0x2dd   :  { %3472 = vmatpush3.bf16.xpose.msra.mxu0 %v605_v39 }
 0x2de   :  { %3473 = vmatprep.subr.bf16.mxu0 %v4213_v0 }
 0x2e5   :  { %3474 = vmatpush3.bf16.xpose.msra.mxu0 %v602_v44  ;;  %v2994_v44 = vld [vmem:[%s5409_s14] ss:$0 sm:$0xff] }
 0x2e6   :  { %3519 = vmatprep.subr.bf16.mxu0 %v4213_v0 }
 0x2ec   :  { %3476 = vmatmul.mubr.msk.bf16.vlgmr.msra.gmra.mxu0 %vm257_vm4, %v597_v15 }
 0x2ed   :  { %3527 = vmatprep.mubr.msk.bf16.mxu0 %vm4215_vm2, %v4213_v0  ;;  %3520 = vmatpush3.bf16.msra.mxu0 %v3884_v14  ;;  %v3890_v14 = vld [vmem:[#allocation13 + $0x8] sm:$0xff]  }
 0x2ee   :  { %3521 = vmatprep.subr.bf16.mxu0 %v4213_v0 }
 0x2f1   :  { %3522 = vmatpush3.bf16.msra.mxu0 %v3885_v16  ;;  %v3892_v16 = vld [vmem:[%s5414_s19 + $0x38] sm:$0xff]  }
 0x2f2   :  { %3523 = vmatprep.subr.bf16.mxu0 %v4213_v0 }
 0x2f5   :  { %3524 = vmatpush3.bf16.msra.mxu0 %v3886_v19  ;;  %v3893_v19 = vld [vmem:[%s5414_s19 + $0x30] sm:$0xff]  }
 0x2f6   :  { %3525 = vmatprep.subr.bf16.mxu0 %v4213_v0 }
 0x2f9   :  { %3526 = vmatpush3.bf16.msra.mxu0 %v3887_v21  ;;  %v3894_v21 = vld [vmem:[%s5414_s19 + $0x28] sm:$0xff]  }
 0x2fa   :  { %3543 = vmatprep.subr.bf16.mxu0 %v4213_v0 }
 0x3ac   :  { %v659_v45 = vpop.f32.mrf.mxu0 }
 0x3ad   :  { %v660_v46 = vadd.f32 %v659_v45, %v4650_v12 }
 0x3ae   :  { %v3477_v5 = vpop.f32.mrf.mxu0 }
 0x3af   :  { %666 = vmax.xlane.f32.xlu0 %v660_v46 }
 0x3b0   :  { %v662_v48 = vpop.f32.mrf.mxu0 }
 0x3b1   :  { %v663_v49 = vadd.f32 %v662_v48, %v4653_v47 }
 0x3b2   :  { %v3478_v50 = vpop.f32.mrf.mxu0 }
 0x3b3   :  { %668 = vmax.xlane.f32.xlu1 %v663_v49 }
 0x438   :  { %v667_v10 = vpop.xlane.xlu0 %666 }
 0x439   :  { %v670_v11 = vsub.f32 %v660_v46, %v667_v10 }
 0x43b   :  { %v672_v15 = vmul.f32 1.442695, %v670_v11 }
 0x43c   :  { %v669_v51 = vpop.xlane.xlu1 %668 }
 0x43d   :  { %v671_v53 = vsub.f32 %v663_v49, %v669_v51  ;;  %3964 = vpow2.f32 %v672_v15 }
 0x43f   :  { %v674_v54 = vmul.f32 1.442695, %v671_v53 }
 0x441   :  { %3966 = vpow2.f32 %v674_v54 }
 0x44a   :  { %v3965_v58 = vpop.eup %3964 }
 0x44e   :  { %v3967_v59 = vpop.eup %3966 }
 0x44f   :  { %v676_v61 = vpack.c.bf16 %v3967_v59, %v3965_v58 }
 0x451   :  { %3496 = vmatmul.mubr.bf16.vlgmr.msra.gmra.mxu1 %v676_v61 }
 0x452   :  { %3500 = vmatpush3.bf16.msra.mxu1 %v4658_v60  ;;  %3515 = vmatprep.mubr.msk.bf16.mxu1 %vm4215_vm2, %v4213_v0 }
 0x453   :  { %3501 = vmatprep.subr.bf16.mxu1 %v4213_v0 }
 0x456   :  { %3502 = vmatpush3.bf16.msra.mxu1 %v4663_v62 }
 0x457   :  { %3503 = vmatprep.subr.bf16.mxu1 %v4213_v0 }
 0x45a   :  { %3504 = vmatpush3.bf16.msra.mxu1 %v4671_v63 }
 0x45b   :  { %3505 = vmatprep.subr.bf16.mxu1 %v4213_v0 }
 0x45e   :  { %3506 = vmatpush3.bf16.msra.mxu1 %v4677_v1 }
 0x45f   :  { %3507 = vmatprep.subr.bf16.mxu1 %v4213_v0 }
 0x462   :  { %3508 = vmatpush3.bf16.msra.mxu1 %v4683_v2 }
 0x463   :  { %3509 = vmatprep.subr.bf16.mxu1 %v4213_v0 }
 0x466   :  { %3510 = vmatpush3.bf16.msra.mxu1 %v4689_v4 }
 0x467   :  { %3511 = vmatprep.subr.bf16.mxu1 %v4213_v0 }
 0x46a   :  { %3512 = vmatpush3.bf16.msra.mxu1 %v4695_v6 }
 0x46b   :  { %3513 = vmatprep.subr.bf16.mxu1 %v4213_v0 }
 0x46e   :  { %3514 = vmatpush3.bf16.msra.mxu1 %v4701_v13 }
 0x46f   :  { %3531 = vmatprep.subr.bf16.mxu1 %v4213_v0 }
 0x471   :  { %3516 = vmatmul.mubr.bf16.vlgmr.msra.gmra.mxu1 %v676_v61  ;;  %v3889_v61 = vld [vmem:[#allocation13 + $0x10] sm:$0xff]  }
 0x472   :  { %3539 = vmatprep.mubr.msk.bf16.mxu1 %vm4215_vm2, %v4213_v0 }
 0x511   :  { %v711_v22 = vpop.f32.mrf.mxu1 }
 0x513   :  { %v3497_v24 = vpop.f32.mrf.mxu1 }
 0x514   :  { %v3896_v24 = vld [vmem:[%s5414_s19 + $0x18] sm:$0xff]  }
 0x515   :  { %v714_v25 = vpop.f32.mrf.mxu1 }
 0x517   :  { %v3498_v28 = vpop.f32.mrf.mxu1 }
 0x531   :  { %v752_v31 = vpop.f32.mrf.mxu1 }
 0x532   :  { %v759_v33 = vmax.f32 %v752_v31, 1e-20 }
 0x533   :  { %v3517_v35 = vpop.f32.mrf.mxu1 }
 0x534   :  { %3968 = vrcp.f32 %v759_v33 }
 0x535   :  { %v755_v36 = vpop.f32.mrf.mxu1 }
 0x536   :  { %v760_v37 = vmax.f32 %v755_v36, 1e-20 }
 0x537   :  { %v3518_v34 = vpop.f32.mrf.mxu1 }
 0x538   :  { %3970 = vrcp.f32 %v760_v37 }
 0x541   :  { %v3969_v38 = vpop.eup %3968 }
 0x542   :  { %v763_v30 = vmul.f32 %v3969_v38, %v711_v22  ;;  %v3895_v22 = vld [vmem:[%s5414_s19 + $0x20] sm:$0xff]  }
 0x545   :  { %v3971_v39 = vpop.eup %3970 }
 0x546   :  { %v764_v41 = vmul.f32 %v3971_v39, %v714_v25 }
 0x548   :  { %v765_v42 = vpack.c.bf16 %v764_v41, %v763_v30 }
 0x54a   :  { %3528 = vmatmul.mubr.msk.bf16.vlgmr.msra.gmra.mxu0 %vm257_vm4, %v765_v42 }
 0x54b   :  { %3559 = vmatprep.mubr.msk.bf16.mxu0 %vm4215_vm2, %v4213_v0  ;;  %3544 = vmatpush3.bf16.msra.mxu0 %v3892_v16 }
 0x54c   :  { %3545 = vmatprep.subr.bf16.mxu0 %v4213_v0 }
 0x54f   :  { %3546 = vmatpush3.bf16.msra.mxu0 %v3893_v19 }
 0x550   :  { %3547 = vmatprep.subr.bf16.mxu0 %v4213_v0 }
 0x553   :  { %3548 = vmatpush3.bf16.msra.mxu0 %v3894_v21 }
 0x554   :  { %3549 = vmatprep.subr.bf16.mxu0 %v4213_v0 }
 0x557   :  { %3550 = vmatpush3.bf16.msra.mxu0 %v3895_v22 }
 0x558   :  { %3551 = vmatprep.subr.bf16.mxu0 %v4213_v0 }
 0x55b   :  { %3552 = vmatpush3.bf16.msra.mxu0 %v3896_v24 }
 0x55c   :  { %3553 = vmatprep.subr.bf16.mxu0 %v4213_v0 }
 0x60a   :  { %v842_v45 = vpop.f32.mrf.mxu0 }
 0x60b   :  { %v843_v46 = vadd.f32 %v2994_v44, %v842_v45 }
 0x60c   :  { %v3529_v5 = vpop.f32.mrf.mxu0 }
 0x60d   :  { %v849_v48 = vadd.f32 %v843_v46, %v4425_v55  ;;  %v3888_v55 = vld [vmem:[#allocation13 + $0x18] sm:$0xff]  }
 0x60e   :  { %v845_v49 = vpop.f32.mrf.mxu0  ;;  %3532 = vmatpush3.bf16.msra.mxu1 %v3888_v55 }
 0x60f   :  { %v846_v50 = vadd.f32 %v2994_v44, %v845_v49  ;;  %v853_v10 = vsel %vm257_vm4, %v849_v48, 0.0  ;;  %v861_v11 = vmul.f32 %v849_v48, %v849_v48  ;;  %3533 = vmatprep.subr.bf16.mxu1 %v4213_v0  ;;  %v3000_v49 = vld [vmem:[%s5410_s15] ss:$0 sm:$0xff] }
 0x610   :  { %854 = vadd.xlane.f32.xlu0 %v853_v10  ;;  %v3530_v15 = vpop.f32.mrf.mxu0 }
 0x611   :  { %v850_v51 = vadd.f32 %v846_v50, %v4427_v56  ;;  %v863_v53 = vsel %vm257_vm4, %v861_v11, 0.0  ;;  %v3891_v56 = vld [vmem:[#allocation13] sm:$0xff]  }
 0x612   :  { %3534 = vmatpush3.bf16.msra.mxu1 %v3889_v61  ;;  %v3899_v61 = vld [vmem:[%s5414_s19] sm:$0xff]  }
 0x613   :  { %v856_v54 = vsel %vm257_vm4, %v850_v51, 0.0  ;;  %v862_v58 = vmul.f32 %v850_v51, %v850_v51  ;;  %3535 = vmatprep.subr.bf16.mxu1 %v4213_v0 }
 0x614   :  { %864 = vadd.xlane.f32.xlu0 %v863_v53  ;;  %857 = vadd.xlane.f32.xlu1 %v856_v54  ;;  %v3001_v53 = vld [vmem:[%s5411_s16] ss:$0 sm:$0xff] }
 0x615   :  { %v866_v59 = vsel %vm257_vm4, %v862_v58, 0.0 }
 0x616   :  { %3536 = vmatpush3.bf16.msra.mxu1 %v3890_v14  ;;  %v3002_v14 = vld [vmem:[%s5413_s18] ss:$0 sm:$0xff] }
 0x617   :  { %3537 = vmatprep.subr.bf16.mxu1 %v4213_v0 }
 0x618   :  { %867 = vadd.xlane.f32.xlu1 %v866_v59 }
 0x61a   :  { %3538 = vmatpush3.bf16.msra.mxu1 %v3891_v56 }
 0x61b   :  { %3563 = vmatprep.subr.bf16.mxu1 %v4213_v0 }
 0x699   :  { %v855_v25 = vpop.xlane.xlu0 %854 }
 0x69a   :  { %v859_v28 = vmul.f32 0.015625, %v855_v25 }
 0x69c   :  { %v871_v35 = vmul.f32 %v859_v28, %v859_v28  ;;  %v875_v45 = vsub.f32 %v849_v48, %v859_v28  ;;  %v3897_v48 = vld [vmem:[%s5414_s19 + $0x10] sm:$0xff]  }
 0x69d   :  { %v865_v31 = vpop.xlane.xlu0 %864  ;;  %v858_v33 = vpop.xlane.xlu1 %857  ;;  %3554 = vmatpush3.bf16.msra.mxu0 %v3897_v48 }
 0x69e   :  { %v869_v36 = vmul.f32 0.015625, %v865_v31  ;;  %v860_v37 = vmul.f32 0.015625, %v858_v33  ;;  %3555 = vmatprep.subr.bf16.mxu0 %v4213_v0  ;;  %v3008_v33 = vld [vmem:[%s5415_s20] ss:$0 sm:$0xff] }
 0x6a0   :  { %v873_v34 = vsub.f32 %v869_v36, %v871_v35  ;;  %v872_v30 = vmul.f32 %v860_v37, %v860_v37  ;;  %v876_v50 = vsub.f32 %v850_v51, %v860_v37  ;;  %v3898_v51 = vld [vmem:[%s5414_s19 + $0x8] sm:$0xff]  }
 0x6a1   :  { %v868_v38 = vpop.xlane.xlu1 %867  ;;  %3556 = vmatpush3.bf16.msra.mxu0 %v3898_v51 }
 0x6a2   :  { %v877_v39 = vadd.f32 1e-05, %v873_v34  ;;  %v870_v41 = vmul.f32 0.015625, %v868_v38  ;;  %3557 = vmatprep.subr.bf16.mxu0 %v4213_v0 }
 0x6a4   :  { %3972 = vrsqrt.f32 %v877_v39  ;;  %v874_v42 = vsub.f32 %v870_v41, %v872_v30 }
 0x6a5   :  { %3558 = vmatpush3.bf16.msra.mxu0 %v3899_v61 }
 0x6a6   :  { %v878_v44 = vadd.f32 1e-05, %v874_v42  ;;  %3587 = vmatprep.subr.bf16.mxu0 %v4213_v0 }
 0x6a8   :  { %3974 = vrsqrt.f32 %v878_v44 }
 0x6b1   :  { %v3973_v46 = vpop.eup %3972 }
 0x6b2   :  { %v881_v5 = vmul.f32 %v3973_v46, %v875_v45 }
 0x6b4   :  { %v889_v15 = vmul.f32 %v3000_v49, %v881_v5 }
 0x6b5   :  { %v3975_v10 = vpop.eup %3974 }
 0x6b6   :  { %v882_v11 = vmul.f32 %v3975_v10, %v876_v50  ;;  %v897_v58 = vadd.f32 %v3001_v53, %v889_v15  ;;  %v3900_v50 = vld [vmem:[%s5443_s25 + $0x38] sm:$0xff]   ;;  %v3903_v15 = vld [vmem:[%s5406_s11 + $0x30] sm:$0xff]  }
 0x6b7   :  { %v3901_v10 = vld [vmem:[%s5406_s11 + $0x38] sm:$0xff]  }
 0x6b8   :  { %v890_v54 = vmul.f32 %v3000_v49, %v882_v11  ;;  %v3902_v11 = vld [vmem:[%s5443_s25 + $0x30] sm:$0xff]  }
 0x6ba   :  { %v898_v59 = vadd.f32 %v3001_v53, %v890_v54  ;;  %v3904_v53 = vld [vmem:[%s5443_s25 + $0x28] sm:$0xff]  }
 0x6bb   :  { %v3905_v54 = vld [vmem:[%s5406_s11 + $0x28] sm:$0xff]  }
 0x6bc   :  { %v899_v55 = vpack.c.bf16 %v898_v59, %v897_v58 }
 0x6be   :  { %3540 = vmatmul.mubr.msk.bf16.vlgmr.msra.gmra.mxu1 %vm257_vm4, %v899_v55 }
 0x6bf   :  { %3571 = vmatprep.mubr.msk.bf16.mxu1 %vm4215_vm2, %v4213_v0  ;;  %3564 = vmatpush3.bf16.msra.mxu1 %v3900_v50  ;;  %v3910_v50 = vld [vmem:[%s5444_s6 + $0x28] sm:$0xff]  }
 0x6c0   :  { %3565 = vmatprep.subr.bf16.mxu1 %v4213_v0 }
 0x6c3   :  { %3566 = vmatpush3.bf16.msra.mxu1 %v3902_v11 }
 0x6c4   :  { %3567 = vmatprep.subr.bf16.mxu1 %v4213_v0 }
 0x6c7   :  { %3568 = vmatpush3.bf16.msra.mxu1 %v3904_v53 }
 0x6c8   :  { %3569 = vmatprep.subr.bf16.mxu1 %v4213_v0 }
 0x77e   :  { %v976_v56 = vpop.f32.mrf.mxu1 }
 0x77f   :  { %v977_v19 = vadd.f32 %v3002_v14, %v976_v56 }
 0x780   :  { %v3541_v16 = vpop.f32.mrf.mxu1 }
 0x781   :  { %v983_v25 = vmax.f32 %v977_v19, 0.0 }
 0x782   :  { %v979_v21 = vpop.f32.mrf.mxu1 }
 0x783   :  { %v980_v22 = vadd.f32 %v3002_v14, %v979_v21 }
 0x784   :  { %v3542_v24 = vpop.f32.mrf.mxu1 }
 0x785   :  { %v984_v28 = vmax.f32 %v980_v22, 0.0 }
 0x787   :  { %v985_v31 = vpack.c.bf16 %v984_v28, %v983_v25 }
 0x789   :  { %3560 = vmatmul.mubr.bf16.vlgmr.msra.gmra.mxu0 %v985_v31 }
 0x78a   :  { %3595 = vmatprep.mubr.msk.bf16.mxu0 %vm4215_vm2, %v4213_v0  ;;  %3588 = vmatpush3.bf16.msra.mxu0 %v3901_v10  ;;  %v3911_v10 = vld [vmem:[%s5444_s6 + $0x20] sm:$0xff]  }
 0x78b   :  { %3589 = vmatprep.subr.bf16.mxu0 %v4213_v0 }
 0x78e   :  { %3590 = vmatpush3.bf16.msra.mxu0 %v3903_v15  ;;  %v3057_v15 = vld [vmem:[%s5407_s12 + $0x1] ss:$0 sm:$0xff] }
 0x78f   :  { %3591 = vmatprep.subr.bf16.mxu0 %v4213_v0 }
 0x792   :  { %3592 = vmatpush3.bf16.msra.mxu0 %v3905_v54  ;;  %v3027_v54 = vld [vmem:[#allocation11 + $0x1] ss:$0 sm:$0xff] }
 0x793   :  { %3593 = vmatprep.subr.bf16.mxu0 %v4213_v0 }
 0x849   :  { %v1091_v35 = vpop.f32.mrf.mxu0 }
 0x84a   :  { %v1092_v36 = vadd.f32 %v3008_v33, %v1091_v35 }
 0x84b   :  { %v3561_v37 = vpop.f32.mrf.mxu0 }
 0x84c   :  { %v1098_v34 = vadd.f32 %v1092_v36, %v897_v58  ;;  %v3906_v58 = vld [vmem:[%s5443_s25 + $0x20] sm:$0xff]  }
 0x84d   :  { %v1094_v38 = vpop.f32.mrf.mxu0  ;;  %3570 = vmatpush3.bf16.msra.mxu1 %v3906_v58  ;;  %v3017_v37 = vld [vmem:[%s5416_s21] ss:$0 sm:$0xff] }
 0x84e   :  { %v1095_v39 = vadd.f32 %v3008_v33, %v1094_v38  ;;  %v1102_v30 = vsel %vm257_vm4, %v1098_v34, 0.0  ;;  %v1110_v41 = vmul.f32 %v1098_v34, %v1098_v34  ;;  %3575 = vmatprep.subr.bf16.mxu1 %v4213_v0 }
 0x84f   :  { %1103 = vadd.xlane.f32.xlu0 %v1102_v30  ;;  %v3562_v42 = vpop.f32.mrf.mxu0 }
 0x850   :  { %v1099_v44 = vadd.f32 %v1095_v39, %v898_v59  ;;  %v1112_v45 = vsel %vm257_vm4, %v1110_v41, 0.0  ;;  %v3907_v59 = vld [vmem:[%s5406_s11 + $0x20] sm:$0xff]  }
 0x851   :  { %3594 = vmatpush3.bf16.msra.mxu0 %v3907_v59  ;;  %v3018_v42 = vld [vmem:[%s5417_s22] ss:$0 sm:$0xff] }
 0x852   :  { %v1105_v46 = vsel %vm257_vm4, %v1099_v44, 0.0  ;;  %v1111_v5 = vmul.f32 %v1099_v44, %v1099_v44  ;;  %3619 = vmatprep.subr.bf16.mxu0 %v4213_v0 }
 0x853   :  { %1113 = vadd.xlane.f32.xlu0 %v1112_v45  ;;  %1106 = vadd.xlane.f32.xlu1 %v1105_v46 }
 0x854   :  { %v1115_v49 = vsel %vm257_vm4, %v1111_v5, 0.0 }
 0x857   :  { %1116 = vadd.xlane.f32.xlu1 %v1115_v49 }
 0x8d8   :  { %v1104_v55 = vpop.xlane.xlu0 %1103 }
 0x8d9   :  { %v1108_v48 = vmul.f32 0.015625, %v1104_v55 }
 0x8db   :  { %v1120_v14 = vmul.f32 %v1108_v48, %v1108_v48  ;;  %v1124_v33 = vsub.f32 %v1098_v34, %v1108_v48  ;;  %v3908_v34 = vld [vmem:[%s5444_s6 + $0x38] sm:$0xff]  }
 0x8dc   :  { %v1114_v51 = vpop.xlane.xlu0 %1113  ;;  %v1107_v61 = vpop.xlane.xlu1 %1106 }
 0x8dd   :  { %v1118_v56 = vmul.f32 0.015625, %v1114_v51  ;;  %v1109_v16 = vmul.f32 0.015625, %v1107_v61 }
 0x8df   :  { %v1122_v19 = vsub.f32 %v1118_v56, %v1120_v14  ;;  %v1121_v24 = vmul.f32 %v1109_v16, %v1109_v16  ;;  %v1125_v38 = vsub.f32 %v1099_v44, %v1109_v16  ;;  %v3909_v44 = vld [vmem:[%s5444_s6 + $0x30] sm:$0xff]  }
 0x8e0   :  { %v1117_v21 = vpop.xlane.xlu1 %1116 }
 0x8e1   :  { %v1126_v22 = vadd.f32 1e-05, %v1122_v19  ;;  %v1119_v25 = vmul.f32 0.015625, %v1117_v21 }
 0x8e3   :  { %3976 = vrsqrt.f32 %v1126_v22  ;;  %v1123_v28 = vsub.f32 %v1119_v25, %v1121_v24 }
 0x8e5   :  { %v1127_v31 = vadd.f32 1e-05, %v1123_v28 }
 0x8e7   :  { %3978 = vrsqrt.f32 %v1127_v31 }
 0x8f0   :  { %v3977_v35 = vpop.eup %3976 }
 0x8f1   :  { %v1130_v36 = vmul.f32 %v3977_v35, %v1124_v33 }
 0x8f3   :  { %v1138_v41 = vmul.f32 %v3017_v37, %v1130_v36 }
 0x8f4   :  { %v3979_v39 = vpop.eup %3978 }
 0x8f5   :  { %v1131_v30 = vmul.f32 %v3979_v39, %v1125_v38  ;;  %v4831_v46 = vadd.f32 %v3018_v42, %v1138_v41 }
 0x8f7   :  { %v1139_v45 = vmul.f32 %v3017_v37, %v1131_v30  ;;  %v3042_v37 = vld [vmem:[%s5405_s10 + $0x1] ss:$0 sm:$0xff] }
 0x8f9   :  { %v4833_v5 = vadd.f32 %v3018_v42, %v1139_v45 }
 0x8fb   :  { %v1148_v49 = vpack.c.bf16 %v4833_v5, %v4831_v46 }
 0x8fd   :  { %3572 = vmatmul.mubr.msk.bf16.vlgmr.msra.gmra.mxu1 %vm257_vm4, %v1148_v49  ;;  %3596 = vmatmul.mubr.msk.bf16.vlgmr.msra.gmra.mxu0 %vm257_vm4, %v1148_v49 }
 0x8fe   :  { %3576 = vmatpush3.bf16.msra.mxu1 %v3908_v34  ;;  %3583 = vmatprep.mubr.msk.bf16.mxu1 %vm4215_vm2, %v4213_v0 }
 0x8ff   :  { %3577 = vmatprep.subr.bf16.mxu1 %v4213_v0  ;;  %3635 = vmatprep.mubr.msk.bf16.mxu0 %vm4215_vm2, %v4213_v0 }
 0x902   :  { %3578 = vmatpush3.bf16.msra.mxu1 %v3909_v44 }
 0x903   :  { %3579 = vmatprep.subr.bf16.mxu1 %v4213_v0 }
 0x906   :  { %3580 = vmatpush3.bf16.msra.mxu1 %v3910_v50 }
 0x907   :  { %3581 = vmatprep.subr.bf16.mxu1 %v4213_v0 }
 0x90a   :  { %3582 = vmatpush3.bf16.msra.mxu1 %v3911_v10 }
 0x90b   :  { %3599 = vmatprep.subr.bf16.mxu1 %v4213_v0 }
 0x90d   :  { %3584 = vmatmul.mubr.msk.bf16.vlgmr.msra.gmra.mxu1 %vm257_vm4, %v1148_v49 }
 0x90e   :  { %3615 = vmatprep.mubr.msk.bf16.mxu1 %vm4215_vm2, %v4213_v0 }
 0x9bd   :  { %v1227_v11 = vpop.f32.mrf.mxu1  ;;  %v1391_v53 = vpop.f32.mrf.mxu0 }
 0x9be   :  { %v1392_v55 = vadd.f32 %v3057_v15, %v1391_v53  ;;  %v4865_v61 = vadd.f32 %v3027_v54, %v1227_v11 }
 0x9bf   :  { %v3573_v58 = vpop.f32.mrf.mxu1  ;;  %v3597_v59 = vpop.f32.mrf.mxu0 }
 0x9c0   :  { %v1436_v22 = vmul.f32 %v1392_v55, %v4464_v8  ;;  %v1434_v31 = vmul.f32 %v1392_v55, %v4491_v20  ;;  %v1432_v36 = vmul.f32 %v1392_v55, %v4510_v29  ;;  %v1430_v45 = vmul.f32 %v1392_v55, %v4536_v43 }
 0x9c1   :  { %v1230_v48 = vpop.f32.mrf.mxu1  ;;  %v1394_v51 = vpop.f32.mrf.mxu0  ;;  %v1428_v53 = vmul.f32 %v1392_v55, %v4562_v57 }
 0x9c2   :  { %v4867_v14 = vadd.f32 %v3027_v54, %v1230_v48  ;;  %v1395_v56 = vadd.f32 %v3057_v15, %v1394_v51  ;;  %v1426_v51 = vmul.f32 %v1392_v55, %v4588_v7 }
 0x9c3   :  { %v3574_v16 = vpop.f32.mrf.mxu1  ;;  %v3598_v19 = vpop.f32.mrf.mxu0 }
 0x9c4   :  { %v1446_v21 = vpack.c.bf16 %v4867_v14, %v4865_v61  ;;  %v1437_v24 = vmul.f32 %v1395_v56, %v4469_v9  ;;  %v1435_v28 = vmul.f32 %v1395_v56, %v4486_v18  ;;  %v1433_v35 = vmul.f32 %v1395_v56, %v4505_v27 }
 0x9c5   :  { %v1431_v30 = vmul.f32 %v1395_v56, %v4529_v40  ;;  %v1429_v50 = vmul.f32 %v1395_v56, %v4555_v52  ;;  %v1427_v59 = vmul.f32 %v1395_v56, %v4581_v3  ;;  %v1425_v19 = vmul.f32 %v1395_v56, %v4599_v17 }
 0x9c6   :  { %v1445_v25 = vpack.c.bf16 %v1437_v24, %v1436_v22  ;;  %v1444_v33 = vpack.c.bf16 %v1435_v28, %v1434_v31  ;;  %v1443_v39 = vpack.c.bf16 %v1433_v35, %v1432_v36  ;;  %v1424_v24 = vmul.f32 %v1392_v55, %v4609_v23 }
 0x9c7   :  { %v1442_v44 = vpack.c.bf16 %v1431_v30, %v1430_v45  ;;  %v1441_v58 = vpack.c.bf16 %v1429_v50, %v1428_v53  ;;  %v1422_v31 = vmul.f32 %v1392_v55, %v4624_v32 }
 0x9c8   :  { %3620 = vmatpush3.bf16.msra.mxu0 %v1445_v25  ;;  %v1439_v25 = vpack.c.bf16 %v1425_v19, %v1424_v24 }
 0x9c9   :  { %3621 = vmatprep.subr.bf16.mxu0 %v4213_v0 }
 0x9cc   :  { %3622 = vmatpush3.bf16.msra.mxu0 %v1444_v33 }
 0x9cd   :  { %v1309_v38 = vpop.f32.mrf.mxu1  ;;  %3623 = vmatprep.subr.bf16.mxu0 %v4213_v0 }
 0x9ce   :  { %v4883_v42 = vadd.f32 %v3042_v37, %v1309_v38 }
 0x9cf   :  { %v3585_v41 = vpop.f32.mrf.mxu1 }
 0x9d0   :  { %3624 = vmatpush3.bf16.msra.mxu0 %v1443_v39  ;;  %v1412_v11 = vmul.f32 %v4883_v42, %v4464_v8  ;;  %v1440_v8 = vpack.c.bf16 %v1427_v59, %v1426_v51  ;;  %v1408_v35 = vmul.f32 %v4883_v42, %v4510_v29  ;;  %v1404_v39 = vmul.f32 %v4883_v42, %v4562_v57  ;;  %v3914_v51 = vld [vmem:[%s5408_s13 + $0x28] sm:$0xff]  }
 0x9d1   :  { %v1312_v34 = vpop.f32.mrf.mxu1  ;;  %3625 = vmatprep.subr.bf16.mxu0 %v4213_v0  ;;  %v1400_v57 = vmul.f32 %v4883_v42, %v4609_v23 }
 0x9d2   :  { %v4887_v49 = vadd.f32 %v3042_v37, %v1312_v34 }
 0x9d3   :  { %v3586_v10 = vpop.f32.mrf.mxu1 }
 0x9d4   :  { %3626 = vmatpush3.bf16.msra.mxu0 %v1442_v44  ;;  %v1413_v15 = vmul.f32 %v4887_v49, %v4469_v9  ;;  %v1411_v16 = vmul.f32 %v4887_v49, %v4486_v18  ;;  %v1410_v9 = vmul.f32 %v4883_v42, %v4491_v20  ;;  %v1423_v18 = vmul.f32 %v1395_v56, %v4617_v26 }
 0x9d5   :  { %3627 = vmatprep.subr.bf16.mxu0 %v4213_v0  ;;  %v1409_v33 = vmul.f32 %v4887_v49, %v4505_v27  ;;  %v1407_v55 = vmul.f32 %v4887_v49, %v4529_v40  ;;  %v1406_v27 = vmul.f32 %v4883_v42, %v4536_v43  ;;  %v1405_v29 = vmul.f32 %v4887_v49, %v4555_v52 }
 0x9d6   :  { %v1421_v54 = vpack.c.bf16 %v1413_v15, %v1412_v11  ;;  %v1420_v22 = vpack.c.bf16 %v1411_v16, %v1410_v9  ;;  %v1438_v20 = vpack.c.bf16 %v1423_v18, %v1422_v31  ;;  %v1403_v41 = vmul.f32 %v4887_v49, %v4581_v3  ;;  %v3915_v16 = vld [vmem:[%s5408_s13 + $0x20] sm:$0xff]  }
 0x9d7   :  { %v1419_v36 = vpack.c.bf16 %v1409_v33, %v1408_v35  ;;  %v1418_v37 = vpack.c.bf16 %v1407_v55, %v1406_v27  ;;  %v1417_v30 = vpack.c.bf16 %v1405_v29, %v1404_v39  ;;  %v1402_v43 = vmul.f32 %v4883_v42, %v4588_v7  ;;  %v3073_v27 = vld [vmem:[%s5409_s14 + $0x1] ss:$0 sm:$0xff] }
 0x9d8   :  { %v1472_v48 = vsel %vm257_vm4, %v1421_v54, 0  ;;  %3628 = vmatpush3.bf16.msra.mxu0 %v1441_v58  ;;  %v1469_v28 = vsel %vm257_vm4, %v1420_v22, 0  ;;  %v1401_v34 = vmul.f32 %v4887_v49, %v4599_v17  ;;  %v1399_v50 = vmul.f32 %v4887_v49, %v4617_v26 }
 0x9d9   :  { %3600 = vmatpush3.bf16.xpose.msra.mxu1 %v1472_v48  ;;  %3629 = vmatprep.subr.bf16.mxu0 %v4213_v0  ;;  %v1466_v56 = vsel %vm257_vm4, %v1419_v36, 0  ;;  %v1463_v38 = vsel %vm257_vm4, %v1418_v37, 0  ;;  %v1460_v40 = vsel %vm257_vm4, %v1417_v30, 0  ;;  %v1416_v45 = vpack.c.bf16 %v1403_v41, %v1402_v43 }
 0x9da   :  { %3601 = vmatprep.subr.bf16.mxu1 %v4213_v0  ;;  %v1415_v44 = vpack.c.bf16 %v1401_v34, %v1400_v57  ;;  %v1398_v7 = vmul.f32 %v4883_v42, %v4624_v32 }
 0x9db   :  { %v1457_v52 = vsel %vm257_vm4, %v1416_v45, 0 }
 0x9dc   :  { %3630 = vmatpush3.bf16.msra.mxu0 %v1440_v8  ;;  %v1454_v3 = vsel %vm257_vm4, %v1415_v44, 0  ;;  %v1414_v10 = vpack.c.bf16 %v1399_v50, %v1398_v7  ;;  %v3917_v50 = vld [vmem:[#allocation13 + $0x30] sm:$0xff]   ;;  %v3918_v7 = vld [vmem:[#allocation13 + $0x28] sm:$0xff]  }
 0x9dd   :  { %3631 = vmatprep.subr.bf16.mxu0 %v4213_v0 }
 0x9de   :  { %v1451_v17 = vsel %vm257_vm4, %v1414_v10, 0  ;;  %v3920_v10 = vld [vmem:[%s5414_s19 + $0x78] sm:$0xff]  }
 0x9e0   :  { %3632 = vmatpush3.bf16.msra.mxu0 %v1439_v25 }
 0x9e1   :  { %3602 = vmatpush3.bf16.xpose.msra.mxu1 %v1469_v28  ;;  %3633 = vmatprep.subr.bf16.mxu0 %v4213_v0 }
 0x9e2   :  { %3603 = vmatprep.subr.bf16.mxu1 %v4213_v0 }
 0x9e4   :  { %3634 = vmatpush3.bf16.msra.mxu0 %v1438_v20 }
 0x9e5   :  { %3639 = vmatprep.subr.bf16.mxu0 %v4213_v0 }
 0x9e9   :  { %3604 = vmatpush3.bf16.xpose.msra.mxu1 %v1466_v56 }
 0x9ea   :  { %3605 = vmatprep.subr.bf16.mxu1 %v4213_v0 }
 0x9f1   :  { %3606 = vmatpush3.bf16.xpose.msra.mxu1 %v1463_v38 }
 0x9f2   :  { %3607 = vmatprep.subr.bf16.mxu1 %v4213_v0 }
 0x9f9   :  { %3608 = vmatpush3.bf16.xpose.msra.mxu1 %v1460_v40 }
 0x9fa   :  { %3609 = vmatprep.subr.bf16.mxu1 %v4213_v0 }
 0xa01   :  { %3610 = vmatpush3.bf16.xpose.msra.mxu1 %v1457_v52 }
 0xa02   :  { %3611 = vmatprep.subr.bf16.mxu1 %v4213_v0 }
 0xa09   :  { %3612 = vmatpush3.bf16.xpose.msra.mxu1 %v1454_v3 }
 0xa0a   :  { %3613 = vmatprep.subr.bf16.mxu1 %v4213_v0 }
 0xa11   :  { %3614 = vmatpush3.bf16.xpose.msra.mxu1 %v1451_v17  ;;  %v3921_v17 = vld [vmem:[%s5414_s19 + $0x70] sm:$0xff]  }
 0xa12   :  { %3659 = vmatprep.subr.bf16.mxu1 %v4213_v0 }
 0xa18   :  { %3616 = vmatmul.mubr.msk.bf16.vlgmr.msra.gmra.mxu1 %vm257_vm4, %v1446_v21 }
 0xa19   :  { %3667 = vmatprep.mubr.msk.bf16.mxu1 %vm4215_vm2, %v4213_v0 }
 0xad8   :  { %v1508_v23 = vpop.f32.mrf.mxu1 }
 0xad9   :  { %v1509_v26 = vadd.f32 %v1508_v23, %v4650_v12  ;;  %v3912_v12 = vld [vmem:[%s5408_s13 + $0x38] sm:$0xff]   ;;  %v3922_v23 = vld [vmem:[%s5414_s19 + $0x68] sm:$0xff]  }
 0xada   :  { %v3617_v49 = vpop.f32.mrf.mxu1  ;;  %3660 = vmatpush3.bf16.msra.mxu1 %v3912_v12 }
 0xadb   :  { %1515 = vmax.xlane.f32.xlu0 %v1509_v26  ;;  %3661 = vmatprep.subr.bf16.mxu1 %v4213_v0  ;;  %v3924_v49 = vld [vmem:[%s5414_s19 + $0x58] sm:$0xff]  }
 0xadc   :  { %v1511_v32 = vpop.f32.mrf.mxu1 }
 0xadd   :  { %v1512_v42 = vadd.f32 %v1511_v32, %v4653_v47  ;;  %v3913_v47 = vld [vmem:[%s5408_s13 + $0x30] sm:$0xff]  }
 0xade   :  { %v3618_v11 = vpop.f32.mrf.mxu1  ;;  %3662 = vmatpush3.bf16.msra.mxu1 %v3913_v47 }
 0xadf   :  { %1517 = vmax.xlane.f32.xlu1 %v1512_v42  ;;  %3663 = vmatprep.subr.bf16.mxu1 %v4213_v0 }
 0xae2   :  { %3664 = vmatpush3.bf16.msra.mxu1 %v3914_v51 }
 0xae3   :  { %3665 = vmatprep.subr.bf16.mxu1 %v4213_v0 }
 0xae6   :  { %3666 = vmatpush3.bf16.msra.mxu1 %v3915_v16 }
 0xae7   :  { %3683 = vmatprep.subr.bf16.mxu1 %v4213_v0 }
 0xb64   :  { %v1516_v15 = vpop.xlane.xlu0 %1515 }
 0xb65   :  { %v1519_v53 = vsub.f32 %v1509_v26, %v1516_v15  ;;  %v3923_v26 = vld [vmem:[%s5414_s19 + $0x60] sm:$0xff]  }
 0xb67   :  { %v1521_v54 = vmul.f32 1.442695, %v1519_v53 }
 0xb68   :  { %v1518_v58 = vpop.xlane.xlu1 %1517 }
 0xb69   :  { %v1520_v61 = vsub.f32 %v1512_v42, %v1518_v58  ;;  %3980 = vpow2.f32 %v1521_v54 }
 0xb6b   :  { %v1523_v14 = vmul.f32 1.442695, %v1520_v61 }
 0xb6d   :  { %3982 = vpow2.f32 %v1523_v14 }
 0xb76   :  { %v3981_v21 = vpop.eup %3980 }
 0xb7a   :  { %v3983_v59 = vpop.eup %3982 }
 0xb7b   :  { %v1525_v48 = vpack.c.bf16 %v3983_v59, %v3981_v21 }
 0xb7d   :  { %3636 = vmatmul.mubr.bf16.vlgmr.msra.gmra.mxu0 %v1525_v48 }
 0xb7e   :  { %3640 = vmatpush3.bf16.msra.mxu0 %v4658_v60  ;;  %3655 = vmatprep.mubr.msk.bf16.mxu0 %vm4215_vm2, %v4213_v0 }
 0xb7f   :  { %3641 = vmatprep.subr.bf16.mxu0 %v4213_v0 }
 0xb82   :  { %3642 = vmatpush3.bf16.msra.mxu0 %v4663_v62 }
 0xb83   :  { %3643 = vmatprep.subr.bf16.mxu0 %v4213_v0 }
 0xb86   :  { %3644 = vmatpush3.bf16.msra.mxu0 %v4671_v63 }
 0xb87   :  { %3645 = vmatprep.subr.bf16.mxu0 %v4213_v0 }
 0xb8a   :  { %3646 = vmatpush3.bf16.msra.mxu0 %v4677_v1 }
 0xb8b   :  { %3647 = vmatprep.subr.bf16.mxu0 %v4213_v0 }
 0xb8e   :  { %3648 = vmatpush3.bf16.msra.mxu0 %v4683_v2 }
 0xb8f   :  { %3649 = vmatprep.subr.bf16.mxu0 %v4213_v0 }
 0xb92   :  { %3650 = vmatpush3.bf16.msra.mxu0 %v4689_v4 }
 0xb93   :  { %3651 = vmatprep.subr.bf16.mxu0 %v4213_v0 }
 0xb96   :  { %3652 = vmatpush3.bf16.msra.mxu0 %v4695_v6 }
 0xb97   :  { %3653 = vmatprep.subr.bf16.mxu0 %v4213_v0 }
 0xb9a   :  { %3654 = vmatpush3.bf16.msra.mxu0 %v4701_v13 }
 0xb9b   :  { %3671 = vmatprep.subr.bf16.mxu0 %v4213_v0 }
 0xb9d   :  { %3656 = vmatmul.mubr.bf16.vlgmr.msra.gmra.mxu0 %v1525_v48 }
 0xb9e   :  { %3679 = vmatprep.mubr.msk.bf16.mxu0 %vm4215_vm2, %v4213_v0 }
 0xc3d   :  { %v1560_v8 = vpop.f32.mrf.mxu0 }
 0xc3f   :  { %v3637_v9 = vpop.f32.mrf.mxu0 }
 0xc40   :  { %v3081_v9 = vld [vmem:[%s5410_s15 + $0x1] ss:$0 sm:$0xff] }
 0xc41   :  { %v1563_v19 = vpop.f32.mrf.mxu0 }
 0xc43   :  { %v3638_v22 = vpop.f32.mrf.mxu0 }
 0xc5d   :  { %v1601_v24 = vpop.f32.mrf.mxu0 }
 0xc5e   :  { %v1608_v25 = vmax.f32 %v1601_v24, 1e-20 }
 0xc5f   :  { %v3657_v18 = vpop.f32.mrf.mxu0 }
 0xc60   :  { %3984 = vrcp.f32 %v1608_v25  ;;  %v3082_v18 = vld [vmem:[%s5411_s16 + $0x1] ss:$0 sm:$0xff] }
 0xc61   :  { %v1604_v28 = vpop.f32.mrf.mxu0 }
 0xc62   :  { %v1609_v31 = vmax.f32 %v1604_v28, 1e-20 }
 0xc63   :  { %v3658_v33 = vpop.f32.mrf.mxu0 }
 0xc64   :  { %3986 = vrcp.f32 %v1609_v31 }
 0xc6d   :  { %v3985_v20 = vpop.eup %3984 }
 0xc6e   :  { %v1612_v36 = vmul.f32 %v3985_v20, %v1560_v8 }
 0xc71   :  { %v3987_v35 = vpop.eup %3986 }
 0xc72   :  { %v1613_v56 = vmul.f32 %v3987_v35, %v1563_v19  ;;  %v3925_v35 = vld [vmem:[%s5414_s19 + $0x50] sm:$0xff]  }
 0xc74   :  { %v1614_v55 = vpack.c.bf16 %v1613_v56, %v1612_v36  ;;  %v3926_v36 = vld [vmem:[%s5414_s19 + $0x48] sm:$0xff]   ;;  %v3927_v56 = vld [vmem:[%s5414_s19 + $0x40] sm:$0xff]  }
 0xc76   :  { %3668 = vmatmul.mubr.msk.bf16.vlgmr.msra.gmra.mxu1 %vm257_vm4, %v1614_v55  ;;  %v3084_v55 = vld [vmem:[%s5413_s18 + $0x1] ss:$0 sm:$0xff] }
 0xc77   :  { %3699 = vmatprep.mubr.msk.bf16.mxu1 %vm4215_vm2, %v4213_v0  ;;  %3684 = vmatpush3.bf16.msra.mxu1 %v3920_v10 }
 0xc78   :  { %3685 = vmatprep.subr.bf16.mxu1 %v4213_v0 }
 0xc7b   :  { %3686 = vmatpush3.bf16.msra.mxu1 %v3921_v17 }
 0xc7c   :  { %3687 = vmatprep.subr.bf16.mxu1 %v4213_v0 }
 0xc7f   :  { %3688 = vmatpush3.bf16.msra.mxu1 %v3922_v23 }
 0xc80   :  { %3689 = vmatprep.subr.bf16.mxu1 %v4213_v0 }
 0xc83   :  { %3690 = vmatpush3.bf16.msra.mxu1 %v3923_v26 }
 0xc84   :  { %3691 = vmatprep.subr.bf16.mxu1 %v4213_v0 }
 0xc87   :  { %3692 = vmatpush3.bf16.msra.mxu1 %v3924_v49 }
 0xc88   :  { %3693 = vmatprep.subr.bf16.mxu1 %v4213_v0 }
 0xc8b   :  { %3694 = vmatpush3.bf16.msra.mxu1 %v3925_v35 }
 0xc8c   :  { %3695 = vmatprep.subr.bf16.mxu1 %v4213_v0 }
 0xc8f   :  { %3696 = vmatpush3.bf16.msra.mxu1 %v3926_v36 }
 0xc90   :  { %3697 = vmatprep.subr.bf16.mxu1 %v4213_v0 }
 0xc93   :  { %3698 = vmatpush3.bf16.msra.mxu1 %v3927_v56 }
 0xc94   :  { %3727 = vmatprep.subr.bf16.mxu1 %v4213_v0 }
 0xd36   :  { %v1693_v37 = vpop.f32.mrf.mxu1 }
 0xd37   :  { %v1694_v38 = vadd.f32 %v3073_v27, %v1693_v37 }
 0xd38   :  { %v3669_v29 = vpop.f32.mrf.mxu1 }
 0xd39   :  { %v1700_v39 = vadd.f32 %v1694_v38, %v4831_v46  ;;  %v3916_v46 = vld [vmem:[#allocation13 + $0x38] sm:$0xff]  }
 0xd3a   :  { %v1696_v30 = vpop.f32.mrf.mxu1  ;;  %3672 = vmatpush3.bf16.msra.mxu0 %v3916_v46 }
 0xd3b   :  { %v1697_v40 = vadd.f32 %v3073_v27, %v1696_v30  ;;  %v1706_v41 = vsel %vm257_vm4, %v1700_v39, 0.0  ;;  %v1714_v43 = vmul.f32 %v1700_v39, %v1700_v39  ;;  %3673 = vmatprep.subr.bf16.mxu0 %v4213_v0 }
 0xd3c   :  { %1707 = vadd.xlane.f32.xlu0 %v1706_v41  ;;  %v3670_v45 = vpop.f32.mrf.mxu1 }
 0xd3d   :  { %v1701_v52 = vadd.f32 %v1697_v40, %v4833_v5  ;;  %v1716_v34 = vsel %vm257_vm4, %v1714_v43, 0.0  ;;  %v3919_v5 = vld [vmem:[#allocation13 + $0x20] sm:$0xff]   ;;  %v3107_v45 = vld [vmem:[%s5415_s20 + $0x1] ss:$0 sm:$0xff] }
 0xd3e   :  { %3674 = vmatpush3.bf16.msra.mxu0 %v3917_v50 }
 0xd3f   :  { %v1709_v57 = vsel %vm257_vm4, %v1701_v52, 0.0  ;;  %v1715_v44 = vmul.f32 %v1701_v52, %v1701_v52  ;;  %3675 = vmatprep.subr.bf16.mxu0 %v4213_v0 }
 0xd40   :  { %1717 = vadd.xlane.f32.xlu0 %v1716_v34  ;;  %1710 = vadd.xlane.f32.xlu1 %v1709_v57 }
 0xd41   :  { %v1719_v3 = vsel %vm257_vm4, %v1715_v44, 0.0 }
 0xd42   :  { %3676 = vmatpush3.bf16.msra.mxu0 %v3918_v7 }
 0xd43   :  { %3677 = vmatprep.subr.bf16.mxu0 %v4213_v0 }
 0xd44   :  { %1720 = vadd.xlane.f32.xlu1 %v1719_v3 }
 0xd46   :  { %3678 = vmatpush3.bf16.msra.mxu0 %v3919_v5 }
 0xd47   :  { %3703 = vmatprep.subr.bf16.mxu0 %v4213_v0 }
 0xdc5   :  { %v1708_v32 = vpop.xlane.xlu0 %1707 }
 0xdc6   :  { %v1712_v42 = vmul.f32 0.015625, %v1708_v32  ;;  %v3928_v32 = vld [vmem:[%s5443_s25 + $0x58] sm:$0xff]  }
 0xdc8   :  { %v1724_v53 = vmul.f32 %v1712_v42, %v1712_v42  ;;  %v1728_v51 = vsub.f32 %v1700_v39, %v1712_v42  ;;  %v3929_v42 = vld [vmem:[%s5406_s11 + $0x58] sm:$0xff]  }
 0xdc9   :  { %v1718_v11 = vpop.xlane.xlu0 %1717  ;;  %v1711_v15 = vpop.xlane.xlu1 %1710 }
 0xdca   :  { %v1722_v54 = vmul.f32 0.015625, %v1718_v11  ;;  %v1713_v58 = vmul.f32 0.015625, %v1711_v15  ;;  %v3930_v11 = vld [vmem:[%s5443_s25 + $0x50] sm:$0xff]  }
 0xdcb   :  { %v3931_v15 = vld [vmem:[%s5406_s11 + $0x50] sm:$0xff]  }
 0xdcc   :  { %v1726_v61 = vsub.f32 %v1722_v54, %v1724_v53  ;;  %v1725_v59 = vmul.f32 %v1713_v58, %v1713_v58  ;;  %v1729_v19 = vsub.f32 %v1701_v52, %v1713_v58  ;;  %v3932_v53 = vld [vmem:[%s5443_s25 + $0x48] sm:$0xff]   ;;  %v3934_v58 = vld [vmem:[%s5443_s25 + $0x40] sm:$0xff]  }
 0xdcd   :  { %v1721_v14 = vpop.xlane.xlu1 %1720  ;;  %v3933_v54 = vld [vmem:[%s5406_s11 + $0x48] sm:$0xff]  }
 0xdce   :  { %v1730_v21 = vadd.f32 1e-05, %v1726_v61  ;;  %v1723_v48 = vmul.f32 0.015625, %v1721_v14  ;;  %v3935_v61 = vld [vmem:[%s5406_s11 + $0x40] sm:$0xff]  }
 0xdd0   :  { %3988 = vrsqrt.f32 %v1730_v21  ;;  %v1727_v12 = vsub.f32 %v1723_v48, %v1725_v59 }
 0xdd2   :  { %v1731_v47 = vadd.f32 1e-05, %v1727_v12 }
 0xdd4   :  { %3990 = vrsqrt.f32 %v1731_v47 }
 0xddd   :  { %v3989_v16 = vpop.eup %3988 }
 0xdde   :  { %v1734_v8 = vmul.f32 %v3989_v16, %v1728_v51 }
 0xde0   :  { %v1742_v25 = vmul.f32 %v3081_v9, %v1734_v8 }
 0xde1   :  { %v3991_v22 = vpop.eup %3990 }
 0xde2   :  { %v1735_v24 = vmul.f32 %v3991_v22, %v1729_v19  ;;  %v1750_v31 = vadd.f32 %v3082_v18, %v1742_v25 }
 0xde4   :  { %v1743_v28 = vmul.f32 %v3081_v9, %v1735_v24 }
 0xde6   :  { %v1751_v33 = vadd.f32 %v3082_v18, %v1743_v28 }
 0xde8   :  { %v1752_v20 = vpack.c.bf16 %v1751_v33, %v1750_v31 }
 0xdea   :  { %3680 = vmatmul.mubr.msk.bf16.vlgmr.msra.gmra.mxu0 %vm257_vm4, %v1752_v20 }
 0xdeb   :  { %3711 = vmatprep.mubr.msk.bf16.mxu0 %vm4215_vm2, %v4213_v0  ;;  %3704 = vmatpush3.bf16.msra.mxu0 %v3928_v32 }
 0xdec   :  { %3705 = vmatprep.subr.bf16.mxu0 %v4213_v0 }
 0xdef   :  { %3706 = vmatpush3.bf16.msra.mxu0 %v3930_v11 }
 0xdf0   :  { %3707 = vmatprep.subr.bf16.mxu0 %v4213_v0 }
 0xdf3   :  { %3708 = vmatpush3.bf16.msra.mxu0 %v3932_v53  ;;  %v4014_v53 = vld [vmem:[%s5445_s29 + $0x68] sm:$0xff] }
 0xdf4   :  { %3709 = vmatprep.subr.bf16.mxu0 %v4213_v0 }
 0xdf7   :  { %3710 = vmatpush3.bf16.msra.mxu0 %v3934_v58  ;;  %v4015_v58 = vld [vmem:[%s5445_s29 + $0x60] sm:$0xff] }
 0xdf8   :  { %3715 = vmatprep.subr.bf16.mxu0 %v4213_v0 }
 0xeaa   :  { %v1831_v27 = vpop.f32.mrf.mxu0 }
 0xeab   :  { %v1832_v38 = vadd.f32 %v3084_v55, %v1831_v27 }
 0xeac   :  { %v3681_v37 = vpop.f32.mrf.mxu0 }
 0xead   :  { %v1838_v40 = vmax.f32 %v1832_v38, 0.0 }
 0xeae   :  { %v1834_v29 = vpop.f32.mrf.mxu0 }
 0xeaf   :  { %v1835_v39 = vadd.f32 %v3084_v55, %v1834_v29  ;;  %v3119_v55 = vld [vmem:[%s5417_s22 + $0x1] ss:$0 sm:$0xff]  ;;  %v3936_v29 = vld [vmem:[%s5444_s6 + $0x58] sm:$0xff]  }
 0xeb0   :  { %v3682_v30 = vpop.f32.mrf.mxu0 }
 0xeb1   :  { %v1839_v41 = vmax.f32 %v1835_v39, 0.0  ;;  %v3937_v30 = vld [vmem:[%s5444_s6 + $0x50] sm:$0xff]  }
 0xeb3   :  { %v1840_v43 = vpack.c.bf16 %v1839_v41, %v1838_v40  ;;  %v3938_v40 = vld [vmem:[%s5444_s6 + $0x48] sm:$0xff]   ;;  %v3939_v41 = vld [vmem:[%s5444_s6 + $0x40] sm:$0xff]  }
 0xeb5   :  { %3700 = vmatmul.mubr.bf16.vlgmr.msra.gmra.mxu1 %v1840_v43 }
 0xeb6   :  { %3735 = vmatprep.mubr.msk.bf16.mxu1 %vm4215_vm2, %v4213_v0  ;;  %3728 = vmatpush3.bf16.msra.mxu1 %v3929_v42  ;;  %v4013_v42 = vld [vmem:[%s5445_s29 + $0x78] sm:$0xff] }
 0xeb7   :  { %3729 = vmatprep.subr.bf16.mxu1 %v4213_v0 }
 0xeba   :  { %3730 = vmatpush3.bf16.msra.mxu1 %v3931_v15 }
 0xebb   :  { %3731 = vmatprep.subr.bf16.mxu1 %v4213_v0 }
 0xebe   :  { %3732 = vmatpush3.bf16.msra.mxu1 %v3933_v54 }
 0xebf   :  { %3733 = vmatprep.subr.bf16.mxu1 %v4213_v0 }
 0xec2   :  { %3734 = vmatpush3.bf16.msra.mxu1 %v3935_v61 }
 0xec3   :  { %3759 = vmatprep.subr.bf16.mxu1 %v4213_v0 }
 0xf75   :  { %v1948_v52 = vpop.f32.mrf.mxu1 }
 0xf76   :  { %v1949_v34 = vadd.f32 %v3107_v45, %v1948_v52 }
 0xf77   :  { %v3701_v57 = vpop.f32.mrf.mxu1 }
 0xf78   :  { %v1955_v44 = vadd.f32 %v1949_v34, %v1750_v31  ;;  %v3128_v34 = vld [vmem:[#allocation11 + $0x2] ss:$0 sm:$0xff] }
 0xf79   :  { %v1951_v3 = vpop.f32.mrf.mxu1 }
 0xf7a   :  { %v1952_v46 = vadd.f32 %v3107_v45, %v1951_v3  ;;  %v1961_v50 = vsel %vm257_vm4, %v1955_v44, 0.0  ;;  %v1969_v7 = vmul.f32 %v1955_v44, %v1955_v44  ;;  %v3158_v45 = vld [vmem:[%s5407_s12 + $0x2] ss:$0 sm:$0xff] }
 0xf7b   :  { %1962 = vadd.xlane.f32.xlu0 %v1961_v50  ;;  %v3702_v5 = vpop.f32.mrf.mxu1 }
 0xf7c   :  { %v1956_v10 = vadd.f32 %v1952_v46, %v1751_v33  ;;  %v1971_v17 = vsel %vm257_vm4, %v1969_v7, 0.0  ;;  %v3118_v33 = vld [vmem:[%s5416_s21 + $0x1] ss:$0 sm:$0xff] }
 0xf7e   :  { %v1964_v23 = vsel %vm257_vm4, %v1956_v10, 0.0  ;;  %v1970_v26 = vmul.f32 %v1956_v10, %v1956_v10 }
 0xf7f   :  { %1972 = vadd.xlane.f32.xlu0 %v1971_v17  ;;  %1965 = vadd.xlane.f32.xlu1 %v1964_v23 }
 0xf80   :  { %v1974_v49 = vsel %vm257_vm4, %v1970_v26, 0.0 }
 0xf83   :  { %1975 = vadd.xlane.f32.xlu1 %v1974_v49  ;;  %v4012_v49 = vld [vmem:[%s5445_s29 + $0x70] sm:$0xff] }
0x1004   :  { %v1963_v14 = vpop.xlane.xlu0 %1962 }
0x1005   :  { %v1967_v21 = vmul.f32 0.015625, %v1963_v14 }
0x1007   :  { %v1979_v12 = vmul.f32 %v1967_v21, %v1967_v21  ;;  %v1983_v18 = vsub.f32 %v1955_v44, %v1967_v21  ;;  %v4016_v21 = vld [vmem:[%s5445_s29 + $0x58] sm:$0xff] }
0x1008   :  { %v1973_v59 = vpop.xlane.xlu0 %1972  ;;  %v1966_v48 = vpop.xlane.xlu1 %1965 }
0x1009   :  { %v1977_v47 = vmul.f32 0.015625, %v1973_v59  ;;  %v1968_v51 = vmul.f32 0.015625, %v1966_v48  ;;  %v4017_v48 = vld [vmem:[%s5445_s29 + $0x50] sm:$0xff] }
0x100b   :  { %v1981_v16 = vsub.f32 %v1977_v47, %v1979_v12  ;;  %v1980_v19 = vmul.f32 %v1968_v51, %v1968_v51  ;;  %v1984_v20 = vsub.f32 %v1956_v10, %v1968_v51  ;;  %v3143_v47 = vld [vmem:[%s5405_s10 + $0x2] ss:$0 sm:$0xff] }
0x100c   :  { %v1976_v8 = vpop.xlane.xlu1 %1975 }
0x100d   :  { %v1985_v9 = vadd.f32 1e-05, %v1981_v16  ;;  %v1978_v22 = vmul.f32 0.015625, %v1976_v8  ;;  %v4018_v8 = vld [vmem:[%s5445_s29 + $0x48] sm:$0xff] }
0x100f   :  { %3992 = vrsqrt.f32 %v1985_v9  ;;  %v1982_v24 = vsub.f32 %v1978_v22, %v1980_v19 }
0x1011   :  { %v1986_v25 = vadd.f32 1e-05, %v1982_v24  ;;  %v4019_v24 = vld [vmem:[%s5445_s29 + $0x40] sm:$0xff] }
0x1013   :  { %3994 = vrsqrt.f32 %v1986_v25 }
0x101c   :  { %v3993_v28 = vpop.eup %3992 }
0x101d   :  { %v1989_v31 = vmul.f32 %v3993_v28, %v1983_v18 }
0x101f   :  { %v1997_v56 = vmul.f32 %v3118_v33, %v1989_v31 }
0x1020   :  { %v3995_v35 = vpop.eup %3994 }
0x1021   :  { %v1990_v36 = vmul.f32 %v3995_v35, %v1984_v20  ;;  %v5101_v37 = vadd.f32 %v3119_v55, %v1997_v56 }
0x1023   :  { %v1998_v27 = vmul.f32 %v3118_v33, %v1990_v36  ;;  %v4020_v33 = vld [vmem:[%s5445_s29 + $0x38] sm:$0xff] }
0x1025   :  { %v5103_v38 = vadd.f32 %v3119_v55, %v1998_v27  ;;  %v4021_v55 = vld [vmem:[%s5445_s29 + $0x30] sm:$0xff] }
0x1027   :  { %v2007_v39 = vpack.c.bf16 %v5103_v38, %v5101_v37 }
0x1029   :  { %3712 = vmatmul.mubr.msk.bf16.vlgmr.msra.gmra.mxu0 %vm257_vm4, %v2007_v39  ;;  %3736 = vmatmul.mubr.msk.bf16.vlgmr.msra.gmra.mxu1 %vm257_vm4, %v2007_v39 }
0x102a   :  { %3716 = vmatpush3.bf16.msra.mxu0 %v3936_v29  ;;  %3723 = vmatprep.mubr.msk.bf16.mxu0 %vm4215_vm2, %v4213_v0 }
0x102b   :  { %3717 = vmatprep.subr.bf16.mxu0 %v4213_v0  ;;  %3775 = vmatprep.mubr.msk.bf16.mxu1 %vm4215_vm2, %v4213_v0 }
0x102e   :  { %3718 = vmatpush3.bf16.msra.mxu0 %v3937_v30  ;;  %v4022_v30 = vld [vmem:[%s5445_s29 + $0x28] sm:$0xff] }
0x102f   :  { %3719 = vmatprep.subr.bf16.mxu0 %v4213_v0 }
0x1032   :  { %3720 = vmatpush3.bf16.msra.mxu0 %v3938_v40 }
0x1033   :  { %3721 = vmatprep.subr.bf16.mxu0 %v4213_v0 }
0x1036   :  { %3722 = vmatpush3.bf16.msra.mxu0 %v3939_v41 }
0x1037   :  { %3739 = vmatprep.subr.bf16.mxu0 %v4213_v0 }
0x1039   :  { %3724 = vmatmul.mubr.msk.bf16.vlgmr.msra.gmra.mxu0 %vm257_vm4, %v2007_v39 }
0x103a   :  { %3755 = vmatprep.mubr.msk.bf16.mxu0 %vm4215_vm2, %v4213_v0 }
0x10e9   :  { %v2086_v43 = vpop.f32.mrf.mxu0  ;;  %v2250_v52 = vpop.f32.mrf.mxu1 }
0x10ea   :  { %v5135_v3 = vadd.f32 %v3158_v45, %v2250_v52  ;;  %v5137_v7 = vadd.f32 %v3128_v34, %v2086_v43  ;;  %v4023_v43 = vld [vmem:[%s5445_s29 + $0x20] sm:$0xff] }
0x10eb   :  { %v3713_v57 = vpop.f32.mrf.mxu0  ;;  %v3737_v44 = vpop.f32.mrf.mxu1 }
0x10ec   :  { %v2295_v32 = vmul.f32 %v4012_v49, %v5135_v3  ;;  %v2293_v61 = vmul.f32 %v4015_v58, %v5135_v3  ;;  %v2291_v12 = vmul.f32 %v4017_v48, %v5135_v3  ;;  %v2289_v25 = vmul.f32 %v4019_v24, %v5135_v3  ;;  %v4024_v44 = vld [vmem:[%s5445_s29 + $0x18] sm:$0xff] }
0x10ed   :  { %v2089_v46 = vpop.f32.mrf.mxu0  ;;  %v2253_v50 = vpop.f32.mrf.mxu1  ;;  %v2287_v27 = vmul.f32 %v4021_v55, %v5135_v3 }
0x10ee   :  { %v5139_v5 = vadd.f32 %v3128_v34, %v2089_v46  ;;  %v5141_v10 = vadd.f32 %v3158_v45, %v2253_v50  ;;  %v2285_v45 = vmul.f32 %v4023_v43, %v5135_v3 }
0x10ef   :  { %v3714_v17 = vpop.f32.mrf.mxu0  ;;  %v3738_v23 = vpop.f32.mrf.mxu1 }
0x10f0   :  { %v2305_v26 = vpack.c.bf16 %v5139_v5, %v5137_v7  ;;  %v2296_v11 = vmul.f32 %v4013_v42, %v5141_v10  ;;  %v2294_v54 = vmul.f32 %v4014_v53, %v5141_v10  ;;  %v2292_v59 = vmul.f32 %v4016_v21, %v5141_v10  ;;  %v4025_v17 = vld [vmem:[%s5445_s29 + $0x10] sm:$0xff] }
0x10f1   :  { %v2290_v9 = vmul.f32 %v4018_v8, %v5141_v10  ;;  %v2288_v20 = vmul.f32 %v4020_v33, %v5141_v10  ;;  %v2286_v40 = vmul.f32 %v4022_v30, %v5141_v10  ;;  %v2284_v46 = vmul.f32 %v4024_v44, %v5141_v10 }
0x10f2   :  { %v2304_v15 = vpack.c.bf16 %v2296_v11, %v2295_v32  ;;  %v2303_v14 = vpack.c.bf16 %v2294_v54, %v2293_v61  ;;  %v2302_v16 = vpack.c.bf16 %v2292_v59, %v2291_v12  ;;  %v2283_v23 = vmul.f32 %v4025_v17, %v5135_v3  ;;  %v4026_v32 = vld [vmem:[%s5445_s29 + $0x8] sm:$0xff] }
0x10f3   :  { %v2301_v31 = vpack.c.bf16 %v2290_v9, %v2289_v25  ;;  %v2300_v39 = vpack.c.bf16 %v2288_v20, %v2287_v27  ;;  %v2299_v34 = vpack.c.bf16 %v2286_v40, %v2285_v45 }
0x10f4   :  { %3760 = vmatpush3.bf16.msra.mxu1 %v2304_v15  ;;  %v4027_v15 = vld [vmem:[%s5445_s29] sm:$0xff] }
0x10f5   :  { %3761 = vmatprep.subr.bf16.mxu1 %v4213_v0 }
0x10f8   :  { %3762 = vmatpush3.bf16.msra.mxu1 %v2303_v14 }
0x10f9   :  { %v2168_v51 = vpop.f32.mrf.mxu0  ;;  %3763 = vmatprep.subr.bf16.mxu1 %v4213_v0 }
0x10fa   :  { %v5178_v22 = vadd.f32 %v3143_v47, %v2168_v51 }
0x10fb   :  { %v3725_v19 = vpop.f32.mrf.mxu0 }
0x10fc   :  { %3764 = vmatpush3.bf16.msra.mxu1 %v2302_v16  ;;  %v2271_v36 = vmul.f32 %v4012_v49, %v5178_v22  ;;  %v2269_v57 = vmul.f32 %v4015_v58, %v5178_v22  ;;  %v2298_v49 = vpack.c.bf16 %v2284_v46, %v2283_v23  ;;  %v2267_v61 = vmul.f32 %v4017_v48, %v5178_v22 }
0x10fd   :  { %v2171_v18 = vpop.f32.mrf.mxu0  ;;  %3765 = vmatprep.subr.bf16.mxu1 %v4213_v0  ;;  %v2263_v48 = vmul.f32 %v4021_v55, %v5178_v22  ;;  %v2261_v9 = vmul.f32 %v4023_v43, %v5178_v22  ;;  %v4028_v55 = vld [vmem:[#allocation5] sm:$0xff] }
0x10fe   :  { %v5185_v28 = vadd.f32 %v3143_v47, %v2171_v18  ;;  %v2259_v18 = vmul.f32 %v4025_v17, %v5178_v22 }
0x10ff   :  { %v3726_v35 = vpop.f32.mrf.mxu0 }
0x1100   :  { %3766 = vmatpush3.bf16.msra.mxu1 %v2301_v31  ;;  %v2272_v56 = vmul.f32 %v4013_v42, %v5185_v28  ;;  %v2270_v52 = vmul.f32 %v4014_v53, %v5185_v28  ;;  %v2282_v42 = vmul.f32 %v4026_v32, %v5141_v10  ;;  %v2281_v53 = vmul.f32 %v4027_v15, %v5135_v3 }
0x1101   :  { %3767 = vmatprep.subr.bf16.mxu1 %v4213_v0  ;;  %v2268_v54 = vmul.f32 %v4016_v21, %v5185_v28  ;;  %v2266_v59 = vmul.f32 %v4018_v8, %v5185_v28  ;;  %v2265_v3 = vmul.f32 %v4019_v24, %v5178_v22  ;;  %v2264_v47 = vmul.f32 %v4020_v33, %v5185_v28 }
0x1102   :  { %v2280_v29 = vpack.c.bf16 %v2272_v56, %v2271_v36  ;;  %v2279_v50 = vpack.c.bf16 %v2270_v52, %v2269_v57  ;;  %v2297_v58 = vpack.c.bf16 %v2282_v42, %v2281_v53  ;;  %v2262_v8 = vmul.f32 %v4022_v30, %v5185_v28 }
0x1103   :  { %v2278_v10 = vpack.c.bf16 %v2268_v54, %v2267_v61  ;;  %v2277_v21 = vpack.c.bf16 %v2266_v59, %v2265_v3  ;;  %v2276_v51 = vpack.c.bf16 %v2264_v47, %v2263_v48  ;;  %v2260_v25 = vmul.f32 %v4024_v44, %v5185_v28  ;;  %v3174_v54 = vld [vmem:[%s5409_s14 + $0x2] ss:$0 sm:$0xff] }
0x1104   :  { %v2331_v41 = vsel %vm257_vm4, %v2280_v29, 0  ;;  %3768 = vmatpush3.bf16.msra.mxu1 %v2300_v39  ;;  %v2328_v11 = vsel %vm257_vm4, %v2279_v50, 0  ;;  %v2275_v19 = vpack.c.bf16 %v2262_v8, %v2261_v9  ;;  %v2258_v20 = vmul.f32 %v4026_v32, %v5185_v28  ;;  %v4029_v39 = vld [vmem:[#allocation5 + $0x8] sm:$0xff] }
0x1105   :  { %3740 = vmatpush3.bf16.xpose.msra.mxu0 %v2331_v41  ;;  %3769 = vmatprep.subr.bf16.mxu1 %v4213_v0  ;;  %v2325_v14 = vsel %vm257_vm4, %v2278_v10, 0  ;;  %v2322_v12 = vsel %vm257_vm4, %v2277_v21, 0  ;;  %v2319_v16 = vsel %vm257_vm4, %v2276_v51, 0  ;;  %v2274_v31 = vpack.c.bf16 %v2260_v25, %v2259_v18  ;;  %v3948_v25 = vld [vmem:[%s5414_s19 + $0xb8] sm:$0xff]   ;;  %v3949_v18 = vld [vmem:[%s5414_s19 + $0xb0] sm:$0xff]  }
0x1106   :  { %3741 = vmatprep.subr.bf16.mxu0 %v4213_v0  ;;  %v2316_v24 = vsel %vm257_vm4, %v2275_v19, 0  ;;  %v2257_v35 = vmul.f32 %v4027_v15, %v5178_v22  ;;  %v3945_v19 = vld [vmem:[#allocation13 + $0x50] sm:$0xff]  }
0x1107   :  { %v2313_v33 = vsel %vm257_vm4, %v2274_v31, 0  ;;  %v3950_v31 = vld [vmem:[%s5414_s19 + $0xa8] sm:$0xff]  }
0x1108   :  { %3770 = vmatpush3.bf16.msra.mxu1 %v2299_v34  ;;  %v2273_v36 = vpack.c.bf16 %v2258_v20, %v2257_v35  ;;  %v3952_v20 = vld [vmem:[%s5414_s19 + $0x98] sm:$0xff]  }
0x1109   :  { %3771 = vmatprep.subr.bf16.mxu1 %v4213_v0 }
0x110a   :  { %v2310_v56 = vsel %vm257_vm4, %v2273_v36, 0 }
0x110c   :  { %3772 = vmatpush3.bf16.msra.mxu1 %v2298_v49 }
0x110d   :  { %3742 = vmatpush3.bf16.xpose.msra.mxu0 %v2328_v11  ;;  %3773 = vmatprep.subr.bf16.mxu1 %v4213_v0 }
0x110e   :  { %3743 = vmatprep.subr.bf16.mxu0 %v4213_v0 }
0x1110   :  { %3774 = vmatpush3.bf16.msra.mxu1 %v2297_v58 }
0x1111   :  { %3779 = vmatprep.subr.bf16.mxu1 %v4213_v0 }
0x1115   :  { %3744 = vmatpush3.bf16.xpose.msra.mxu0 %v2325_v14 }
0x1116   :  { %3745 = vmatprep.subr.bf16.mxu0 %v4213_v0 }
0x111d   :  { %3746 = vmatpush3.bf16.xpose.msra.mxu0 %v2322_v12 }
0x111e   :  { %3747 = vmatprep.subr.bf16.mxu0 %v4213_v0 }
0x1125   :  { %3748 = vmatpush3.bf16.xpose.msra.mxu0 %v2319_v16 }
0x1126   :  { %3749 = vmatprep.subr.bf16.mxu0 %v4213_v0 }
0x112d   :  { %3750 = vmatpush3.bf16.xpose.msra.mxu0 %v2316_v24  ;;  %v3946_v24 = vld [vmem:[#allocation13 + $0x48] sm:$0xff]  }
0x112e   :  { %3751 = vmatprep.subr.bf16.mxu0 %v4213_v0 }
0x1135   :  { %3752 = vmatpush3.bf16.xpose.msra.mxu0 %v2313_v33  ;;  %v3951_v33 = vld [vmem:[%s5414_s19 + $0xa0] sm:$0xff]  }
0x1136   :  { %3753 = vmatprep.subr.bf16.mxu0 %v4213_v0 }
0x113d   :  { %3754 = vmatpush3.bf16.xpose.msra.mxu0 %v2310_v56 }
0x113e   :  { %3799 = vmatprep.subr.bf16.mxu0 %v4213_v0 }
0x1144   :  { %3756 = vmatmul.mubr.msk.bf16.vlgmr.msra.gmra.mxu0 %vm257_vm4, %v2305_v26 }
0x1145   :  { %3807 = vmatprep.mubr.msk.bf16.mxu0 %vm4215_vm2, %v4213_v0 }
0x1204   :  { %v2367_v28 = vpop.f32.mrf.mxu0 }
0x1205   :  { %v2368_v27 = vadd.f32 %v4028_v55, %v2367_v28 }
0x1206   :  { %v3757_v29 = vpop.f32.mrf.mxu0 }
0x1207   :  { %2374 = vmax.xlane.f32.xlu0 %v2368_v27 }
0x1208   :  { %v2370_v22 = vpop.f32.mrf.mxu0 }
0x1209   :  { %v2371_v30 = vadd.f32 %v4029_v39, %v2370_v22 }
0x120a   :  { %v3758_v40 = vpop.f32.mrf.mxu0 }
0x120b   :  { %2376 = vmax.xlane.f32.xlu1 %v2371_v30 }
0x1290   :  { %v2375_v41 = vpop.xlane.xlu0 %2374 }
0x1291   :  { %v2378_v43 = vsub.f32 %v2368_v27, %v2375_v41 }
0x1293   :  { %v2380_v45 = vmul.f32 1.442695, %v2378_v43 }
0x1294   :  { %v2377_v52 = vpop.xlane.xlu1 %2376 }
0x1295   :  { %v2379_v7 = vsub.f32 %v2371_v30, %v2377_v52  ;;  %3996 = vpow2.f32 %v2380_v45 }
0x1297   :  { %v2382_v5 = vmul.f32 1.442695, %v2379_v7 }
0x1299   :  { %3998 = vpow2.f32 %v2382_v5 }
0x12a2   :  { %v3997_v26 = vpop.eup %3996 }
0x12a6   :  { %v3999_v34 = vpop.eup %3998 }
0x12a7   :  { %v2384_v57 = vpack.c.bf16 %v3999_v34, %v3997_v26  ;;  %v3182_v26 = vld [vmem:[%s5410_s15 + $0x2] ss:$0 sm:$0xff] }
0x12a9   :  { %3776 = vmatmul.mubr.bf16.vlgmr.msra.gmra.mxu1 %v2384_v57 }
0x12aa   :  { %3780 = vmatpush3.bf16.msra.mxu1 %v4658_v60  ;;  %3795 = vmatprep.mubr.msk.bf16.mxu1 %vm4215_vm2, %v4213_v0  ;;  %v3940_v60 = vld [vmem:[%s5408_s13 + $0x58] sm:$0xff]  }
0x12ab   :  { %3781 = vmatprep.subr.bf16.mxu1 %v4213_v0  ;;  %3800 = vmatpush3.bf16.msra.mxu0 %v3940_v60 }
0x12ac   :  { %3801 = vmatprep.subr.bf16.mxu0 %v4213_v0 }
0x12ae   :  { %3782 = vmatpush3.bf16.msra.mxu1 %v4663_v62  ;;  %v3941_v62 = vld [vmem:[%s5408_s13 + $0x50] sm:$0xff]  }
0x12af   :  { %3783 = vmatprep.subr.bf16.mxu1 %v4213_v0  ;;  %3802 = vmatpush3.bf16.msra.mxu0 %v3941_v62 }
0x12b0   :  { %3803 = vmatprep.subr.bf16.mxu0 %v4213_v0 }
0x12b2   :  { %3784 = vmatpush3.bf16.msra.mxu1 %v4671_v63  ;;  %v3942_v63 = vld [vmem:[%s5408_s13 + $0x48] sm:$0xff]  }
0x12b3   :  { %3785 = vmatprep.subr.bf16.mxu1 %v4213_v0  ;;  %3804 = vmatpush3.bf16.msra.mxu0 %v3942_v63  ;;  %v3183_v63 = vld [vmem:[%s5411_s16 + $0x2] ss:$0 sm:$0xff] }
0x12b4   :  { %3805 = vmatprep.subr.bf16.mxu0 %v4213_v0 }
0x12b6   :  { %3786 = vmatpush3.bf16.msra.mxu1 %v4677_v1  ;;  %v3943_v1 = vld [vmem:[%s5408_s13 + $0x40] sm:$0xff]  }
0x12b7   :  { %3787 = vmatprep.subr.bf16.mxu1 %v4213_v0  ;;  %3806 = vmatpush3.bf16.msra.mxu0 %v3943_v1 }
0x12b8   :  { %3823 = vmatprep.subr.bf16.mxu0 %v4213_v0 }
0x12ba   :  { %3788 = vmatpush3.bf16.msra.mxu1 %v4683_v2 }
0x12bb   :  { %3789 = vmatprep.subr.bf16.mxu1 %v4213_v0 }
0x12be   :  { %3790 = vmatpush3.bf16.msra.mxu1 %v4689_v4 }
0x12bf   :  { %3791 = vmatprep.subr.bf16.mxu1 %v4213_v0 }
0x12c2   :  { %3792 = vmatpush3.bf16.msra.mxu1 %v4695_v6 }
0x12c3   :  { %3793 = vmatprep.subr.bf16.mxu1 %v4213_v0 }
0x12c6   :  { %3794 = vmatpush3.bf16.msra.mxu1 %v4701_v13 }
0x12c7   :  { %3811 = vmatprep.subr.bf16.mxu1 %v4213_v0 }
0x12c9   :  { %3796 = vmatmul.mubr.bf16.vlgmr.msra.gmra.mxu1 %v2384_v57 }
0x12ca   :  { %3819 = vmatprep.mubr.msk.bf16.mxu1 %vm4215_vm2, %v4213_v0 }
0x1369   :  { %v2419_v2 = vpop.f32.mrf.mxu1 }
0x136b   :  { %v3777_v4 = vpop.f32.mrf.mxu1 }
0x136d   :  { %v2422_v6 = vpop.f32.mrf.mxu1 }
0x136f   :  { %v3778_v13 = vpop.f32.mrf.mxu1 }
0x1370   :  { %v3953_v13 = vld [vmem:[%s5414_s19 + $0x90] sm:$0xff]  }
0x1389   :  { %v2460_v44 = vpop.f32.mrf.mxu1 }
0x138a   :  { %v2467_v46 = vmax.f32 %v2460_v44, 1e-20  ;;  %v3954_v44 = vld [vmem:[%s5414_s19 + $0x88] sm:$0xff]  }
0x138b   :  { %v3797_v50 = vpop.f32.mrf.mxu1 }
0x138c   :  { %4000 = vrcp.f32 %v2467_v46  ;;  %v3955_v46 = vld [vmem:[%s5414_s19 + $0x80] sm:$0xff]  }
0x138d   :  { %v2463_v17 = vpop.f32.mrf.mxu1  ;;  %v3185_v50 = vld [vmem:[%s5413_s18 + $0x2] ss:$0 sm:$0xff] }
0x138e   :  { %v2468_v23 = vmax.f32 %v2463_v17, 1e-20 }
0x138f   :  { %v3798_v49 = vpop.f32.mrf.mxu1 }
0x1390   :  { %4002 = vrcp.f32 %v2468_v23 }
0x1399   :  { %v4001_v32 = vpop.eup %4000 }
0x139a   :  { %v2471_v11 = vmul.f32 %v4001_v32, %v2419_v2 }
0x139d   :  { %v4003_v42 = vpop.eup %4002 }
0x139e   :  { %v2472_v15 = vmul.f32 %v4003_v42, %v2422_v6 }
0x13a0   :  { %v2473_v53 = vpack.c.bf16 %v2472_v15, %v2471_v11 }
0x13a2   :  { %3808 = vmatmul.mubr.msk.bf16.vlgmr.msra.gmra.mxu0 %vm257_vm4, %v2473_v53 }
0x13a3   :  { %3839 = vmatprep.mubr.msk.bf16.mxu0 %vm4215_vm2, %v4213_v0  ;;  %3824 = vmatpush3.bf16.msra.mxu0 %v3948_v25  ;;  %v3959_v25 = vld [vmem:[%s5418_s23] sm:$0xff]  }
0x13a4   :  { %3825 = vmatprep.subr.bf16.mxu0 %v4213_v0 }
0x13a7   :  { %3826 = vmatpush3.bf16.msra.mxu0 %v3949_v18 }
0x13a8   :  { %3827 = vmatprep.subr.bf16.mxu0 %v4213_v0 }
0x13ab   :  { %3828 = vmatpush3.bf16.msra.mxu0 %v3950_v31 }
0x13ac   :  { %3829 = vmatprep.subr.bf16.mxu0 %v4213_v0 }
0x13af   :  { %3830 = vmatpush3.bf16.msra.mxu0 %v3951_v33 }
0x13b0   :  { %3831 = vmatprep.subr.bf16.mxu0 %v4213_v0 }
0x13b3   :  { %3832 = vmatpush3.bf16.msra.mxu0 %v3952_v20 }
0x13b4   :  { %3833 = vmatprep.subr.bf16.mxu0 %v4213_v0 }
0x13b7   :  { %3834 = vmatpush3.bf16.msra.mxu0 %v3953_v13 }
0x13b8   :  { %3835 = vmatprep.subr.bf16.mxu0 %v4213_v0 }
0x13bb   :  { %3836 = vmatpush3.bf16.msra.mxu0 %v3954_v44 }
0x13bc   :  { %3837 = vmatprep.subr.bf16.mxu0 %v4213_v0 }
0x13bf   :  { %3838 = vmatpush3.bf16.msra.mxu0 %v3955_v46 }
0x1462   :  { %v2552_v58 = vpop.f32.mrf.mxu0 }
0x1463   :  { %v2553_v61 = vadd.f32 %v3174_v54, %v2552_v58  ;;  %v3208_v58 = vld [vmem:[%s5415_s20 + $0x2] ss:$0 sm:$0xff] }
0x1464   :  { %v3809_v10 = vpop.f32.mrf.mxu0 }
0x1465   :  { %v2559_v14 = vadd.f32 %v2553_v61, %v5101_v37  ;;  %v3944_v37 = vld [vmem:[#allocation13 + $0x58] sm:$0xff]  }
0x1466   :  { %v2555_v59 = vpop.f32.mrf.mxu0  ;;  %3812 = vmatpush3.bf16.msra.mxu1 %v3944_v37 }
0x1467   :  { %v2556_v3 = vadd.f32 %v3174_v54, %v2555_v59  ;;  %v2565_v21 = vsel %vm257_vm4, %v2559_v14, 0.0  ;;  %v2573_v12 = vmul.f32 %v2559_v14, %v2559_v14  ;;  %3813 = vmatprep.subr.bf16.mxu1 %v4213_v0 }
0x1468   :  { %2566 = vadd.xlane.f32.xlu0 %v2565_v21  ;;  %v3810_v47 = vpop.f32.mrf.mxu0 }
0x1469   :  { %v2560_v48 = vadd.f32 %v2556_v3, %v5103_v38  ;;  %v2575_v51 = vsel %vm257_vm4, %v2573_v12, 0.0  ;;  %v3947_v38 = vld [vmem:[#allocation13 + $0x40] sm:$0xff]  }
0x146a   :  { %3814 = vmatpush3.bf16.msra.mxu1 %v3945_v19  ;;  %v3956_v19 = vld [vmem:[%s5418_s23 + $0x18] sm:$0xff]  }
0x146b   :  { %v2568_v16 = vsel %vm257_vm4, %v2560_v48, 0.0  ;;  %v2574_v8 = vmul.f32 %v2560_v48, %v2560_v48  ;;  %3815 = vmatprep.subr.bf16.mxu1 %v4213_v0 }
0x146c   :  { %2576 = vadd.xlane.f32.xlu0 %v2575_v51  ;;  %2569 = vadd.xlane.f32.xlu1 %v2568_v16 }
0x146d   :  { %v2578_v9 = vsel %vm257_vm4, %v2574_v8, 0.0 }
0x146e   :  { %3816 = vmatpush3.bf16.msra.mxu1 %v3946_v24  ;;  %v3957_v24 = vld [vmem:[%s5418_s23 + $0x10] sm:$0xff]  }
0x146f   :  { %3817 = vmatprep.subr.bf16.mxu1 %v4213_v0 }
0x1470   :  { %2579 = vadd.xlane.f32.xlu1 %v2578_v9 }
0x1472   :  { %3818 = vmatpush3.bf16.msra.mxu1 %v3947_v38  ;;  %v3958_v38 = vld [vmem:[%s5418_s23 + $0x8] sm:$0xff]  }
0x1473   :  { %3843 = vmatprep.subr.bf16.mxu1 %v4213_v0 }
0x14f1   :  { %v2567_v35 = vpop.xlane.xlu0 %2566 }
0x14f2   :  { %v2571_v36 = vmul.f32 0.015625, %v2567_v35 }
0x14f4   :  { %v2583_v55 = vmul.f32 %v2571_v36, %v2571_v36  ;;  %v2587_v52 = vsub.f32 %v2559_v14, %v2571_v36 }
0x14f5   :  { %v2577_v56 = vpop.xlane.xlu0 %2576  ;;  %v2570_v28 = vpop.xlane.xlu1 %2569 }
0x14f6   :  { %v2581_v27 = vmul.f32 0.015625, %v2577_v56  ;;  %v2572_v29 = vmul.f32 0.015625, %v2570_v28 }
0x14f8   :  { %v2585_v22 = vsub.f32 %v2581_v27, %v2583_v55  ;;  %v2584_v40 = vmul.f32 %v2572_v29, %v2572_v29  ;;  %v2588_v34 = vsub.f32 %v2560_v48, %v2572_v29 }
0x14f9   :  { %v2580_v39 = vpop.xlane.xlu1 %2579 }
0x14fa   :  { %v2589_v30 = vadd.f32 1e-05, %v2585_v22  ;;  %v2582_v41 = vmul.f32 0.015625, %v2580_v39 }
0x14fc   :  { %4004 = vrsqrt.f32 %v2589_v30  ;;  %v2586_v43 = vsub.f32 %v2582_v41, %v2584_v40 }
0x14fe   :  { %v2590_v45 = vadd.f32 1e-05, %v2586_v43  ;;  %v3219_v43 = vld [vmem:[%s5416_s21 + $0x2] ss:$0 sm:$0xff]  ;;  %s4216_s21 = smov [#allocation14]  }
0x14ff   :  { %s2957_s10 = sshll.u32 %s4216_s21, 4  ;;  %s2958_s10 = int_to_ptr.vmem [resolvable:$true] %s2957_s10 }
0x1500   :  { %4006 = vrsqrt.f32 %v2590_v45  ;;  %p4175_p8 = scmp.lt.s32.totalorder %s2958_s10, %s2958_s10 }
0x1509   :  { %v4005_v7 = vpop.eup %4004 }
0x150a   :  { %v2593_v5 = vmul.f32 %v4005_v7, %v2587_v52 }
0x150c   :  { %v2601_v62 = vmul.f32 %v3182_v26, %v2593_v5 }
0x150d   :  { %v4007_v57 = vpop.eup %4006 }
0x150e   :  { %v2594_v60 = vmul.f32 %v4007_v57, %v2588_v34  ;;  %v2609_v2 = vadd.f32 %v3183_v63, %v2601_v62 }
0x1510   :  { %v2602_v1 = vmul.f32 %v3182_v26, %v2594_v60  ;;  %v3220_v26 = vld [vmem:[%s5417_s22 + $0x2] ss:$0 sm:$0xff]  ;;  %s4170_s22 = scalar_lea.vmem %s2958_s10, 256 }
0x1511   :  { %p4171_p7 = scmp.ne.s32.totalorder %s2958_s10, %s4170_s22  ;;  %p4176_p9 = scmp.lt.s32.totalorder %s4170_s22, %s4170_s22 }
0x1512   :  { %v2610_v4 = vadd.f32 %v3183_v63, %v2602_v1  ;;  %v3221_v63 = vld [vmem:[%s5419_s24] ss:$0 sm:$0xff] }
0x1513   :  { %p4177_p10 = por %p4176_p9, %p4175_p8 }
0x1514   :  { %v2611_v6 = vpack.c.bf16 %v2610_v4, %v2609_v2 }
0x1515   :  { %p4178_p11 = pnand %p4177_p10, %p4171_p7 }
0x1516   :  { %3820 = vmatmul.mubr.msk.bf16.vlgmr.msra.gmra.mxu1 %vm257_vm4, %v2611_v6 }
0x1517   :  { %3851 = vmatprep.mubr.msk.bf16.mxu1 %vm4215_vm2, %v4213_v0  ;;  %3844 = vmatpush3.bf16.msra.mxu1 %v3956_v19 }
0x1518   :  { %3845 = vmatprep.subr.bf16.mxu1 %v4213_v0 }
0x151b   :  { %3846 = vmatpush3.bf16.msra.mxu1 %v3957_v24 }
0x151c   :  { %3847 = vmatprep.subr.bf16.mxu1 %v4213_v0 }
0x151f   :  { %3848 = vmatpush3.bf16.msra.mxu1 %v3958_v38 }
0x1520   :  { %3849 = vmatprep.subr.bf16.mxu1 %v4213_v0 }
0x1523   :  { %3850 = vmatpush3.bf16.msra.mxu1 %v3959_v25 }
0x15d6   :  { %v2690_v17 = vpop.f32.mrf.mxu1 }
0x15d7   :  { %v2691_v49 = vadd.f32 %v3185_v50, %v2690_v17 }
0x15d8   :  { %v3821_v23 = vpop.f32.mrf.mxu1 }
0x15d9   :  { %v2697_v15 = vmax.f32 %v2691_v49, 0.0 }
0x15da   :  { %v2693_v32 = vpop.f32.mrf.mxu1 }
0x15db   :  { %v2694_v42 = vadd.f32 %v3185_v50, %v2693_v32 }
0x15dc   :  { %v3822_v11 = vpop.f32.mrf.mxu1 }
0x15dd   :  { %v2698_v53 = vmax.f32 %v2694_v42, 0.0 }
0x15df   :  { %v2699_v54 = vpack.c.bf16 %v2698_v53, %v2697_v15 }
0x15e1   :  { %3840 = vmatmul.mubr.bf16.vlgmr.msra.gmra.mxu0 %v2699_v54 }
0x16a1   :  { %v2807_v61 = vpop.f32.mrf.mxu0 }
0x16a2   :  { %v2808_v10 = vadd.f32 %v3208_v58, %v2807_v61 }
0x16a3   :  { %v3841_v14 = vpop.f32.mrf.mxu0 }
0x16a4   :  { %v2814_v59 = vadd.f32 %v2808_v10, %v2609_v2 }
0x16a5   :  { %v2810_v3 = vpop.f32.mrf.mxu0 }
0x16a6   :  { %v2811_v21 = vadd.f32 %v3208_v58, %v2810_v3  ;;  %v2820_v12 = vsel %vm257_vm4, %v2814_v59, 0.0  ;;  %v2828_v47 = vmul.f32 %v2814_v59, %v2814_v59 }
0x16a7   :  { %2821 = vadd.xlane.f32.xlu0 %v2820_v12  ;;  %v3842_v48 = vpop.f32.mrf.mxu0 }
0x16a8   :  { %v2815_v51 = vadd.f32 %v2811_v21, %v2610_v4  ;;  %v2830_v16 = vsel %vm257_vm4, %v2828_v47, 0.0 }
0x16aa   :  { %v2823_v8 = vsel %vm257_vm4, %v2815_v51, 0.0  ;;  %v2829_v9 = vmul.f32 %v2815_v51, %v2815_v51 }
0x16ab   :  { %2831 = vadd.xlane.f32.xlu0 %v2830_v16  ;;  %2824 = vadd.xlane.f32.xlu1 %v2823_v8 }
0x16ac   :  { %v2833_v37 = vsel %vm257_vm4, %v2829_v9, 0.0 }
0x16af   :  { %2834 = vadd.xlane.f32.xlu1 %v2833_v37 }
0x1730   :  { %v2822_v18 = vpop.xlane.xlu0 %2821 }
0x1731   :  { %v2826_v31 = vmul.f32 0.015625, %v2822_v18 }
0x1733   :  { %v2838_v35 = vmul.f32 %v2826_v31, %v2826_v31  ;;  %v2842_v40 = vsub.f32 %v2814_v59, %v2826_v31 }
0x1734   :  { %v2832_v33 = vpop.xlane.xlu0 %2831  ;;  %v2825_v20 = vpop.xlane.xlu1 %2824 }
0x1735   :  { %v2836_v36 = vmul.f32 0.015625, %v2832_v33  ;;  %v2827_v56 = vmul.f32 0.015625, %v2825_v20 }
0x1737   :  { %v2840_v28 = vsub.f32 %v2836_v36, %v2838_v35  ;;  %v2839_v29 = vmul.f32 %v2827_v56, %v2827_v56  ;;  %v2843_v45 = vsub.f32 %v2815_v51, %v2827_v56 }
0x1738   :  { %v2835_v55 = vpop.xlane.xlu1 %2834 }
0x1739   :  { %v2844_v27 = vadd.f32 1e-05, %v2840_v28  ;;  %v2837_v22 = vmul.f32 0.015625, %v2835_v55 }
0x173b   :  { %4008 = vrsqrt.f32 %v2844_v27  ;;  %v2841_v39 = vsub.f32 %v2837_v22, %v2839_v29 }
0x173d   :  { %v2845_v30 = vadd.f32 1e-05, %v2841_v39 }
0x173f   :  { %4010 = vrsqrt.f32 %v2845_v30 }
0x1748   :  { %v4009_v41 = vpop.eup %4008 }
0x1749   :  { %v2848_v0 = vmul.f32 %v4009_v41, %v2842_v40 }
0x174b   :  { %v2856_v5 = vmul.f32 %v3219_v43, %v2848_v0 }
0x174c   :  { %v4011_v52 = vpop.eup %4010 }
0x174d   :  { %v2849_v7 = vmul.f32 %v4011_v52, %v2843_v45  ;;  %v2864_v57 = vadd.f32 %v3220_v26, %v2856_v5 }
0x174f   :  { %v2857_v34 = vmul.f32 %v3219_v43, %v2849_v7 }
0x1751   :  { %v2865_v60 = vadd.f32 %v3220_v26, %v2857_v34 }
0x1753   :  { %v2866_v62 = vpack.c.bf16 %v2865_v60, %v2864_v57 }
0x1755   :  { %3852 = vmatmul.mubr.msk.bf16.vlgmr.msra.gmra.mxu1 %vm257_vm4, %v2866_v62 }
0x1815   :  { %v2943_v1 = vpop.f32.mrf.mxu1 }
0x1816   :  { %v2944_v2 = vadd.f32 %v3221_v63, %v2943_v1 }
0x1817   :  { %v3853_v4 = vpop.f32.mrf.mxu1 }
0x1818   :  { %2950 = vst [vmem:[#allocation14] sm:$0xff] %v2944_v2 }
0x1819   :  { %v2946_v6 = vpop.f32.mrf.mxu1 }
0x181a   :  { %v2947_v13 = vadd.f32 %v3221_v63, %v2946_v6 }
0x181b   :  { %v3854_v44 = vpop.f32.mrf.mxu1 }
0x181c   :  { %2951 = vst [vmem:[#allocation14 + $0x8] sm:$0xff] %v2947_v13 }
0x181d   :  { %4181 = shalt.err (!%p4178_p11)
}
0x181e   :  { %s5446_s25 = sld [smem:[#allocation30_spill]] }
0x1824   :  { %2963 = dma.vmem_to_hbm [thread:$0]  %s2958_s10, 256, %s5446_s25, [#allocation4], %s4202_s3, %s4202_s3, %s4203_s26  }
0x1825   :  { %4198 = dma.done.wait [#allocation4], 256  }
0x1826   :  { %4199 = vsyncadd [#allocation4], 4294967040 }
0x1827   :  { %2967 = vsyncpa [#allocation3], 1 }
0x1828   :  { %2968 = vsyncpa [#allocation6], 1 }
0x1829   :  { %2969 = vsyncpa [#allocation9], 1 }
0x182a   :  { %2970 = vsyncpa [#allocation12], 1 }
0x182b   :  { %2971 = vsyncpa [#allocation4], 1 }

</bundles_post_ra>
